<compile_context>
chip_gen: v7x
topology: tpu7x:2x2x1
jax: 0.10.0
libtpu: 0.0.40
codegen_flags: <defaults>
</compile_context>

<pallas_src>
import jax
import jax.numpy as jnp
from jax.experimental import pallas as pl
from jax.experimental.pallas import tpu as pltpu


# ----------------------- synthetic config (stands in for AutoConfig) ----------
VOCAB = 100          # new_num_tokens (resize_token_embeddings target)
MAX_POS = 16
TYPE_VOCAB = 2
HIDDEN = 32
N_HEADS = 2
HEAD_DIM = HIDDEN // N_HEADS
FFN = 64
N_LAYERS = 2
NUM_LABELS = 30      # config.num_labels (KLUE-RE style)
LN_EPS = 1e-12


# ----------------------------- in-kernel helpers ------------------------------

def _sigmoid(x):
    # hand-rolled (exp + divide) to keep lowering simple; f32 math
    return 1.0 / (1.0 + jnp.exp(-x))


def _layernorm(x, g, b, eps=LN_EPS):
    mu = jnp.mean(x, axis=-1, keepdims=True)
    var = jnp.mean((x - mu) * (x - mu), axis=-1, keepdims=True)
    return (x - mu) * jax.lax.rsqrt(var + eps) * g + b


def _mm(x, w, b=None):
    """bf16 operands, f32 accumulation (autocast-style matmul)."""
    y = jnp.dot(x.astype(jnp.bfloat16), w, preferred_element_type=jnp.float32)
    if b is not None:
        y = y + b
    return y


# ------------------------------- fused kernel ---------------------------------

def _bigru_re_kernel(*refs):
    out_ref = refs[-1]
    it = iter(refs[:-1])

    emb_ref = next(it)
    mask_ref = next(it)
    emb_g = next(it)[...]
    emb_b = next(it)[...]
    layers = []
    for _ in range(N_LAYERS):
        layers.append({k: next(it)[...] for k in (
            "qkv_w", "qkv_b", "o_w", "o_b", "ln1_g", "ln1_b",
            "f1_w", "f1_b", "f2_w", "f2_b", "ln2_g", "ln2_b")})
    gru_wih = next(it)[...]          # [H, 6H]   (fwd gates | bwd gates)
    gru_bih = next(it)[...]          # [1, 6H]
    gru_whh = next(it)[...]          # [2H, 6H]  block-diagonal (fwd | bwd)
    gru_bhh = next(it)[...]          # [1, 6H]
    cls_w = next(it)[...]
    cls_b = next(it)[...]

    B, S = mask_ref.shape
    H = HIDDEN
    Dh = HEAD_DIM
    scale = 1.0 / (Dh ** 0.5)

    add_mask = (1.0 - mask_ref[...]) * -1e9                 # [B, S] additive mask

    # --- embedding LayerNorm (f32) ---
    x = _layernorm(emb_ref[...], emb_g, emb_b)              # [B*S, H]

    # --- transformer encoder (post-LN BERT style) ---
    for lp in layers:
        qkv = _mm(x, lp["qkv_w"], lp["qkv_b"])              # fused QKV: [B*S, 3H]
        q = qkv[:, 0:H] * scale                             # fold softmax scale into q
        k = qkv[:, H:2 * H]
        v = qkv[:, 2 * H:3 * H]

        ctx_rows = []
        for b in range(B):                                  # flattened (B, nH) loops,
            rb = slice(b * S, (b + 1) * S)                  # 2-D dots per pair
            qb = q[rb].astype(jnp.bfloat16)                 # [S, H]
            kb = k[rb].astype(jnp.bfloat16)
            vb = v[rb].astype(jnp.bfloat16)
            mb = add_mask[b:b + 1, :]                       # [1, S]
            heads = []
            for hh in range(N_HEADS):
                cs = slice(hh * Dh, (hh + 1) * Dh)
                s = jax.lax.dot_general(                    # q @ k^T  -> [S, S]
                    qb[:, cs], kb[:, cs],
                    dimension_numbers=(((1,), (1,)), ((), ())),
                    preferred_element_type=jnp.float32)
                s = s + mb
                s = s - jnp.max(s, axis=-1, keepdims=True)
                p = jnp.exp(s)
                p = p * pl.reciprocal(jnp.sum(p, axis=-1, keepdims=True),
                                      approx=True)
                heads.append(jnp.dot(p.astype(jnp.bfloat16), vb[:, cs],
                                     preferred_element_type=jnp.float32))
            ctx_rows.append(jnp.concatenate(heads, axis=-1))   # [S, H]
        ctx = jnp.concatenate(ctx_rows, axis=0)                # [B*S, H]

        attn_out = _mm(ctx, lp["o_w"], lp["o_b"])
        x = _layernorm(x + attn_out, lp["ln1_g"], lp["ln1_b"])  # residual+LN epilogue

        ff = jax.nn.gelu(_mm(x, lp["f1_w"], lp["f1_b"]))        # tanh-approx GELU (f32)
        ff = _mm(ff, lp["f2_w"], lp["f2_b"])
        x = _layernorm(x + ff, lp["ln2_g"], lp["ln2_b"])

    # --- joint bidirectional GRU over last_hidden_state (runs over all S
    #     positions, no masking, exactly like nn.GRU on a padded batch).
    #     Forward processes position t, backward processes position S-1-t in
    #     the SAME unrolled step; their hidden-recurrence matmuls are fused via
    #     the block-diagonal gru_whh (one MXU op per timestep). ---
    gi_all = _mm(x, gru_wih, gru_bih)                        # [B*S, 6H] all input proj at once
    gi_all = gi_all.reshape(B, S, 6 * H)                     # fwd gates 0:3H | bwd gates 3H:6H
    h = jnp.zeros((B, 2 * H), jnp.float32)                   # [h_fwd | h_bwd]

    def _pick(a, g):
        # gate g (0=r, 1=z, 2=n) for both directions -> [B, 2H] laid out [fwd | bwd]
        return jnp.concatenate(
            [a[:, g * H:(g + 1) * H], a[:, (3 + g) * H:(4 + g) * H]], axis=-1)

    for t in range(S):                                       # static unroll (S=8)
        gi = jnp.concatenate(
            [gi_all[:, t, 0:3 * H], gi_all[:, S - 1 - t, 3 * H:6 * H]], axis=-1)
        gh = _mm(h, gru_whh, gru_bhh)                        # [B, 6H] block-diag recurrence
        r = _sigmoid(_pick(gi, 0) + _pick(gh, 0))
        z = _sigmoid(_pick(gi, 1) + _pick(gh, 1))
        n = jnp.tanh(_pick(gi, 2) + r * _pick(gh, 2))
        h = (1.0 - z) * n + z * h                            # update both directions at once

    # h is already cat(next_hidden[0], next_hidden[1]) == [h_fwd | h_bwd]: [B, 2H]
    logits = _mm(h, cls_w, cls_b)                            # [B, NUM_LABELS]
    out_ref[...] = logits.astype(out_ref.dtype)


# ------------------------------- wrapper / glue --------------------------------

def _full_spec(shape):
    ndim = len(shape)

    def index_map():
        return (0,) * ndim

    return pl.BlockSpec(shape, index_map)


def bigru_re_forward(params, input_ids, token_type_ids, attention_mask, labels=None):
    """Mirrors BiGRUREModel.forward -> {'logits': [B, num_labels]}."""
    B, S = input_ids.shape
    H = HIDDEN
    positions = jnp.arange(S)
    # Embedding-table gathers are data-dependent; they stay as plain-JAX glue.
    emb = (jnp.take(params["word_emb"], input_ids, axis=0)
           + jnp.take(params["pos_emb"], positions, axis=0)[None, :, :]
           + jnp.take(params["type_emb"], token_type_ids, axis=0))
    emb = emb.reshape(B * S, H)
    mask_f = attention_mask.astype(jnp.float32)

    # One-time GRU weight layout prep (tiny; fuses into the XLA prologue):
    #   * both directions' input projections -> single [H, 6H] matmul operand
    #   * both directions' hidden projections -> block-diagonal [2H, 6H] so the
    #     serialized recurrence issues ONE MXU op per timestep.
    g = params["gru"]
    wih = jnp.concatenate([g["wih_f"], g["wih_b"]], axis=1)            # [H, 6H] bf16
    bih = jnp.concatenate([g["bih_f"], g["bih_b"]], axis=1)            # [1, 6H] f32
    whh = jnp.zeros((2 * H, 6 * H), jnp.bfloat16)
    whh = whh.at[0:H, 0:3 * H].set(g["whh_f"])
    whh = whh.at[H:2 * H, 3 * H:6 * H].set(g["whh_b"])
    bhh = jnp.concatenate([g["bhh_f"], g["bhh_b"]], axis=1)

    flat = [emb, mask_f, params["emb_ln_g"], params["emb_ln_b"]]
    for lp in params["layers"]:
        flat += [lp["qkv_w"], lp["qkv_b"], lp["o_w"], lp["o_b"],
                 lp["ln1_g"], lp["ln1_b"],
                 lp["ffn1_w"], lp["ffn1_b"], lp["ffn2_w"], lp["ffn2_b"],
                 lp["ln2_g"], lp["ln2_b"]]
    flat += [wih, bih, whh, bhh]
    flat += [params["cls_w"], params["cls_b"]]

    logits = pl.pallas_call(
        _bigru_re_kernel,
        out_shape=jax.ShapeDtypeStruct((B, NUM_LABELS), jnp.float32),
        in_specs=[_full_spec(a.shape) for a in flat],
        out_specs=_full_spec((B, NUM_LABELS)),
        compiler_params=pltpu.CompilerParams(vmem_limit_bytes=32 * 1024 * 1024),
    )(*flat)
    # TODO(synk): `labels` is accepted but (as in the PyTorch module) loss is not returned.
    return {"logits": logits}


# ---------------------------- deterministic weights ----------------------------

def init_params(key):
    keys = jax.random.split(key, 3 + N_LAYERS + 2)

    def bf16_normal(k, shape, std):
        return (std * jax.random.normal(k, shape, jnp.float32)).astype(jnp.bfloat16)

    params = {
        "word_emb": 0.02 * jax.random.normal(keys[0], (VOCAB, HIDDEN), jnp.float32),
        "pos_emb": 0.02 * jax.random.normal(keys[1], (MAX_POS, HIDDEN), jnp.float32),
        "type_emb": 0.02 * jax.random.normal(keys[2], (TYPE_VOCAB, HIDDEN), jnp.float32),
        "emb_ln_g": jnp.ones((1, HIDDEN), jnp.float32),
        "emb_ln_b": jnp.zeros((1, HIDDEN), jnp.float32),
        "layers": [],
    }
    ones_h = jnp.ones((1, HIDDEN), jnp.float32)
    zeros_h = jnp.zeros((1, HIDDEN), jnp.float32)
    for i in range(N_LAYERS):
        lk = jax.random.split(keys[3 + i], 4)
        params["layers"].append({
            "qkv_w": bf16_normal(lk[0], (HIDDEN, 3 * HIDDEN), 0.02),
            "qkv_b": jnp.zeros((1, 3 * HIDDEN), jnp.float32),
            "o_w": bf16_normal(lk[1], (HIDDEN, HIDDEN), 0.02),
            "o_b": zeros_h,
            "ln1_g": ones_h, "ln1_b": zeros_h,
            "ffn1_w": bf16_normal(lk[2], (HIDDEN, FFN), 0.02),
            "ffn1_b": jnp.zeros((1, FFN), jnp.float32),
            "ffn2_w": bf16_normal(lk[3], (FFN, HIDDEN), 0.02),
            "ffn2_b": zeros_h,
            "ln2_g": ones_h, "ln2_b": zeros_h,
        })
    # GRU: xavier_normal weights, zero biases (matches init_gru()).
    gk = jax.random.split(keys[3 + N_LAYERS], 4)
    xavier = (2.0 / (HIDDEN + 3 * HIDDEN)) ** 0.5
    zeros_3h = jnp.zeros((1, 3 * HIDDEN), jnp.float32)
    params["gru"] = {
        "wih_f": bf16_normal(gk[0], (HIDDEN, 3 * HIDDEN), xavier),
        "whh_f": bf16_normal(gk[1], (HIDDEN, 3 * HIDDEN), xavier),
        "bih_f": zeros_3h, "bhh_f": zeros_3h,
        "wih_b": bf16_normal(gk[2], (HIDDEN, 3 * HIDDEN), xavier),
        "whh_b": bf16_normal(gk[3], (HIDDEN, 3 * HIDDEN), xavier),
        "bih_b": zeros_3h, "bhh_b": zeros_3h,
    }
    # Classifier: kaiming_normal(fan_in) weight, zero bias.
    kaiming = (2.0 / (2 * HIDDEN)) ** 0.5
    params["cls_w"] = bf16_normal(keys[3 + N_LAYERS + 1], (2 * HIDDEN, NUM_LABELS), kaiming)
    params["cls_b"] = jnp.zeros((1, NUM_LABELS), jnp.float32)
    return params


if __name__ == "__main__":
    key = jax.random.PRNGKey(0)
    pkey, ikey = jax.random.split(key)
    params = init_params(pkey)

    B, S = 2, 8
    input_ids = jax.random.randint(ikey, (B, S), 0, VOCAB, dtype=jnp.int32)
    token_type_ids = jnp.zeros((B, S), jnp.int32)
    attention_mask = jnp.ones((B, S), jnp.int32).at[1, 6:].set(0)   # pad last 2 of seq 1

    fwd = jax.jit(bigru_re_forward)
    out = fwd(params, input_ids, token_type_ids, attention_mask)
    logits = jax.block_until_ready(out["logits"])
    assert logits.shape == (B, NUM_LABELS)
    assert bool(jnp.all(jnp.isfinite(logits)))
    print("KERNEL_OK")
</pallas_src>

<mosaic_0001>
module attributes {stable_mosaic.version = 11 : i64} {
  func.func @_bigru_re_kernel(%arg0: memref<16x32xf32, #tpu.memory_space<vmem>>, %arg1: memref<2x8xf32, #tpu.memory_space<vmem>>, %arg2: memref<1x32xf32, #tpu.memory_space<vmem>>, %arg3: memref<1x32xf32, #tpu.memory_space<vmem>>, %arg4: memref<32x96xbf16, #tpu.memory_space<vmem>>, %arg5: memref<1x96xf32, #tpu.memory_space<vmem>>, %arg6: memref<32x32xbf16, #tpu.memory_space<vmem>>, %arg7: memref<1x32xf32, #tpu.memory_space<vmem>>, %arg8: memref<1x32xf32, #tpu.memory_space<vmem>>, %arg9: memref<1x32xf32, #tpu.memory_space<vmem>>, %arg10: memref<32x64xbf16, #tpu.memory_space<vmem>>, %arg11: memref<1x64xf32, #tpu.memory_space<vmem>>, %arg12: memref<64x32xbf16, #tpu.memory_space<vmem>>, %arg13: memref<1x32xf32, #tpu.memory_space<vmem>>, %arg14: memref<1x32xf32, #tpu.memory_space<vmem>>, %arg15: memref<1x32xf32, #tpu.memory_space<vmem>>, %arg16: memref<32x96xbf16, #tpu.memory_space<vmem>>, %arg17: memref<1x96xf32, #tpu.memory_space<vmem>>, %arg18: memref<32x32xbf16, #tpu.memory_space<vmem>>, %arg19: memref<1x32xf32, #tpu.memory_space<vmem>>, %arg20: memref<1x32xf32, #tpu.memory_space<vmem>>, %arg21: memref<1x32xf32, #tpu.memory_space<vmem>>, %arg22: memref<32x64xbf16, #tpu.memory_space<vmem>>, %arg23: memref<1x64xf32, #tpu.memory_space<vmem>>, %arg24: memref<64x32xbf16, #tpu.memory_space<vmem>>, %arg25: memref<1x32xf32, #tpu.memory_space<vmem>>, %arg26: memref<1x32xf32, #tpu.memory_space<vmem>>, %arg27: memref<1x32xf32, #tpu.memory_space<vmem>>, %arg28: memref<32x192xbf16, #tpu.memory_space<vmem>>, %arg29: memref<1x192xf32, #tpu.memory_space<vmem>>, %arg30: memref<64x192xbf16, #tpu.memory_space<vmem>>, %arg31: memref<1x192xf32, #tpu.memory_space<vmem>>, %arg32: memref<64x30xbf16, #tpu.memory_space<vmem>>, %arg33: memref<1x30xf32, #tpu.memory_space<vmem>>, %arg34: memref<2x30xf32, #tpu.memory_space<vmem>>) attributes {dimension_semantics = [], scalar_prefetch = 0 : i64, scratch_operands = 0 : i64, tpu.core_type = #tpu.core_type<tc>} {
    %c0 = arith.constant 0 : index
    %c0_0 = arith.constant 0 : index
    %0 = vector.load %arg2[%c0, %c0_0] : memref<1x32xf32, #tpu.memory_space<vmem>>, vector<1x32xf32>
    %c0_1 = arith.constant 0 : index
    %c0_2 = arith.constant 0 : index
    %1 = vector.load %arg3[%c0_1, %c0_2] : memref<1x32xf32, #tpu.memory_space<vmem>>, vector<1x32xf32>
    %c0_3 = arith.constant 0 : index
    %c0_4 = arith.constant 0 : index
    %2 = vector.load %arg4[%c0_3, %c0_4] : memref<32x96xbf16, #tpu.memory_space<vmem>>, vector<32x96xbf16>
    %c0_5 = arith.constant 0 : index
    %c0_6 = arith.constant 0 : index
    %3 = vector.load %arg5[%c0_5, %c0_6] : memref<1x96xf32, #tpu.memory_space<vmem>>, vector<1x96xf32>
    %c0_7 = arith.constant 0 : index
    %c0_8 = arith.constant 0 : index
    %4 = vector.load %arg6[%c0_7, %c0_8] : memref<32x32xbf16, #tpu.memory_space<vmem>>, vector<32x32xbf16>
    %c0_9 = arith.constant 0 : index
    %c0_10 = arith.constant 0 : index
    %5 = vector.load %arg7[%c0_9, %c0_10] : memref<1x32xf32, #tpu.memory_space<vmem>>, vector<1x32xf32>
    %c0_11 = arith.constant 0 : index
    %c0_12 = arith.constant 0 : index
    %6 = vector.load %arg8[%c0_11, %c0_12] : memref<1x32xf32, #tpu.memory_space<vmem>>, vector<1x32xf32>
    %c0_13 = arith.constant 0 : index
    %c0_14 = arith.constant 0 : index
    %7 = vector.load %arg9[%c0_13, %c0_14] : memref<1x32xf32, #tpu.memory_space<vmem>>, vector<1x32xf32>
    %c0_15 = arith.constant 0 : index
    %c0_16 = arith.constant 0 : index
    %8 = vector.load %arg10[%c0_15, %c0_16] : memref<32x64xbf16, #tpu.memory_space<vmem>>, vector<32x64xbf16>
    %c0_17 = arith.constant 0 : index
    %c0_18 = arith.constant 0 : index
    %9 = vector.load %arg11[%c0_17, %c0_18] : memref<1x64xf32, #tpu.memory_space<vmem>>, vector<1x64xf32>
    %c0_19 = arith.constant 0 : index
    %c0_20 = arith.constant 0 : index
    %10 = vector.load %arg12[%c0_19, %c0_20] : memref<64x32xbf16, #tpu.memory_space<vmem>>, vector<64x32xbf16>
    %c0_21 = arith.constant 0 : index
    %c0_22 = arith.constant 0 : index
    %11 = vector.load %arg13[%c0_21, %c0_22] : memref<1x32xf32, #tpu.memory_space<vmem>>, vector<1x32xf32>
    %c0_23 = arith.constant 0 : index
    %c0_24 = arith.constant 0 : index
    %12 = vector.load %arg14[%c0_23, %c0_24] : memref<1x32xf32, #tpu.memory_space<vmem>>, vector<1x32xf32>
    %c0_25 = arith.constant 0 : index
    %c0_26 = arith.constant 0 : index
    %13 = vector.load %arg15[%c0_25, %c0_26] : memref<1x32xf32, #tpu.memory_space<vmem>>, vector<1x32xf32>
    %c0_27 = arith.constant 0 : index
    %c0_28 = arith.constant 0 : index
    %14 = vector.load %arg16[%c0_27, %c0_28] : memref<32x96xbf16, #tpu.memory_space<vmem>>, vector<32x96xbf16>
    %c0_29 = arith.constant 0 : index
    %c0_30 = arith.constant 0 : index
    %15 = vector.load %arg17[%c0_29, %c0_30] : memref<1x96xf32, #tpu.memory_space<vmem>>, vector<1x96xf32>
    %c0_31 = arith.constant 0 : index
    %c0_32 = arith.constant 0 : index
    %16 = vector.load %arg18[%c0_31, %c0_32] : memref<32x32xbf16, #tpu.memory_space<vmem>>, vector<32x32xbf16>
    %c0_33 = arith.constant 0 : index
    %c0_34 = arith.constant 0 : index
    %17 = vector.load %arg19[%c0_33, %c0_34] : memref<1x32xf32, #tpu.memory_space<vmem>>, vector<1x32xf32>
    %c0_35 = arith.constant 0 : index
    %c0_36 = arith.constant 0 : index
    %18 = vector.load %arg20[%c0_35, %c0_36] : memref<1x32xf32, #tpu.memory_space<vmem>>, vector<1x32xf32>
    %c0_37 = arith.constant 0 : index
    %c0_38 = arith.constant 0 : index
    %19 = vector.load %arg21[%c0_37, %c0_38] : memref<1x32xf32, #tpu.memory_space<vmem>>, vector<1x32xf32>
    %c0_39 = arith.constant 0 : index
    %c0_40 = arith.constant 0 : index
    %20 = vector.load %arg22[%c0_39, %c0_40] : memref<32x64xbf16, #tpu.memory_space<vmem>>, vector<32x64xbf16>
    %c0_41 = arith.constant 0 : index
    %c0_42 = arith.constant 0 : index
    %21 = vector.load %arg23[%c0_41, %c0_42] : memref<1x64xf32, #tpu.memory_space<vmem>>, vector<1x64xf32>
    %c0_43 = arith.constant 0 : index
    %c0_44 = arith.constant 0 : index
    %22 = vector.load %arg24[%c0_43, %c0_44] : memref<64x32xbf16, #tpu.memory_space<vmem>>, vector<64x32xbf16>
    %c0_45 = arith.constant 0 : index
    %c0_46 = arith.constant 0 : index
    %23 = vector.load %arg25[%c0_45, %c0_46] : memref<1x32xf32, #tpu.memory_space<vmem>>, vector<1x32xf32>
    %c0_47 = arith.constant 0 : index
    %c0_48 = arith.constant 0 : index
    %24 = vector.load %arg26[%c0_47, %c0_48] : memref<1x32xf32, #tpu.memory_space<vmem>>, vector<1x32xf32>
    %c0_49 = arith.constant 0 : index
    %c0_50 = arith.constant 0 : index
    %25 = vector.load %arg27[%c0_49, %c0_50] : memref<1x32xf32, #tpu.memory_space<vmem>>, vector<1x32xf32>
    %c0_51 = arith.constant 0 : index
    %c0_52 = arith.constant 0 : index
    %26 = vector.load %arg28[%c0_51, %c0_52] : memref<32x192xbf16, #tpu.memory_space<vmem>>, vector<32x192xbf16>
    %c0_53 = arith.constant 0 : index
    %c0_54 = arith.constant 0 : index
    %27 = vector.load %arg29[%c0_53, %c0_54] : memref<1x192xf32, #tpu.memory_space<vmem>>, vector<1x192xf32>
    %c0_55 = arith.constant 0 : index
    %c0_56 = arith.constant 0 : index
    %28 = vector.load %arg30[%c0_55, %c0_56] : memref<64x192xbf16, #tpu.memory_space<vmem>>, vector<64x192xbf16>
    %c0_57 = arith.constant 0 : index
    %c0_58 = arith.constant 0 : index
    %29 = vector.load %arg31[%c0_57, %c0_58] : memref<1x192xf32, #tpu.memory_space<vmem>>, vector<1x192xf32>
    %c0_59 = arith.constant 0 : index
    %c0_60 = arith.constant 0 : index
    %30 = vector.load %arg32[%c0_59, %c0_60] : memref<64x30xbf16, #tpu.memory_space<vmem>>, vector<64x30xbf16>
    %c0_61 = arith.constant 0 : index
    %c0_62 = arith.constant 0 : index
    %31 = vector.load %arg33[%c0_61, %c0_62] : memref<1x30xf32, #tpu.memory_space<vmem>>, vector<1x30xf32>
    %c0_63 = arith.constant 0 : index
    %c0_64 = arith.constant 0 : index
    %32 = vector.load %arg1[%c0_63, %c0_64] : memref<2x8xf32, #tpu.memory_space<vmem>>, vector<2x8xf32>
    %cst = arith.constant 1.000000e+00 : f32
    %33 = vector.broadcast %cst : f32 to vector<2x8xf32>
    %34 = arith.subf %33, %32 : vector<2x8xf32>
    %cst_65 = arith.constant -1.000000e+09 : f32
    %35 = vector.broadcast %cst_65 : f32 to vector<2x8xf32>
    %36 = arith.mulf %34, %35 : vector<2x8xf32>
    %c0_66 = arith.constant 0 : index
    %c0_67 = arith.constant 0 : index
    %37 = vector.load %arg0[%c0_66, %c0_67] : memref<16x32xf32, #tpu.memory_space<vmem>>, vector<16x32xf32>
    %cst_68 = arith.constant dense<0.000000e+00> : vector<16xf32>
    %38 = vector.multi_reduction <add>, %37, %cst_68 [1] : vector<16x32xf32> to vector<16xf32>
    %39 = vector.shape_cast %38 : vector<16xf32> to vector<16x1xf32>
    %cst_69 = arith.constant 3.200000e+01 : f32
    %40 = vector.broadcast %cst_69 : f32 to vector<16x1xf32>
    %41 = arith.divf %39, %40 : vector<16x1xf32>
    %42 = vector.broadcast %41 : vector<16x1xf32> to vector<16x32xf32>
    %43 = arith.subf %37, %42 : vector<16x32xf32>
    %44 = vector.broadcast %41 : vector<16x1xf32> to vector<16x32xf32>
    %45 = arith.subf %37, %44 : vector<16x32xf32>
    %46 = arith.mulf %43, %45 : vector<16x32xf32>
    %cst_70 = arith.constant dense<0.000000e+00> : vector<16xf32>
    %47 = vector.multi_reduction <add>, %46, %cst_70 [1] : vector<16x32xf32> to vector<16xf32>
    %48 = vector.shape_cast %47 : vector<16xf32> to vector<16x1xf32>
    %cst_71 = arith.constant 3.200000e+01 : f32
    %49 = vector.broadcast %cst_71 : f32 to vector<16x1xf32>
    %50 = arith.divf %48, %49 : vector<16x1xf32>
    %51 = vector.broadcast %41 : vector<16x1xf32> to vector<16x32xf32>
    %52 = arith.subf %37, %51 : vector<16x32xf32>
    %cst_72 = arith.constant 9.99999996E-13 : f32
    %53 = vector.broadcast %cst_72 : f32 to vector<16x1xf32>
    %54 = arith.addf %50, %53 : vector<16x1xf32>
    %55 = math.rsqrt %54 : vector<16x1xf32>
    %56 = vector.broadcast %55 : vector<16x1xf32> to vector<16x32xf32>
    %57 = arith.mulf %52, %56 : vector<16x32xf32>
    %58 = vector.broadcast %0 : vector<1x32xf32> to vector<16x32xf32>
    %59 = arith.mulf %57, %58 : vector<16x32xf32>
    %60 = vector.broadcast %1 : vector<1x32xf32> to vector<16x32xf32>
    %61 = arith.addf %59, %60 : vector<16x32xf32>
    %62 = arith.truncf %61 : vector<16x32xf32> to vector<16x32xbf16>
    %cst_73 = arith.constant dense<0.000000e+00> : vector<16x96xf32>
    %63 = tpu.matmul %62, %2, %cst_73 {dimension_numbers = #tpu.dot_dimension_numbers<[1], [0], [0], [1], [0, 0, 1, 1], [], []>} : vector<16x32xbf16>, vector<32x96xbf16>, vector<16x96xf32> -> vector<16x96xf32>
    %64 = vector.broadcast %3 : vector<1x96xf32> to vector<16x96xf32>
    %65 = arith.addf %63, %64 : vector<16x96xf32>
    %66 = vector.extract_strided_slice %65 {offsets = [0, 0], sizes = [16, 32], strides = [1, 1]} : vector<16x96xf32> to vector<16x32xf32>
    %cst_74 = arith.constant 2.500000e-01 : f32
    %67 = vector.broadcast %cst_74 : f32 to vector<16x32xf32>
    %68 = arith.mulf %66, %67 : vector<16x32xf32>
    %69 = vector.extract_strided_slice %65 {offsets = [0, 32], sizes = [16, 32], strides = [1, 1]} : vector<16x96xf32> to vector<16x32xf32>
    %70 = vector.extract_strided_slice %65 {offsets = [0, 64], sizes = [16, 32], strides = [1, 1]} : vector<16x96xf32> to vector<16x32xf32>
    %71 = vector.extract_strided_slice %68 {offsets = [0, 0], sizes = [8, 32], strides = [1, 1]} : vector<16x32xf32> to vector<8x32xf32>
    %72 = arith.truncf %71 : vector<8x32xf32> to vector<8x32xbf16>
    %73 = vector.extract_strided_slice %69 {offsets = [0, 0], sizes = [8, 32], strides = [1, 1]} : vector<16x32xf32> to vector<8x32xf32>
    %74 = arith.truncf %73 : vector<8x32xf32> to vector<8x32xbf16>
    %75 = vector.extract_strided_slice %70 {offsets = [0, 0], sizes = [8, 32], strides = [1, 1]} : vector<16x32xf32> to vector<8x32xf32>
    %76 = arith.truncf %75 : vector<8x32xf32> to vector<8x32xbf16>
    %77 = vector.extract_strided_slice %36 {offsets = [0, 0], sizes = [1, 8], strides = [1, 1]} : vector<2x8xf32> to vector<1x8xf32>
    %78 = vector.extract_strided_slice %72 {offsets = [0, 0], sizes = [8, 16], strides = [1, 1]} : vector<8x32xbf16> to vector<8x16xbf16>
    %79 = vector.extract_strided_slice %74 {offsets = [0, 0], sizes = [8, 16], strides = [1, 1]} : vector<8x32xbf16> to vector<8x16xbf16>
    %cst_75 = arith.constant dense<0.000000e+00> : vector<8x8xf32>
    %80 = tpu.matmul %78, %79, %cst_75 {dimension_numbers = #tpu.dot_dimension_numbers<[1], [1], [0], [0], [0, 0, 1, 0], [], []>} : vector<8x16xbf16>, vector<8x16xbf16>, vector<8x8xf32> -> vector<8x8xf32>
    %81 = vector.broadcast %77 : vector<1x8xf32> to vector<8x8xf32>
    %82 = arith.addf %80, %81 : vector<8x8xf32>
    %cst_76 = arith.constant dense<0xFF800000> : vector<8xf32>
    %83 = vector.multi_reduction <maximumf>, %82, %cst_76 [1] : vector<8x8xf32> to vector<8xf32>
    %84 = vector.shape_cast %83 : vector<8xf32> to vector<8x1xf32>
    %85 = vector.broadcast %84 : vector<8x1xf32> to vector<8x8xf32>
    %86 = arith.subf %82, %85 : vector<8x8xf32>
    %87 = math.exp %86 : vector<8x8xf32>
    %cst_77 = arith.constant dense<0.000000e+00> : vector<8xf32>
    %88 = vector.multi_reduction <add>, %87, %cst_77 [1] : vector<8x8xf32> to vector<8xf32>
    %89 = vector.shape_cast %88 : vector<8xf32> to vector<8x1xf32>
    %90 = tpu.reciprocal %89 {approx = true} : vector<8x1xf32> -> vector<8x1xf32>
    %91 = vector.broadcast %90 : vector<8x1xf32> to vector<8x8xf32>
    %92 = arith.mulf %87, %91 : vector<8x8xf32>
    %93 = arith.truncf %92 : vector<8x8xf32> to vector<8x8xbf16>
    %94 = vector.extract_strided_slice %76 {offsets = [0, 0], sizes = [8, 16], strides = [1, 1]} : vector<8x32xbf16> to vector<8x16xbf16>
    %cst_78 = arith.constant dense<0.000000e+00> : vector<8x16xf32>
    %95 = tpu.matmul %93, %94, %cst_78 {dimension_numbers = #tpu.dot_dimension_numbers<[1], [0], [0], [1], [0, 0, 1, 1], [], []>} : vector<8x8xbf16>, vector<8x16xbf16>, vector<8x16xf32> -> vector<8x16xf32>
    %96 = vector.extract_strided_slice %72 {offsets = [0, 16], sizes = [8, 16], strides = [1, 1]} : vector<8x32xbf16> to vector<8x16xbf16>
    %97 = vector.extract_strided_slice %74 {offsets = [0, 16], sizes = [8, 16], strides = [1, 1]} : vector<8x32xbf16> to vector<8x16xbf16>
    %cst_79 = arith.constant dense<0.000000e+00> : vector<8x8xf32>
    %98 = tpu.matmul %96, %97, %cst_79 {dimension_numbers = #tpu.dot_dimension_numbers<[1], [1], [0], [0], [0, 0, 1, 0], [], []>} : vector<8x16xbf16>, vector<8x16xbf16>, vector<8x8xf32> -> vector<8x8xf32>
    %99 = vector.broadcast %77 : vector<1x8xf32> to vector<8x8xf32>
    %100 = arith.addf %98, %99 : vector<8x8xf32>
    %cst_80 = arith.constant dense<0xFF800000> : vector<8xf32>
    %101 = vector.multi_reduction <maximumf>, %100, %cst_80 [1] : vector<8x8xf32> to vector<8xf32>
    %102 = vector.shape_cast %101 : vector<8xf32> to vector<8x1xf32>
    %103 = vector.broadcast %102 : vector<8x1xf32> to vector<8x8xf32>
    %104 = arith.subf %100, %103 : vector<8x8xf32>
    %105 = math.exp %104 : vector<8x8xf32>
    %cst_81 = arith.constant dense<0.000000e+00> : vector<8xf32>
    %106 = vector.multi_reduction <add>, %105, %cst_81 [1] : vector<8x8xf32> to vector<8xf32>
    %107 = vector.shape_cast %106 : vector<8xf32> to vector<8x1xf32>
    %108 = tpu.reciprocal %107 {approx = true} : vector<8x1xf32> -> vector<8x1xf32>
    %109 = vector.broadcast %108 : vector<8x1xf32> to vector<8x8xf32>
    %110 = arith.mulf %105, %109 : vector<8x8xf32>
    %111 = arith.truncf %110 : vector<8x8xf32> to vector<8x8xbf16>
    %112 = vector.extract_strided_slice %76 {offsets = [0, 16], sizes = [8, 16], strides = [1, 1]} : vector<8x32xbf16> to vector<8x16xbf16>
    %cst_82 = arith.constant dense<0.000000e+00> : vector<8x16xf32>
    %113 = tpu.matmul %111, %112, %cst_82 {dimension_numbers = #tpu.dot_dimension_numbers<[1], [0], [0], [1], [0, 0, 1, 1], [], []>} : vector<8x8xbf16>, vector<8x16xbf16>, vector<8x16xf32> -> vector<8x16xf32>
    %114 = tpu.concatenate %95, %113 in 1 : vector<8x16xf32>, vector<8x16xf32> -> vector<8x32xf32>
    %115 = vector.extract_strided_slice %68 {offsets = [8, 0], sizes = [8, 32], strides = [1, 1]} : vector<16x32xf32> to vector<8x32xf32>
    %116 = arith.truncf %115 : vector<8x32xf32> to vector<8x32xbf16>
    %117 = vector.extract_strided_slice %69 {offsets = [8, 0], sizes = [8, 32], strides = [1, 1]} : vector<16x32xf32> to vector<8x32xf32>
    %118 = arith.truncf %117 : vector<8x32xf32> to vector<8x32xbf16>
    %119 = vector.extract_strided_slice %70 {offsets = [8, 0], sizes = [8, 32], strides = [1, 1]} : vector<16x32xf32> to vector<8x32xf32>
    %120 = arith.truncf %119 : vector<8x32xf32> to vector<8x32xbf16>
    %121 = vector.extract_strided_slice %36 {offsets = [1, 0], sizes = [1, 8], strides = [1, 1]} : vector<2x8xf32> to vector<1x8xf32>
    %122 = vector.extract_strided_slice %116 {offsets = [0, 0], sizes = [8, 16], strides = [1, 1]} : vector<8x32xbf16> to vector<8x16xbf16>
    %123 = vector.extract_strided_slice %118 {offsets = [0, 0], sizes = [8, 16], strides = [1, 1]} : vector<8x32xbf16> to vector<8x16xbf16>
    %cst_83 = arith.constant dense<0.000000e+00> : vector<8x8xf32>
    %124 = tpu.matmul %122, %123, %cst_83 {dimension_numbers = #tpu.dot_dimension_numbers<[1], [1], [0], [0], [0, 0, 1, 0], [], []>} : vector<8x16xbf16>, vector<8x16xbf16>, vector<8x8xf32> -> vector<8x8xf32>
    %125 = vector.broadcast %121 : vector<1x8xf32> to vector<8x8xf32>
    %126 = arith.addf %124, %125 : vector<8x8xf32>
    %cst_84 = arith.constant dense<0xFF800000> : vector<8xf32>
    %127 = vector.multi_reduction <maximumf>, %126, %cst_84 [1] : vector<8x8xf32> to vector<8xf32>
    %128 = vector.shape_cast %127 : vector<8xf32> to vector<8x1xf32>
    %129 = vector.broadcast %128 : vector<8x1xf32> to vector<8x8xf32>
    %130 = arith.subf %126, %129 : vector<8x8xf32>
    %131 = math.exp %130 : vector<8x8xf32>
    %cst_85 = arith.constant dense<0.000000e+00> : vector<8xf32>
    %132 = vector.multi_reduction <add>, %131, %cst_85 [1] : vector<8x8xf32> to vector<8xf32>
    %133 = vector.shape_cast %132 : vector<8xf32> to vector<8x1xf32>
    %134 = tpu.reciprocal %133 {approx = true} : vector<8x1xf32> -> vector<8x1xf32>
    %135 = vector.broadcast %134 : vector<8x1xf32> to vector<8x8xf32>
    %136 = arith.mulf %131, %135 : vector<8x8xf32>
    %137 = arith.truncf %136 : vector<8x8xf32> to vector<8x8xbf16>
    %138 = vector.extract_strided_slice %120 {offsets = [0, 0], sizes = [8, 16], strides = [1, 1]} : vector<8x32xbf16> to vector<8x16xbf16>
    %cst_86 = arith.constant dense<0.000000e+00> : vector<8x16xf32>
    %139 = tpu.matmul %137, %138, %cst_86 {dimension_numbers = #tpu.dot_dimension_numbers<[1], [0], [0], [1], [0, 0, 1, 1], [], []>} : vector<8x8xbf16>, vector<8x16xbf16>, vector<8x16xf32> -> vector<8x16xf32>
    %140 = vector.extract_strided_slice %116 {offsets = [0, 16], sizes = [8, 16], strides = [1, 1]} : vector<8x32xbf16> to vector<8x16xbf16>
    %141 = vector.extract_strided_slice %118 {offsets = [0, 16], sizes = [8, 16], strides = [1, 1]} : vector<8x32xbf16> to vector<8x16xbf16>
    %cst_87 = arith.constant dense<0.000000e+00> : vector<8x8xf32>
    %142 = tpu.matmul %140, %141, %cst_87 {dimension_numbers = #tpu.dot_dimension_numbers<[1], [1], [0], [0], [0, 0, 1, 0], [], []>} : vector<8x16xbf16>, vector<8x16xbf16>, vector<8x8xf32> -> vector<8x8xf32>
    %143 = vector.broadcast %121 : vector<1x8xf32> to vector<8x8xf32>
    %144 = arith.addf %142, %143 : vector<8x8xf32>
    %cst_88 = arith.constant dense<0xFF800000> : vector<8xf32>
    %145 = vector.multi_reduction <maximumf>, %144, %cst_88 [1] : vector<8x8xf32> to vector<8xf32>
    %146 = vector.shape_cast %145 : vector<8xf32> to vector<8x1xf32>
    %147 = vector.broadcast %146 : vector<8x1xf32> to vector<8x8xf32>
    %148 = arith.subf %144, %147 : vector<8x8xf32>
    %149 = math.exp %148 : vector<8x8xf32>
    %cst_89 = arith.constant dense<0.000000e+00> : vector<8xf32>
    %150 = vector.multi_reduction <add>, %149, %cst_89 [1] : vector<8x8xf32> to vector<8xf32>
    %151 = vector.shape_cast %150 : vector<8xf32> to vector<8x1xf32>
    %152 = tpu.reciprocal %151 {approx = true} : vector<8x1xf32> -> vector<8x1xf32>
    %153 = vector.broadcast %152 : vector<8x1xf32> to vector<8x8xf32>
    %154 = arith.mulf %149, %153 : vector<8x8xf32>
    %155 = arith.truncf %154 : vector<8x8xf32> to vector<8x8xbf16>
    %156 = vector.extract_strided_slice %120 {offsets = [0, 16], sizes = [8, 16], strides = [1, 1]} : vector<8x32xbf16> to vector<8x16xbf16>
    %cst_90 = arith.constant dense<0.000000e+00> : vector<8x16xf32>
    %157 = tpu.matmul %155, %156, %cst_90 {dimension_numbers = #tpu.dot_dimension_numbers<[1], [0], [0], [1], [0, 0, 1, 1], [], []>} : vector<8x8xbf16>, vector<8x16xbf16>, vector<8x16xf32> -> vector<8x16xf32>
    %158 = tpu.concatenate %139, %157 in 1 : vector<8x16xf32>, vector<8x16xf32> -> vector<8x32xf32>
    %159 = tpu.concatenate %114, %158 in 0 : vector<8x32xf32>, vector<8x32xf32> -> vector<16x32xf32>
    %160 = arith.truncf %159 : vector<16x32xf32> to vector<16x32xbf16>
    %cst_91 = arith.constant dense<0.000000e+00> : vector<16x32xf32>
    %161 = tpu.matmul %160, %4, %cst_91 {dimension_numbers = #tpu.dot_dimension_numbers<[1], [0], [0], [1], [0, 0, 1, 1], [], []>} : vector<16x32xbf16>, vector<32x32xbf16>, vector<16x32xf32> -> vector<16x32xf32>
    %162 = vector.broadcast %5 : vector<1x32xf32> to vector<16x32xf32>
    %163 = arith.addf %161, %162 : vector<16x32xf32>
    %164 = arith.addf %61, %163 : vector<16x32xf32>
    %cst_92 = arith.constant dense<0.000000e+00> : vector<16xf32>
    %165 = vector.multi_reduction <add>, %164, %cst_92 [1] : vector<16x32xf32> to vector<16xf32>
    %166 = vector.shape_cast %165 : vector<16xf32> to vector<16x1xf32>
    %cst_93 = arith.constant 3.200000e+01 : f32
    %167 = vector.broadcast %cst_93 : f32 to vector<16x1xf32>
    %168 = arith.divf %166, %167 : vector<16x1xf32>
    %169 = vector.broadcast %168 : vector<16x1xf32> to vector<16x32xf32>
    %170 = arith.subf %164, %169 : vector<16x32xf32>
    %171 = vector.broadcast %168 : vector<16x1xf32> to vector<16x32xf32>
    %172 = arith.subf %164, %171 : vector<16x32xf32>
    %173 = arith.mulf %170, %172 : vector<16x32xf32>
    %cst_94 = arith.constant dense<0.000000e+00> : vector<16xf32>
    %174 = vector.multi_reduction <add>, %173, %cst_94 [1] : vector<16x32xf32> to vector<16xf32>
    %175 = vector.shape_cast %174 : vector<16xf32> to vector<16x1xf32>
    %cst_95 = arith.constant 3.200000e+01 : f32
    %176 = vector.broadcast %cst_95 : f32 to vector<16x1xf32>
    %177 = arith.divf %175, %176 : vector<16x1xf32>
    %178 = vector.broadcast %168 : vector<16x1xf32> to vector<16x32xf32>
    %179 = arith.subf %164, %178 : vector<16x32xf32>
    %cst_96 = arith.constant 9.99999996E-13 : f32
    %180 = vector.broadcast %cst_96 : f32 to vector<16x1xf32>
    %181 = arith.addf %177, %180 : vector<16x1xf32>
    %182 = math.rsqrt %181 : vector<16x1xf32>
    %183 = vector.broadcast %182 : vector<16x1xf32> to vector<16x32xf32>
    %184 = arith.mulf %179, %183 : vector<16x32xf32>
    %185 = vector.broadcast %6 : vector<1x32xf32> to vector<16x32xf32>
    %186 = arith.mulf %184, %185 : vector<16x32xf32>
    %187 = vector.broadcast %7 : vector<1x32xf32> to vector<16x32xf32>
    %188 = arith.addf %186, %187 : vector<16x32xf32>
    %189 = arith.truncf %188 : vector<16x32xf32> to vector<16x32xbf16>
    %cst_97 = arith.constant dense<0.000000e+00> : vector<16x64xf32>
    %190 = tpu.matmul %189, %8, %cst_97 {dimension_numbers = #tpu.dot_dimension_numbers<[1], [0], [0], [1], [0, 0, 1, 1], [], []>} : vector<16x32xbf16>, vector<32x64xbf16>, vector<16x64xf32> -> vector<16x64xf32>
    %191 = vector.broadcast %9 : vector<1x64xf32> to vector<16x64xf32>
    %192 = arith.addf %190, %191 : vector<16x64xf32>
    %193 = arith.mulf %192, %192 : vector<16x64xf32>
    %194 = arith.mulf %192, %193 : vector<16x64xf32>
    %cst_98 = arith.constant 4.471500e-02 : f32
    %195 = vector.broadcast %cst_98 : f32 to vector<16x64xf32>
    %196 = arith.mulf %195, %194 : vector<16x64xf32>
    %197 = arith.addf %192, %196 : vector<16x64xf32>
    %cst_99 = arith.constant 0.797884583 : f32
    %198 = vector.broadcast %cst_99 : f32 to vector<16x64xf32>
    %199 = arith.mulf %198, %197 : vector<16x64xf32>
    %200 = math.tanh %199 : vector<16x64xf32>
    %cst_100 = arith.constant 1.000000e+00 : f32
    %201 = vector.broadcast %cst_100 : f32 to vector<16x64xf32>
    %202 = arith.addf %201, %200 : vector<16x64xf32>
    %cst_101 = arith.constant 5.000000e-01 : f32
    %203 = vector.broadcast %cst_101 : f32 to vector<16x64xf32>
    %204 = arith.mulf %203, %202 : vector<16x64xf32>
    %205 = arith.mulf %192, %204 : vector<16x64xf32>
    %206 = arith.truncf %205 : vector<16x64xf32> to vector<16x64xbf16>
    %cst_102 = arith.constant dense<0.000000e+00> : vector<16x32xf32>
    %207 = tpu.matmul %206, %10, %cst_102 {dimension_numbers = #tpu.dot_dimension_numbers<[1], [0], [0], [1], [0, 0, 1, 1], [], []>} : vector<16x64xbf16>, vector<64x32xbf16>, vector<16x32xf32> -> vector<16x32xf32>
    %208 = vector.broadcast %11 : vector<1x32xf32> to vector<16x32xf32>
    %209 = arith.addf %207, %208 : vector<16x32xf32>
    %210 = arith.addf %188, %209 : vector<16x32xf32>
    %cst_103 = arith.constant dense<0.000000e+00> : vector<16xf32>
    %211 = vector.multi_reduction <add>, %210, %cst_103 [1] : vector<16x32xf32> to vector<16xf32>
    %212 = vector.shape_cast %211 : vector<16xf32> to vector<16x1xf32>
    %cst_104 = arith.constant 3.200000e+01 : f32
    %213 = vector.broadcast %cst_104 : f32 to vector<16x1xf32>
    %214 = arith.divf %212, %213 : vector<16x1xf32>
    %215 = vector.broadcast %214 : vector<16x1xf32> to vector<16x32xf32>
    %216 = arith.subf %210, %215 : vector<16x32xf32>
    %217 = vector.broadcast %214 : vector<16x1xf32> to vector<16x32xf32>
    %218 = arith.subf %210, %217 : vector<16x32xf32>
    %219 = arith.mulf %216, %218 : vector<16x32xf32>
    %cst_105 = arith.constant dense<0.000000e+00> : vector<16xf32>
    %220 = vector.multi_reduction <add>, %219, %cst_105 [1] : vector<16x32xf32> to vector<16xf32>
    %221 = vector.shape_cast %220 : vector<16xf32> to vector<16x1xf32>
    %cst_106 = arith.constant 3.200000e+01 : f32
    %222 = vector.broadcast %cst_106 : f32 to vector<16x1xf32>
    %223 = arith.divf %221, %222 : vector<16x1xf32>
    %224 = vector.broadcast %214 : vector<16x1xf32> to vector<16x32xf32>
    %225 = arith.subf %210, %224 : vector<16x32xf32>
    %cst_107 = arith.constant 9.99999996E-13 : f32
    %226 = vector.broadcast %cst_107 : f32 to vector<16x1xf32>
    %227 = arith.addf %223, %226 : vector<16x1xf32>
    %228 = math.rsqrt %227 : vector<16x1xf32>
    %229 = vector.broadcast %228 : vector<16x1xf32> to vector<16x32xf32>
    %230 = arith.mulf %225, %229 : vector<16x32xf32>
    %231 = vector.broadcast %12 : vector<1x32xf32> to vector<16x32xf32>
    %232 = arith.mulf %230, %231 : vector<16x32xf32>
    %233 = vector.broadcast %13 : vector<1x32xf32> to vector<16x32xf32>
    %234 = arith.addf %232, %233 : vector<16x32xf32>
    %235 = arith.truncf %234 : vector<16x32xf32> to vector<16x32xbf16>
    %cst_108 = arith.constant dense<0.000000e+00> : vector<16x96xf32>
    %236 = tpu.matmul %235, %14, %cst_108 {dimension_numbers = #tpu.dot_dimension_numbers<[1], [0], [0], [1], [0, 0, 1, 1], [], []>} : vector<16x32xbf16>, vector<32x96xbf16>, vector<16x96xf32> -> vector<16x96xf32>
    %237 = vector.broadcast %15 : vector<1x96xf32> to vector<16x96xf32>
    %238 = arith.addf %236, %237 : vector<16x96xf32>
    %239 = vector.extract_strided_slice %238 {offsets = [0, 0], sizes = [16, 32], strides = [1, 1]} : vector<16x96xf32> to vector<16x32xf32>
    %cst_109 = arith.constant 2.500000e-01 : f32
    %240 = vector.broadcast %cst_109 : f32 to vector<16x32xf32>
    %241 = arith.mulf %239, %240 : vector<16x32xf32>
    %242 = vector.extract_strided_slice %238 {offsets = [0, 32], sizes = [16, 32], strides = [1, 1]} : vector<16x96xf32> to vector<16x32xf32>
    %243 = vector.extract_strided_slice %238 {offsets = [0, 64], sizes = [16, 32], strides = [1, 1]} : vector<16x96xf32> to vector<16x32xf32>
    %244 = vector.extract_strided_slice %241 {offsets = [0, 0], sizes = [8, 32], strides = [1, 1]} : vector<16x32xf32> to vector<8x32xf32>
    %245 = arith.truncf %244 : vector<8x32xf32> to vector<8x32xbf16>
    %246 = vector.extract_strided_slice %242 {offsets = [0, 0], sizes = [8, 32], strides = [1, 1]} : vector<16x32xf32> to vector<8x32xf32>
    %247 = arith.truncf %246 : vector<8x32xf32> to vector<8x32xbf16>
    %248 = vector.extract_strided_slice %243 {offsets = [0, 0], sizes = [8, 32], strides = [1, 1]} : vector<16x32xf32> to vector<8x32xf32>
    %249 = arith.truncf %248 : vector<8x32xf32> to vector<8x32xbf16>
    %250 = vector.extract_strided_slice %36 {offsets = [0, 0], sizes = [1, 8], strides = [1, 1]} : vector<2x8xf32> to vector<1x8xf32>
    %251 = vector.extract_strided_slice %245 {offsets = [0, 0], sizes = [8, 16], strides = [1, 1]} : vector<8x32xbf16> to vector<8x16xbf16>
    %252 = vector.extract_strided_slice %247 {offsets = [0, 0], sizes = [8, 16], strides = [1, 1]} : vector<8x32xbf16> to vector<8x16xbf16>
    %cst_110 = arith.constant dense<0.000000e+00> : vector<8x8xf32>
    %253 = tpu.matmul %251, %252, %cst_110 {dimension_numbers = #tpu.dot_dimension_numbers<[1], [1], [0], [0], [0, 0, 1, 0], [], []>} : vector<8x16xbf16>, vector<8x16xbf16>, vector<8x8xf32> -> vector<8x8xf32>
    %254 = vector.broadcast %250 : vector<1x8xf32> to vector<8x8xf32>
    %255 = arith.addf %253, %254 : vector<8x8xf32>
    %cst_111 = arith.constant dense<0xFF800000> : vector<8xf32>
    %256 = vector.multi_reduction <maximumf>, %255, %cst_111 [1] : vector<8x8xf32> to vector<8xf32>
    %257 = vector.shape_cast %256 : vector<8xf32> to vector<8x1xf32>
    %258 = vector.broadcast %257 : vector<8x1xf32> to vector<8x8xf32>
    %259 = arith.subf %255, %258 : vector<8x8xf32>
    %260 = math.exp %259 : vector<8x8xf32>
    %cst_112 = arith.constant dense<0.000000e+00> : vector<8xf32>
    %261 = vector.multi_reduction <add>, %260, %cst_112 [1] : vector<8x8xf32> to vector<8xf32>
    %262 = vector.shape_cast %261 : vector<8xf32> to vector<8x1xf32>
    %263 = tpu.reciprocal %262 {approx = true} : vector<8x1xf32> -> vector<8x1xf32>
    %264 = vector.broadcast %263 : vector<8x1xf32> to vector<8x8xf32>
    %265 = arith.mulf %260, %264 : vector<8x8xf32>
    %266 = arith.truncf %265 : vector<8x8xf32> to vector<8x8xbf16>
    %267 = vector.extract_strided_slice %249 {offsets = [0, 0], sizes = [8, 16], strides = [1, 1]} : vector<8x32xbf16> to vector<8x16xbf16>
    %cst_113 = arith.constant dense<0.000000e+00> : vector<8x16xf32>
    %268 = tpu.matmul %266, %267, %cst_113 {dimension_numbers = #tpu.dot_dimension_numbers<[1], [0], [0], [1], [0, 0, 1, 1], [], []>} : vector<8x8xbf16>, vector<8x16xbf16>, vector<8x16xf32> -> vector<8x16xf32>
    %269 = vector.extract_strided_slice %245 {offsets = [0, 16], sizes = [8, 16], strides = [1, 1]} : vector<8x32xbf16> to vector<8x16xbf16>
    %270 = vector.extract_strided_slice %247 {offsets = [0, 16], sizes = [8, 16], strides = [1, 1]} : vector<8x32xbf16> to vector<8x16xbf16>
    %cst_114 = arith.constant dense<0.000000e+00> : vector<8x8xf32>
    %271 = tpu.matmul %269, %270, %cst_114 {dimension_numbers = #tpu.dot_dimension_numbers<[1], [1], [0], [0], [0, 0, 1, 0], [], []>} : vector<8x16xbf16>, vector<8x16xbf16>, vector<8x8xf32> -> vector<8x8xf32>
    %272 = vector.broadcast %250 : vector<1x8xf32> to vector<8x8xf32>
    %273 = arith.addf %271, %272 : vector<8x8xf32>
    %cst_115 = arith.constant dense<0xFF800000> : vector<8xf32>
    %274 = vector.multi_reduction <maximumf>, %273, %cst_115 [1] : vector<8x8xf32> to vector<8xf32>
    %275 = vector.shape_cast %274 : vector<8xf32> to vector<8x1xf32>
    %276 = vector.broadcast %275 : vector<8x1xf32> to vector<8x8xf32>
    %277 = arith.subf %273, %276 : vector<8x8xf32>
    %278 = math.exp %277 : vector<8x8xf32>
    %cst_116 = arith.constant dense<0.000000e+00> : vector<8xf32>
    %279 = vector.multi_reduction <add>, %278, %cst_116 [1] : vector<8x8xf32> to vector<8xf32>
    %280 = vector.shape_cast %279 : vector<8xf32> to vector<8x1xf32>
    %281 = tpu.reciprocal %280 {approx = true} : vector<8x1xf32> -> vector<8x1xf32>
    %282 = vector.broadcast %281 : vector<8x1xf32> to vector<8x8xf32>
    %283 = arith.mulf %278, %282 : vector<8x8xf32>
    %284 = arith.truncf %283 : vector<8x8xf32> to vector<8x8xbf16>
    %285 = vector.extract_strided_slice %249 {offsets = [0, 16], sizes = [8, 16], strides = [1, 1]} : vector<8x32xbf16> to vector<8x16xbf16>
    %cst_117 = arith.constant dense<0.000000e+00> : vector<8x16xf32>
    %286 = tpu.matmul %284, %285, %cst_117 {dimension_numbers = #tpu.dot_dimension_numbers<[1], [0], [0], [1], [0, 0, 1, 1], [], []>} : vector<8x8xbf16>, vector<8x16xbf16>, vector<8x16xf32> -> vector<8x16xf32>
    %287 = tpu.concatenate %268, %286 in 1 : vector<8x16xf32>, vector<8x16xf32> -> vector<8x32xf32>
    %288 = vector.extract_strided_slice %241 {offsets = [8, 0], sizes = [8, 32], strides = [1, 1]} : vector<16x32xf32> to vector<8x32xf32>
    %289 = arith.truncf %288 : vector<8x32xf32> to vector<8x32xbf16>
    %290 = vector.extract_strided_slice %242 {offsets = [8, 0], sizes = [8, 32], strides = [1, 1]} : vector<16x32xf32> to vector<8x32xf32>
    %291 = arith.truncf %290 : vector<8x32xf32> to vector<8x32xbf16>
    %292 = vector.extract_strided_slice %243 {offsets = [8, 0], sizes = [8, 32], strides = [1, 1]} : vector<16x32xf32> to vector<8x32xf32>
    %293 = arith.truncf %292 : vector<8x32xf32> to vector<8x32xbf16>
    %294 = vector.extract_strided_slice %36 {offsets = [1, 0], sizes = [1, 8], strides = [1, 1]} : vector<2x8xf32> to vector<1x8xf32>
    %295 = vector.extract_strided_slice %289 {offsets = [0, 0], sizes = [8, 16], strides = [1, 1]} : vector<8x32xbf16> to vector<8x16xbf16>
    %296 = vector.extract_strided_slice %291 {offsets = [0, 0], sizes = [8, 16], strides = [1, 1]} : vector<8x32xbf16> to vector<8x16xbf16>
    %cst_118 = arith.constant dense<0.000000e+00> : vector<8x8xf32>
    %297 = tpu.matmul %295, %296, %cst_118 {dimension_numbers = #tpu.dot_dimension_numbers<[1], [1], [0], [0], [0, 0, 1, 0], [], []>} : vector<8x16xbf16>, vector<8x16xbf16>, vector<8x8xf32> -> vector<8x8xf32>
    %298 = vector.broadcast %294 : vector<1x8xf32> to vector<8x8xf32>
    %299 = arith.addf %297, %298 : vector<8x8xf32>
    %cst_119 = arith.constant dense<0xFF800000> : vector<8xf32>
    %300 = vector.multi_reduction <maximumf>, %299, %cst_119 [1] : vector<8x8xf32> to vector<8xf32>
    %301 = vector.shape_cast %300 : vector<8xf32> to vector<8x1xf32>
    %302 = vector.broadcast %301 : vector<8x1xf32> to vector<8x8xf32>
    %303 = arith.subf %299, %302 : vector<8x8xf32>
    %304 = math.exp %303 : vector<8x8xf32>
    %cst_120 = arith.constant dense<0.000000e+00> : vector<8xf32>
    %305 = vector.multi_reduction <add>, %304, %cst_120 [1] : vector<8x8xf32> to vector<8xf32>
    %306 = vector.shape_cast %305 : vector<8xf32> to vector<8x1xf32>
    %307 = tpu.reciprocal %306 {approx = true} : vector<8x1xf32> -> vector<8x1xf32>
    %308 = vector.broadcast %307 : vector<8x1xf32> to vector<8x8xf32>
    %309 = arith.mulf %304, %308 : vector<8x8xf32>
    %310 = arith.truncf %309 : vector<8x8xf32> to vector<8x8xbf16>
    %311 = vector.extract_strided_slice %293 {offsets = [0, 0], sizes = [8, 16], strides = [1, 1]} : vector<8x32xbf16> to vector<8x16xbf16>
    %cst_121 = arith.constant dense<0.000000e+00> : vector<8x16xf32>
    %312 = tpu.matmul %310, %311, %cst_121 {dimension_numbers = #tpu.dot_dimension_numbers<[1], [0], [0], [1], [0, 0, 1, 1], [], []>} : vector<8x8xbf16>, vector<8x16xbf16>, vector<8x16xf32> -> vector<8x16xf32>
    %313 = vector.extract_strided_slice %289 {offsets = [0, 16], sizes = [8, 16], strides = [1, 1]} : vector<8x32xbf16> to vector<8x16xbf16>
    %314 = vector.extract_strided_slice %291 {offsets = [0, 16], sizes = [8, 16], strides = [1, 1]} : vector<8x32xbf16> to vector<8x16xbf16>
    %cst_122 = arith.constant dense<0.000000e+00> : vector<8x8xf32>
    %315 = tpu.matmul %313, %314, %cst_122 {dimension_numbers = #tpu.dot_dimension_numbers<[1], [1], [0], [0], [0, 0, 1, 0], [], []>} : vector<8x16xbf16>, vector<8x16xbf16>, vector<8x8xf32> -> vector<8x8xf32>
    %316 = vector.broadcast %294 : vector<1x8xf32> to vector<8x8xf32>
    %317 = arith.addf %315, %316 : vector<8x8xf32>
    %cst_123 = arith.constant dense<0xFF800000> : vector<8xf32>
    %318 = vector.multi_reduction <maximumf>, %317, %cst_123 [1] : vector<8x8xf32> to vector<8xf32>
    %319 = vector.shape_cast %318 : vector<8xf32> to vector<8x1xf32>
    %320 = vector.broadcast %319 : vector<8x1xf32> to vector<8x8xf32>
    %321 = arith.subf %317, %320 : vector<8x8xf32>
    %322 = math.exp %321 : vector<8x8xf32>
    %cst_124 = arith.constant dense<0.000000e+00> : vector<8xf32>
    %323 = vector.multi_reduction <add>, %322, %cst_124 [1] : vector<8x8xf32> to vector<8xf32>
    %324 = vector.shape_cast %323 : vector<8xf32> to vector<8x1xf32>
    %325 = tpu.reciprocal %324 {approx = true} : vector<8x1xf32> -> vector<8x1xf32>
    %326 = vector.broadcast %325 : vector<8x1xf32> to vector<8x8xf32>
    %327 = arith.mulf %322, %326 : vector<8x8xf32>
    %328 = arith.truncf %327 : vector<8x8xf32> to vector<8x8xbf16>
    %329 = vector.extract_strided_slice %293 {offsets = [0, 16], sizes = [8, 16], strides = [1, 1]} : vector<8x32xbf16> to vector<8x16xbf16>
    %cst_125 = arith.constant dense<0.000000e+00> : vector<8x16xf32>
    %330 = tpu.matmul %328, %329, %cst_125 {dimension_numbers = #tpu.dot_dimension_numbers<[1], [0], [0], [1], [0, 0, 1, 1], [], []>} : vector<8x8xbf16>, vector<8x16xbf16>, vector<8x16xf32> -> vector<8x16xf32>
    %331 = tpu.concatenate %312, %330 in 1 : vector<8x16xf32>, vector<8x16xf32> -> vector<8x32xf32>
    %332 = tpu.concatenate %287, %331 in 0 : vector<8x32xf32>, vector<8x32xf32> -> vector<16x32xf32>
    %333 = arith.truncf %332 : vector<16x32xf32> to vector<16x32xbf16>
    %cst_126 = arith.constant dense<0.000000e+00> : vector<16x32xf32>
    %334 = tpu.matmul %333, %16, %cst_126 {dimension_numbers = #tpu.dot_dimension_numbers<[1], [0], [0], [1], [0, 0, 1, 1], [], []>} : vector<16x32xbf16>, vector<32x32xbf16>, vector<16x32xf32> -> vector<16x32xf32>
    %335 = vector.broadcast %17 : vector<1x32xf32> to vector<16x32xf32>
    %336 = arith.addf %334, %335 : vector<16x32xf32>
    %337 = arith.addf %234, %336 : vector<16x32xf32>
    %cst_127 = arith.constant dense<0.000000e+00> : vector<16xf32>
    %338 = vector.multi_reduction <add>, %337, %cst_127 [1] : vector<16x32xf32> to vector<16xf32>
    %339 = vector.shape_cast %338 : vector<16xf32> to vector<16x1xf32>
    %cst_128 = arith.constant 3.200000e+01 : f32
    %340 = vector.broadcast %cst_128 : f32 to vector<16x1xf32>
    %341 = arith.divf %339, %340 : vector<16x1xf32>
    %342 = vector.broadcast %341 : vector<16x1xf32> to vector<16x32xf32>
    %343 = arith.subf %337, %342 : vector<16x32xf32>
    %344 = vector.broadcast %341 : vector<16x1xf32> to vector<16x32xf32>
    %345 = arith.subf %337, %344 : vector<16x32xf32>
    %346 = arith.mulf %343, %345 : vector<16x32xf32>
    %cst_129 = arith.constant dense<0.000000e+00> : vector<16xf32>
    %347 = vector.multi_reduction <add>, %346, %cst_129 [1] : vector<16x32xf32> to vector<16xf32>
    %348 = vector.shape_cast %347 : vector<16xf32> to vector<16x1xf32>
    %cst_130 = arith.constant 3.200000e+01 : f32
    %349 = vector.broadcast %cst_130 : f32 to vector<16x1xf32>
    %350 = arith.divf %348, %349 : vector<16x1xf32>
    %351 = vector.broadcast %341 : vector<16x1xf32> to vector<16x32xf32>
    %352 = arith.subf %337, %351 : vector<16x32xf32>
    %cst_131 = arith.constant 9.99999996E-13 : f32
    %353 = vector.broadcast %cst_131 : f32 to vector<16x1xf32>
    %354 = arith.addf %350, %353 : vector<16x1xf32>
    %355 = math.rsqrt %354 : vector<16x1xf32>
    %356 = vector.broadcast %355 : vector<16x1xf32> to vector<16x32xf32>
    %357 = arith.mulf %352, %356 : vector<16x32xf32>
    %358 = vector.broadcast %18 : vector<1x32xf32> to vector<16x32xf32>
    %359 = arith.mulf %357, %358 : vector<16x32xf32>
    %360 = vector.broadcast %19 : vector<1x32xf32> to vector<16x32xf32>
    %361 = arith.addf %359, %360 : vector<16x32xf32>
    %362 = arith.truncf %361 : vector<16x32xf32> to vector<16x32xbf16>
    %cst_132 = arith.constant dense<0.000000e+00> : vector<16x64xf32>
    %363 = tpu.matmul %362, %20, %cst_132 {dimension_numbers = #tpu.dot_dimension_numbers<[1], [0], [0], [1], [0, 0, 1, 1], [], []>} : vector<16x32xbf16>, vector<32x64xbf16>, vector<16x64xf32> -> vector<16x64xf32>
    %364 = vector.broadcast %21 : vector<1x64xf32> to vector<16x64xf32>
    %365 = arith.addf %363, %364 : vector<16x64xf32>
    %366 = arith.mulf %365, %365 : vector<16x64xf32>
    %367 = arith.mulf %365, %366 : vector<16x64xf32>
    %cst_133 = arith.constant 4.471500e-02 : f32
    %368 = vector.broadcast %cst_133 : f32 to vector<16x64xf32>
    %369 = arith.mulf %368, %367 : vector<16x64xf32>
    %370 = arith.addf %365, %369 : vector<16x64xf32>
    %cst_134 = arith.constant 0.797884583 : f32
    %371 = vector.broadcast %cst_134 : f32 to vector<16x64xf32>
    %372 = arith.mulf %371, %370 : vector<16x64xf32>
    %373 = math.tanh %372 : vector<16x64xf32>
    %cst_135 = arith.constant 1.000000e+00 : f32
    %374 = vector.broadcast %cst_135 : f32 to vector<16x64xf32>
    %375 = arith.addf %374, %373 : vector<16x64xf32>
    %cst_136 = arith.constant 5.000000e-01 : f32
    %376 = vector.broadcast %cst_136 : f32 to vector<16x64xf32>
    %377 = arith.mulf %376, %375 : vector<16x64xf32>
    %378 = arith.mulf %365, %377 : vector<16x64xf32>
    %379 = arith.truncf %378 : vector<16x64xf32> to vector<16x64xbf16>
    %cst_137 = arith.constant dense<0.000000e+00> : vector<16x32xf32>
    %380 = tpu.matmul %379, %22, %cst_137 {dimension_numbers = #tpu.dot_dimension_numbers<[1], [0], [0], [1], [0, 0, 1, 1], [], []>} : vector<16x64xbf16>, vector<64x32xbf16>, vector<16x32xf32> -> vector<16x32xf32>
    %381 = vector.broadcast %23 : vector<1x32xf32> to vector<16x32xf32>
    %382 = arith.addf %380, %381 : vector<16x32xf32>
    %383 = arith.addf %361, %382 : vector<16x32xf32>
    %cst_138 = arith.constant dense<0.000000e+00> : vector<16xf32>
    %384 = vector.multi_reduction <add>, %383, %cst_138 [1] : vector<16x32xf32> to vector<16xf32>
    %385 = vector.shape_cast %384 : vector<16xf32> to vector<16x1xf32>
    %cst_139 = arith.constant 3.200000e+01 : f32
    %386 = vector.broadcast %cst_139 : f32 to vector<16x1xf32>
    %387 = arith.divf %385, %386 : vector<16x1xf32>
    %388 = vector.broadcast %387 : vector<16x1xf32> to vector<16x32xf32>
    %389 = arith.subf %383, %388 : vector<16x32xf32>
    %390 = vector.broadcast %387 : vector<16x1xf32> to vector<16x32xf32>
    %391 = arith.subf %383, %390 : vector<16x32xf32>
    %392 = arith.mulf %389, %391 : vector<16x32xf32>
    %cst_140 = arith.constant dense<0.000000e+00> : vector<16xf32>
    %393 = vector.multi_reduction <add>, %392, %cst_140 [1] : vector<16x32xf32> to vector<16xf32>
    %394 = vector.shape_cast %393 : vector<16xf32> to vector<16x1xf32>
    %cst_141 = arith.constant 3.200000e+01 : f32
    %395 = vector.broadcast %cst_141 : f32 to vector<16x1xf32>
    %396 = arith.divf %394, %395 : vector<16x1xf32>
    %397 = vector.broadcast %387 : vector<16x1xf32> to vector<16x32xf32>
    %398 = arith.subf %383, %397 : vector<16x32xf32>
    %cst_142 = arith.constant 9.99999996E-13 : f32
    %399 = vector.broadcast %cst_142 : f32 to vector<16x1xf32>
    %400 = arith.addf %396, %399 : vector<16x1xf32>
    %401 = math.rsqrt %400 : vector<16x1xf32>
    %402 = vector.broadcast %401 : vector<16x1xf32> to vector<16x32xf32>
    %403 = arith.mulf %398, %402 : vector<16x32xf32>
    %404 = vector.broadcast %24 : vector<1x32xf32> to vector<16x32xf32>
    %405 = arith.mulf %403, %404 : vector<16x32xf32>
    %406 = vector.broadcast %25 : vector<1x32xf32> to vector<16x32xf32>
    %407 = arith.addf %405, %406 : vector<16x32xf32>
    %408 = arith.truncf %407 : vector<16x32xf32> to vector<16x32xbf16>
    %cst_143 = arith.constant dense<0.000000e+00> : vector<16x192xf32>
    %409 = tpu.matmul %408, %26, %cst_143 {dimension_numbers = #tpu.dot_dimension_numbers<[1], [0], [0], [1], [0, 0, 1, 1], [], []>} : vector<16x32xbf16>, vector<32x192xbf16>, vector<16x192xf32> -> vector<16x192xf32>
    %410 = vector.broadcast %27 : vector<1x192xf32> to vector<16x192xf32>
    %411 = arith.addf %409, %410 : vector<16x192xf32>
    %412 = vector.shape_cast %411 : vector<16x192xf32> to vector<2x8x192xf32>
    %cst_144 = arith.constant 0.000000e+00 : f32
    %413 = vector.broadcast %cst_144 : f32 to vector<2x64xf32>
    %414 = vector.extract_strided_slice %412 {offsets = [0, 0, 0], sizes = [2, 1, 96], strides = [1, 1, 1]} : vector<2x8x192xf32> to vector<2x1x96xf32>
    %415 = vector.shape_cast %414 : vector<2x1x96xf32> to vector<2x96xf32>
    %416 = vector.extract_strided_slice %412 {offsets = [0, 7, 96], sizes = [2, 1, 96], strides = [1, 1, 1]} : vector<2x8x192xf32> to vector<2x1x96xf32>
    %417 = vector.shape_cast %416 : vector<2x1x96xf32> to vector<2x96xf32>
    %418 = tpu.concatenate %415, %417 in 1 : vector<2x96xf32>, vector<2x96xf32> -> vector<2x192xf32>
    %419 = arith.truncf %413 : vector<2x64xf32> to vector<2x64xbf16>
    %cst_145 = arith.constant dense<0.000000e+00> : vector<2x192xf32>
    %420 = tpu.matmul %419, %28, %cst_145 {dimension_numbers = #tpu.dot_dimension_numbers<[1], [0], [0], [1], [0, 0, 1, 1], [], []>} : vector<2x64xbf16>, vector<64x192xbf16>, vector<2x192xf32> -> vector<2x192xf32>
    %421 = vector.broadcast %29 : vector<1x192xf32> to vector<2x192xf32>
    %422 = arith.addf %420, %421 : vector<2x192xf32>
    %423 = vector.extract_strided_slice %418 {offsets = [0, 0], sizes = [2, 32], strides = [1, 1]} : vector<2x192xf32> to vector<2x32xf32>
    %424 = vector.extract_strided_slice %418 {offsets = [0, 96], sizes = [2, 32], strides = [1, 1]} : vector<2x192xf32> to vector<2x32xf32>
    %425 = tpu.concatenate %423, %424 in 1 : vector<2x32xf32>, vector<2x32xf32> -> vector<2x64xf32>
    %426 = vector.extract_strided_slice %422 {offsets = [0, 0], sizes = [2, 32], strides = [1, 1]} : vector<2x192xf32> to vector<2x32xf32>
    %427 = vector.extract_strided_slice %422 {offsets = [0, 96], sizes = [2, 32], strides = [1, 1]} : vector<2x192xf32> to vector<2x32xf32>
    %428 = tpu.concatenate %426, %427 in 1 : vector<2x32xf32>, vector<2x32xf32> -> vector<2x64xf32>
    %429 = arith.addf %425, %428 : vector<2x64xf32>
    %cst_146 = arith.constant 0.000000e+00 : f32
    %430 = vector.broadcast %cst_146 : f32 to vector<2x64xf32>
    %431 = arith.subf %430, %429 : vector<2x64xf32>
    %432 = math.exp %431 : vector<2x64xf32>
    %cst_147 = arith.constant 1.000000e+00 : f32
    %433 = vector.broadcast %cst_147 : f32 to vector<2x64xf32>
    %434 = arith.addf %433, %432 : vector<2x64xf32>
    %cst_148 = arith.constant 1.000000e+00 : f32
    %435 = vector.broadcast %cst_148 : f32 to vector<2x64xf32>
    %436 = arith.divf %435, %434 : vector<2x64xf32>
    %437 = vector.extract_strided_slice %418 {offsets = [0, 32], sizes = [2, 32], strides = [1, 1]} : vector<2x192xf32> to vector<2x32xf32>
    %438 = vector.extract_strided_slice %418 {offsets = [0, 128], sizes = [2, 32], strides = [1, 1]} : vector<2x192xf32> to vector<2x32xf32>
    %439 = tpu.concatenate %437, %438 in 1 : vector<2x32xf32>, vector<2x32xf32> -> vector<2x64xf32>
    %440 = vector.extract_strided_slice %422 {offsets = [0, 32], sizes = [2, 32], strides = [1, 1]} : vector<2x192xf32> to vector<2x32xf32>
    %441 = vector.extract_strided_slice %422 {offsets = [0, 128], sizes = [2, 32], strides = [1, 1]} : vector<2x192xf32> to vector<2x32xf32>
    %442 = tpu.concatenate %440, %441 in 1 : vector<2x32xf32>, vector<2x32xf32> -> vector<2x64xf32>
    %443 = arith.addf %439, %442 : vector<2x64xf32>
    %cst_149 = arith.constant 0.000000e+00 : f32
    %444 = vector.broadcast %cst_149 : f32 to vector<2x64xf32>
    %445 = arith.subf %444, %443 : vector<2x64xf32>
    %446 = math.exp %445 : vector<2x64xf32>
    %cst_150 = arith.constant 1.000000e+00 : f32
    %447 = vector.broadcast %cst_150 : f32 to vector<2x64xf32>
    %448 = arith.addf %447, %446 : vector<2x64xf32>
    %cst_151 = arith.constant 1.000000e+00 : f32
    %449 = vector.broadcast %cst_151 : f32 to vector<2x64xf32>
    %450 = arith.divf %449, %448 : vector<2x64xf32>
    %451 = vector.extract_strided_slice %418 {offsets = [0, 64], sizes = [2, 32], strides = [1, 1]} : vector<2x192xf32> to vector<2x32xf32>
    %452 = vector.extract_strided_slice %418 {offsets = [0, 160], sizes = [2, 32], strides = [1, 1]} : vector<2x192xf32> to vector<2x32xf32>
    %453 = tpu.concatenate %451, %452 in 1 : vector<2x32xf32>, vector<2x32xf32> -> vector<2x64xf32>
    %454 = vector.extract_strided_slice %422 {offsets = [0, 64], sizes = [2, 32], strides = [1, 1]} : vector<2x192xf32> to vector<2x32xf32>
    %455 = vector.extract_strided_slice %422 {offsets = [0, 160], sizes = [2, 32], strides = [1, 1]} : vector<2x192xf32> to vector<2x32xf32>
    %456 = tpu.concatenate %454, %455 in 1 : vector<2x32xf32>, vector<2x32xf32> -> vector<2x64xf32>
    %457 = arith.mulf %436, %456 : vector<2x64xf32>
    %458 = arith.addf %453, %457 : vector<2x64xf32>
    %459 = math.tanh %458 : vector<2x64xf32>
    %cst_152 = arith.constant 1.000000e+00 : f32
    %460 = vector.broadcast %cst_152 : f32 to vector<2x64xf32>
    %461 = arith.subf %460, %450 : vector<2x64xf32>
    %462 = arith.mulf %461, %459 : vector<2x64xf32>
    %463 = arith.mulf %450, %413 : vector<2x64xf32>
    %464 = arith.addf %462, %463 : vector<2x64xf32>
    %465 = vector.extract_strided_slice %412 {offsets = [0, 1, 0], sizes = [2, 1, 96], strides = [1, 1, 1]} : vector<2x8x192xf32> to vector<2x1x96xf32>
    %466 = vector.shape_cast %465 : vector<2x1x96xf32> to vector<2x96xf32>
    %467 = vector.extract_strided_slice %412 {offsets = [0, 6, 96], sizes = [2, 1, 96], strides = [1, 1, 1]} : vector<2x8x192xf32> to vector<2x1x96xf32>
    %468 = vector.shape_cast %467 : vector<2x1x96xf32> to vector<2x96xf32>
    %469 = tpu.concatenate %466, %468 in 1 : vector<2x96xf32>, vector<2x96xf32> -> vector<2x192xf32>
    %470 = arith.truncf %464 : vector<2x64xf32> to vector<2x64xbf16>
    %cst_153 = arith.constant dense<0.000000e+00> : vector<2x192xf32>
    %471 = tpu.matmul %470, %28, %cst_153 {dimension_numbers = #tpu.dot_dimension_numbers<[1], [0], [0], [1], [0, 0, 1, 1], [], []>} : vector<2x64xbf16>, vector<64x192xbf16>, vector<2x192xf32> -> vector<2x192xf32>
    %472 = vector.broadcast %29 : vector<1x192xf32> to vector<2x192xf32>
    %473 = arith.addf %471, %472 : vector<2x192xf32>
    %474 = vector.extract_strided_slice %469 {offsets = [0, 0], sizes = [2, 32], strides = [1, 1]} : vector<2x192xf32> to vector<2x32xf32>
    %475 = vector.extract_strided_slice %469 {offsets = [0, 96], sizes = [2, 32], strides = [1, 1]} : vector<2x192xf32> to vector<2x32xf32>
    %476 = tpu.concatenate %474, %475 in 1 : vector<2x32xf32>, vector<2x32xf32> -> vector<2x64xf32>
    %477 = vector.extract_strided_slice %473 {offsets = [0, 0], sizes = [2, 32], strides = [1, 1]} : vector<2x192xf32> to vector<2x32xf32>
    %478 = vector.extract_strided_slice %473 {offsets = [0, 96], sizes = [2, 32], strides = [1, 1]} : vector<2x192xf32> to vector<2x32xf32>
    %479 = tpu.concatenate %477, %478 in 1 : vector<2x32xf32>, vector<2x32xf32> -> vector<2x64xf32>
    %480 = arith.addf %476, %479 : vector<2x64xf32>
    %cst_154 = arith.constant 0.000000e+00 : f32
    %481 = vector.broadcast %cst_154 : f32 to vector<2x64xf32>
    %482 = arith.subf %481, %480 : vector<2x64xf32>
    %483 = math.exp %482 : vector<2x64xf32>
    %cst_155 = arith.constant 1.000000e+00 : f32
    %484 = vector.broadcast %cst_155 : f32 to vector<2x64xf32>
    %485 = arith.addf %484, %483 : vector<2x64xf32>
    %cst_156 = arith.constant 1.000000e+00 : f32
    %486 = vector.broadcast %cst_156 : f32 to vector<2x64xf32>
    %487 = arith.divf %486, %485 : vector<2x64xf32>
    %488 = vector.extract_strided_slice %469 {offsets = [0, 32], sizes = [2, 32], strides = [1, 1]} : vector<2x192xf32> to vector<2x32xf32>
    %489 = vector.extract_strided_slice %469 {offsets = [0, 128], sizes = [2, 32], strides = [1, 1]} : vector<2x192xf32> to vector<2x32xf32>
    %490 = tpu.concatenate %488, %489 in 1 : vector<2x32xf32>, vector<2x32xf32> -> vector<2x64xf32>
    %491 = vector.extract_strided_slice %473 {offsets = [0, 32], sizes = [2, 32], strides = [1, 1]} : vector<2x192xf32> to vector<2x32xf32>
    %492 = vector.extract_strided_slice %473 {offsets = [0, 128], sizes = [2, 32], strides = [1, 1]} : vector<2x192xf32> to vector<2x32xf32>
    %493 = tpu.concatenate %491, %492 in 1 : vector<2x32xf32>, vector<2x32xf32> -> vector<2x64xf32>
    %494 = arith.addf %490, %493 : vector<2x64xf32>
    %cst_157 = arith.constant 0.000000e+00 : f32
    %495 = vector.broadcast %cst_157 : f32 to vector<2x64xf32>
    %496 = arith.subf %495, %494 : vector<2x64xf32>
    %497 = math.exp %496 : vector<2x64xf32>
    %cst_158 = arith.constant 1.000000e+00 : f32
    %498 = vector.broadcast %cst_158 : f32 to vector<2x64xf32>
    %499 = arith.addf %498, %497 : vector<2x64xf32>
    %cst_159 = arith.constant 1.000000e+00 : f32
    %500 = vector.broadcast %cst_159 : f32 to vector<2x64xf32>
    %501 = arith.divf %500, %499 : vector<2x64xf32>
    %502 = vector.extract_strided_slice %469 {offsets = [0, 64], sizes = [2, 32], strides = [1, 1]} : vector<2x192xf32> to vector<2x32xf32>
    %503 = vector.extract_strided_slice %469 {offsets = [0, 160], sizes = [2, 32], strides = [1, 1]} : vector<2x192xf32> to vector<2x32xf32>
    %504 = tpu.concatenate %502, %503 in 1 : vector<2x32xf32>, vector<2x32xf32> -> vector<2x64xf32>
    %505 = vector.extract_strided_slice %473 {offsets = [0, 64], sizes = [2, 32], strides = [1, 1]} : vector<2x192xf32> to vector<2x32xf32>
    %506 = vector.extract_strided_slice %473 {offsets = [0, 160], sizes = [2, 32], strides = [1, 1]} : vector<2x192xf32> to vector<2x32xf32>
    %507 = tpu.concatenate %505, %506 in 1 : vector<2x32xf32>, vector<2x32xf32> -> vector<2x64xf32>
    %508 = arith.mulf %487, %507 : vector<2x64xf32>
    %509 = arith.addf %504, %508 : vector<2x64xf32>
    %510 = math.tanh %509 : vector<2x64xf32>
    %cst_160 = arith.constant 1.000000e+00 : f32
    %511 = vector.broadcast %cst_160 : f32 to vector<2x64xf32>
    %512 = arith.subf %511, %501 : vector<2x64xf32>
    %513 = arith.mulf %512, %510 : vector<2x64xf32>
    %514 = arith.mulf %501, %464 : vector<2x64xf32>
    %515 = arith.addf %513, %514 : vector<2x64xf32>
    %516 = vector.extract_strided_slice %412 {offsets = [0, 2, 0], sizes = [2, 1, 96], strides = [1, 1, 1]} : vector<2x8x192xf32> to vector<2x1x96xf32>
    %517 = vector.shape_cast %516 : vector<2x1x96xf32> to vector<2x96xf32>
    %518 = vector.extract_strided_slice %412 {offsets = [0, 5, 96], sizes = [2, 1, 96], strides = [1, 1, 1]} : vector<2x8x192xf32> to vector<2x1x96xf32>
    %519 = vector.shape_cast %518 : vector<2x1x96xf32> to vector<2x96xf32>
    %520 = tpu.concatenate %517, %519 in 1 : vector<2x96xf32>, vector<2x96xf32> -> vector<2x192xf32>
    %521 = arith.truncf %515 : vector<2x64xf32> to vector<2x64xbf16>
    %cst_161 = arith.constant dense<0.000000e+00> : vector<2x192xf32>
    %522 = tpu.matmul %521, %28, %cst_161 {dimension_numbers = #tpu.dot_dimension_numbers<[1], [0], [0], [1], [0, 0, 1, 1], [], []>} : vector<2x64xbf16>, vector<64x192xbf16>, vector<2x192xf32> -> vector<2x192xf32>
    %523 = vector.broadcast %29 : vector<1x192xf32> to vector<2x192xf32>
    %524 = arith.addf %522, %523 : vector<2x192xf32>
    %525 = vector.extract_strided_slice %520 {offsets = [0, 0], sizes = [2, 32], strides = [1, 1]} : vector<2x192xf32> to vector<2x32xf32>
    %526 = vector.extract_strided_slice %520 {offsets = [0, 96], sizes = [2, 32], strides = [1, 1]} : vector<2x192xf32> to vector<2x32xf32>
    %527 = tpu.concatenate %525, %526 in 1 : vector<2x32xf32>, vector<2x32xf32> -> vector<2x64xf32>
    %528 = vector.extract_strided_slice %524 {offsets = [0, 0], sizes = [2, 32], strides = [1, 1]} : vector<2x192xf32> to vector<2x32xf32>
    %529 = vector.extract_strided_slice %524 {offsets = [0, 96], sizes = [2, 32], strides = [1, 1]} : vector<2x192xf32> to vector<2x32xf32>
    %530 = tpu.concatenate %528, %529 in 1 : vector<2x32xf32>, vector<2x32xf32> -> vector<2x64xf32>
    %531 = arith.addf %527, %530 : vector<2x64xf32>
    %cst_162 = arith.constant 0.000000e+00 : f32
    %532 = vector.broadcast %cst_162 : f32 to vector<2x64xf32>
    %533 = arith.subf %532, %531 : vector<2x64xf32>
    %534 = math.exp %533 : vector<2x64xf32>
    %cst_163 = arith.constant 1.000000e+00 : f32
    %535 = vector.broadcast %cst_163 : f32 to vector<2x64xf32>
    %536 = arith.addf %535, %534 : vector<2x64xf32>
    %cst_164 = arith.constant 1.000000e+00 : f32
    %537 = vector.broadcast %cst_164 : f32 to vector<2x64xf32>
    %538 = arith.divf %537, %536 : vector<2x64xf32>
    %539 = vector.extract_strided_slice %520 {offsets = [0, 32], sizes = [2, 32], strides = [1, 1]} : vector<2x192xf32> to vector<2x32xf32>
    %540 = vector.extract_strided_slice %520 {offsets = [0, 128], sizes = [2, 32], strides = [1, 1]} : vector<2x192xf32> to vector<2x32xf32>
    %541 = tpu.concatenate %539, %540 in 1 : vector<2x32xf32>, vector<2x32xf32> -> vector<2x64xf32>
    %542 = vector.extract_strided_slice %524 {offsets = [0, 32], sizes = [2, 32], strides = [1, 1]} : vector<2x192xf32> to vector<2x32xf32>
    %543 = vector.extract_strided_slice %524 {offsets = [0, 128], sizes = [2, 32], strides = [1, 1]} : vector<2x192xf32> to vector<2x32xf32>
    %544 = tpu.concatenate %542, %543 in 1 : vector<2x32xf32>, vector<2x32xf32> -> vector<2x64xf32>
    %545 = arith.addf %541, %544 : vector<2x64xf32>
    %cst_165 = arith.constant 0.000000e+00 : f32
    %546 = vector.broadcast %cst_165 : f32 to vector<2x64xf32>
    %547 = arith.subf %546, %545 : vector<2x64xf32>
    %548 = math.exp %547 : vector<2x64xf32>
    %cst_166 = arith.constant 1.000000e+00 : f32
    %549 = vector.broadcast %cst_166 : f32 to vector<2x64xf32>
    %550 = arith.addf %549, %548 : vector<2x64xf32>
    %cst_167 = arith.constant 1.000000e+00 : f32
    %551 = vector.broadcast %cst_167 : f32 to vector<2x64xf32>
    %552 = arith.divf %551, %550 : vector<2x64xf32>
    %553 = vector.extract_strided_slice %520 {offsets = [0, 64], sizes = [2, 32], strides = [1, 1]} : vector<2x192xf32> to vector<2x32xf32>
    %554 = vector.extract_strided_slice %520 {offsets = [0, 160], sizes = [2, 32], strides = [1, 1]} : vector<2x192xf32> to vector<2x32xf32>
    %555 = tpu.concatenate %553, %554 in 1 : vector<2x32xf32>, vector<2x32xf32> -> vector<2x64xf32>
    %556 = vector.extract_strided_slice %524 {offsets = [0, 64], sizes = [2, 32], strides = [1, 1]} : vector<2x192xf32> to vector<2x32xf32>
    %557 = vector.extract_strided_slice %524 {offsets = [0, 160], sizes = [2, 32], strides = [1, 1]} : vector<2x192xf32> to vector<2x32xf32>
    %558 = tpu.concatenate %556, %557 in 1 : vector<2x32xf32>, vector<2x32xf32> -> vector<2x64xf32>
    %559 = arith.mulf %538, %558 : vector<2x64xf32>
    %560 = arith.addf %555, %559 : vector<2x64xf32>
    %561 = math.tanh %560 : vector<2x64xf32>
    %cst_168 = arith.constant 1.000000e+00 : f32
    %562 = vector.broadcast %cst_168 : f32 to vector<2x64xf32>
    %563 = arith.subf %562, %552 : vector<2x64xf32>
    %564 = arith.mulf %563, %561 : vector<2x64xf32>
    %565 = arith.mulf %552, %515 : vector<2x64xf32>
    %566 = arith.addf %564, %565 : vector<2x64xf32>
    %567 = vector.extract_strided_slice %412 {offsets = [0, 3, 0], sizes = [2, 1, 96], strides = [1, 1, 1]} : vector<2x8x192xf32> to vector<2x1x96xf32>
    %568 = vector.shape_cast %567 : vector<2x1x96xf32> to vector<2x96xf32>
    %569 = vector.extract_strided_slice %412 {offsets = [0, 4, 96], sizes = [2, 1, 96], strides = [1, 1, 1]} : vector<2x8x192xf32> to vector<2x1x96xf32>
    %570 = vector.shape_cast %569 : vector<2x1x96xf32> to vector<2x96xf32>
    %571 = tpu.concatenate %568, %570 in 1 : vector<2x96xf32>, vector<2x96xf32> -> vector<2x192xf32>
    %572 = arith.truncf %566 : vector<2x64xf32> to vector<2x64xbf16>
    %cst_169 = arith.constant dense<0.000000e+00> : vector<2x192xf32>
    %573 = tpu.matmul %572, %28, %cst_169 {dimension_numbers = #tpu.dot_dimension_numbers<[1], [0], [0], [1], [0, 0, 1, 1], [], []>} : vector<2x64xbf16>, vector<64x192xbf16>, vector<2x192xf32> -> vector<2x192xf32>
    %574 = vector.broadcast %29 : vector<1x192xf32> to vector<2x192xf32>
    %575 = arith.addf %573, %574 : vector<2x192xf32>
    %576 = vector.extract_strided_slice %571 {offsets = [0, 0], sizes = [2, 32], strides = [1, 1]} : vector<2x192xf32> to vector<2x32xf32>
    %577 = vector.extract_strided_slice %571 {offsets = [0, 96], sizes = [2, 32], strides = [1, 1]} : vector<2x192xf32> to vector<2x32xf32>
    %578 = tpu.concatenate %576, %577 in 1 : vector<2x32xf32>, vector<2x32xf32> -> vector<2x64xf32>
    %579 = vector.extract_strided_slice %575 {offsets = [0, 0], sizes = [2, 32], strides = [1, 1]} : vector<2x192xf32> to vector<2x32xf32>
    %580 = vector.extract_strided_slice %575 {offsets = [0, 96], sizes = [2, 32], strides = [1, 1]} : vector<2x192xf32> to vector<2x32xf32>
    %581 = tpu.concatenate %579, %580 in 1 : vector<2x32xf32>, vector<2x32xf32> -> vector<2x64xf32>
    %582 = arith.addf %578, %581 : vector<2x64xf32>
    %cst_170 = arith.constant 0.000000e+00 : f32
    %583 = vector.broadcast %cst_170 : f32 to vector<2x64xf32>
    %584 = arith.subf %583, %582 : vector<2x64xf32>
    %585 = math.exp %584 : vector<2x64xf32>
    %cst_171 = arith.constant 1.000000e+00 : f32
    %586 = vector.broadcast %cst_171 : f32 to vector<2x64xf32>
    %587 = arith.addf %586, %585 : vector<2x64xf32>
    %cst_172 = arith.constant 1.000000e+00 : f32
    %588 = vector.broadcast %cst_172 : f32 to vector<2x64xf32>
    %589 = arith.divf %588, %587 : vector<2x64xf32>
    %590 = vector.extract_strided_slice %571 {offsets = [0, 32], sizes = [2, 32], strides = [1, 1]} : vector<2x192xf32> to vector<2x32xf32>
    %591 = vector.extract_strided_slice %571 {offsets = [0, 128], sizes = [2, 32], strides = [1, 1]} : vector<2x192xf32> to vector<2x32xf32>
    %592 = tpu.concatenate %590, %591 in 1 : vector<2x32xf32>, vector<2x32xf32> -> vector<2x64xf32>
    %593 = vector.extract_strided_slice %575 {offsets = [0, 32], sizes = [2, 32], strides = [1, 1]} : vector<2x192xf32> to vector<2x32xf32>
    %594 = vector.extract_strided_slice %575 {offsets = [0, 128], sizes = [2, 32], strides = [1, 1]} : vector<2x192xf32> to vector<2x32xf32>
    %595 = tpu.concatenate %593, %594 in 1 : vector<2x32xf32>, vector<2x32xf32> -> vector<2x64xf32>
    %596 = arith.addf %592, %595 : vector<2x64xf32>
    %cst_173 = arith.constant 0.000000e+00 : f32
    %597 = vector.broadcast %cst_173 : f32 to vector<2x64xf32>
    %598 = arith.subf %597, %596 : vector<2x64xf32>
    %599 = math.exp %598 : vector<2x64xf32>
    %cst_174 = arith.constant 1.000000e+00 : f32
    %600 = vector.broadcast %cst_174 : f32 to vector<2x64xf32>
    %601 = arith.addf %600, %599 : vector<2x64xf32>
    %cst_175 = arith.constant 1.000000e+00 : f32
    %602 = vector.broadcast %cst_175 : f32 to vector<2x64xf32>
    %603 = arith.divf %602, %601 : vector<2x64xf32>
    %604 = vector.extract_strided_slice %571 {offsets = [0, 64], sizes = [2, 32], strides = [1, 1]} : vector<2x192xf32> to vector<2x32xf32>
    %605 = vector.extract_strided_slice %571 {offsets = [0, 160], sizes = [2, 32], strides = [1, 1]} : vector<2x192xf32> to vector<2x32xf32>
    %606 = tpu.concatenate %604, %605 in 1 : vector<2x32xf32>, vector<2x32xf32> -> vector<2x64xf32>
    %607 = vector.extract_strided_slice %575 {offsets = [0, 64], sizes = [2, 32], strides = [1, 1]} : vector<2x192xf32> to vector<2x32xf32>
    %608 = vector.extract_strided_slice %575 {offsets = [0, 160], sizes = [2, 32], strides = [1, 1]} : vector<2x192xf32> to vector<2x32xf32>
    %609 = tpu.concatenate %607, %608 in 1 : vector<2x32xf32>, vector<2x32xf32> -> vector<2x64xf32>
    %610 = arith.mulf %589, %609 : vector<2x64xf32>
    %611 = arith.addf %606, %610 : vector<2x64xf32>
    %612 = math.tanh %611 : vector<2x64xf32>
    %cst_176 = arith.constant 1.000000e+00 : f32
    %613 = vector.broadcast %cst_176 : f32 to vector<2x64xf32>
    %614 = arith.subf %613, %603 : vector<2x64xf32>
    %615 = arith.mulf %614, %612 : vector<2x64xf32>
    %616 = arith.mulf %603, %566 : vector<2x64xf32>
    %617 = arith.addf %615, %616 : vector<2x64xf32>
    %618 = vector.extract_strided_slice %412 {offsets = [0, 4, 0], sizes = [2, 1, 96], strides = [1, 1, 1]} : vector<2x8x192xf32> to vector<2x1x96xf32>
    %619 = vector.shape_cast %618 : vector<2x1x96xf32> to vector<2x96xf32>
    %620 = vector.extract_strided_slice %412 {offsets = [0, 3, 96], sizes = [2, 1, 96], strides = [1, 1, 1]} : vector<2x8x192xf32> to vector<2x1x96xf32>
    %621 = vector.shape_cast %620 : vector<2x1x96xf32> to vector<2x96xf32>
    %622 = tpu.concatenate %619, %621 in 1 : vector<2x96xf32>, vector<2x96xf32> -> vector<2x192xf32>
    %623 = arith.truncf %617 : vector<2x64xf32> to vector<2x64xbf16>
    %cst_177 = arith.constant dense<0.000000e+00> : vector<2x192xf32>
    %624 = tpu.matmul %623, %28, %cst_177 {dimension_numbers = #tpu.dot_dimension_numbers<[1], [0], [0], [1], [0, 0, 1, 1], [], []>} : vector<2x64xbf16>, vector<64x192xbf16>, vector<2x192xf32> -> vector<2x192xf32>
    %625 = vector.broadcast %29 : vector<1x192xf32> to vector<2x192xf32>
    %626 = arith.addf %624, %625 : vector<2x192xf32>
    %627 = vector.extract_strided_slice %622 {offsets = [0, 0], sizes = [2, 32], strides = [1, 1]} : vector<2x192xf32> to vector<2x32xf32>
    %628 = vector.extract_strided_slice %622 {offsets = [0, 96], sizes = [2, 32], strides = [1, 1]} : vector<2x192xf32> to vector<2x32xf32>
    %629 = tpu.concatenate %627, %628 in 1 : vector<2x32xf32>, vector<2x32xf32> -> vector<2x64xf32>
    %630 = vector.extract_strided_slice %626 {offsets = [0, 0], sizes = [2, 32], strides = [1, 1]} : vector<2x192xf32> to vector<2x32xf32>
    %631 = vector.extract_strided_slice %626 {offsets = [0, 96], sizes = [2, 32], strides = [1, 1]} : vector<2x192xf32> to vector<2x32xf32>
    %632 = tpu.concatenate %630, %631 in 1 : vector<2x32xf32>, vector<2x32xf32> -> vector<2x64xf32>
    %633 = arith.addf %629, %632 : vector<2x64xf32>
    %cst_178 = arith.constant 0.000000e+00 : f32
    %634 = vector.broadcast %cst_178 : f32 to vector<2x64xf32>
    %635 = arith.subf %634, %633 : vector<2x64xf32>
    %636 = math.exp %635 : vector<2x64xf32>
    %cst_179 = arith.constant 1.000000e+00 : f32
    %637 = vector.broadcast %cst_179 : f32 to vector<2x64xf32>
    %638 = arith.addf %637, %636 : vector<2x64xf32>
    %cst_180 = arith.constant 1.000000e+00 : f32
    %639 = vector.broadcast %cst_180 : f32 to vector<2x64xf32>
    %640 = arith.divf %639, %638 : vector<2x64xf32>
    %641 = vector.extract_strided_slice %622 {offsets = [0, 32], sizes = [2, 32], strides = [1, 1]} : vector<2x192xf32> to vector<2x32xf32>
    %642 = vector.extract_strided_slice %622 {offsets = [0, 128], sizes = [2, 32], strides = [1, 1]} : vector<2x192xf32> to vector<2x32xf32>
    %643 = tpu.concatenate %641, %642 in 1 : vector<2x32xf32>, vector<2x32xf32> -> vector<2x64xf32>
    %644 = vector.extract_strided_slice %626 {offsets = [0, 32], sizes = [2, 32], strides = [1, 1]} : vector<2x192xf32> to vector<2x32xf32>
    %645 = vector.extract_strided_slice %626 {offsets = [0, 128], sizes = [2, 32], strides = [1, 1]} : vector<2x192xf32> to vector<2x32xf32>
    %646 = tpu.concatenate %644, %645 in 1 : vector<2x32xf32>, vector<2x32xf32> -> vector<2x64xf32>
    %647 = arith.addf %643, %646 : vector<2x64xf32>
    %cst_181 = arith.constant 0.000000e+00 : f32
    %648 = vector.broadcast %cst_181 : f32 to vector<2x64xf32>
    %649 = arith.subf %648, %647 : vector<2x64xf32>
    %650 = math.exp %649 : vector<2x64xf32>
    %cst_182 = arith.constant 1.000000e+00 : f32
    %651 = vector.broadcast %cst_182 : f32 to vector<2x64xf32>
    %652 = arith.addf %651, %650 : vector<2x64xf32>
    %cst_183 = arith.constant 1.000000e+00 : f32
    %653 = vector.broadcast %cst_183 : f32 to vector<2x64xf32>
    %654 = arith.divf %653, %652 : vector<2x64xf32>
    %655 = vector.extract_strided_slice %622 {offsets = [0, 64], sizes = [2, 32], strides = [1, 1]} : vector<2x192xf32> to vector<2x32xf32>
    %656 = vector.extract_strided_slice %622 {offsets = [0, 160], sizes = [2, 32], strides = [1, 1]} : vector<2x192xf32> to vector<2x32xf32>
    %657 = tpu.concatenate %655, %656 in 1 : vector<2x32xf32>, vector<2x32xf32> -> vector<2x64xf32>
    %658 = vector.extract_strided_slice %626 {offsets = [0, 64], sizes = [2, 32], strides = [1, 1]} : vector<2x192xf32> to vector<2x32xf32>
    %659 = vector.extract_strided_slice %626 {offsets = [0, 160], sizes = [2, 32], strides = [1, 1]} : vector<2x192xf32> to vector<2x32xf32>
    %660 = tpu.concatenate %658, %659 in 1 : vector<2x32xf32>, vector<2x32xf32> -> vector<2x64xf32>
    %661 = arith.mulf %640, %660 : vector<2x64xf32>
    %662 = arith.addf %657, %661 : vector<2x64xf32>
    %663 = math.tanh %662 : vector<2x64xf32>
    %cst_184 = arith.constant 1.000000e+00 : f32
    %664 = vector.broadcast %cst_184 : f32 to vector<2x64xf32>
    %665 = arith.subf %664, %654 : vector<2x64xf32>
    %666 = arith.mulf %665, %663 : vector<2x64xf32>
    %667 = arith.mulf %654, %617 : vector<2x64xf32>
    %668 = arith.addf %666, %667 : vector<2x64xf32>
    %669 = vector.extract_strided_slice %412 {offsets = [0, 5, 0], sizes = [2, 1, 96], strides = [1, 1, 1]} : vector<2x8x192xf32> to vector<2x1x96xf32>
    %670 = vector.shape_cast %669 : vector<2x1x96xf32> to vector<2x96xf32>
    %671 = vector.extract_strided_slice %412 {offsets = [0, 2, 96], sizes = [2, 1, 96], strides = [1, 1, 1]} : vector<2x8x192xf32> to vector<2x1x96xf32>
    %672 = vector.shape_cast %671 : vector<2x1x96xf32> to vector<2x96xf32>
    %673 = tpu.concatenate %670, %672 in 1 : vector<2x96xf32>, vector<2x96xf32> -> vector<2x192xf32>
    %674 = arith.truncf %668 : vector<2x64xf32> to vector<2x64xbf16>
    %cst_185 = arith.constant dense<0.000000e+00> : vector<2x192xf32>
    %675 = tpu.matmul %674, %28, %cst_185 {dimension_numbers = #tpu.dot_dimension_numbers<[1], [0], [0], [1], [0, 0, 1, 1], [], []>} : vector<2x64xbf16>, vector<64x192xbf16>, vector<2x192xf32> -> vector<2x192xf32>
    %676 = vector.broadcast %29 : vector<1x192xf32> to vector<2x192xf32>
    %677 = arith.addf %675, %676 : vector<2x192xf32>
    %678 = vector.extract_strided_slice %673 {offsets = [0, 0], sizes = [2, 32], strides = [1, 1]} : vector<2x192xf32> to vector<2x32xf32>
    %679 = vector.extract_strided_slice %673 {offsets = [0, 96], sizes = [2, 32], strides = [1, 1]} : vector<2x192xf32> to vector<2x32xf32>
    %680 = tpu.concatenate %678, %679 in 1 : vector<2x32xf32>, vector<2x32xf32> -> vector<2x64xf32>
    %681 = vector.extract_strided_slice %677 {offsets = [0, 0], sizes = [2, 32], strides = [1, 1]} : vector<2x192xf32> to vector<2x32xf32>
    %682 = vector.extract_strided_slice %677 {offsets = [0, 96], sizes = [2, 32], strides = [1, 1]} : vector<2x192xf32> to vector<2x32xf32>
    %683 = tpu.concatenate %681, %682 in 1 : vector<2x32xf32>, vector<2x32xf32> -> vector<2x64xf32>
    %684 = arith.addf %680, %683 : vector<2x64xf32>
    %cst_186 = arith.constant 0.000000e+00 : f32
    %685 = vector.broadcast %cst_186 : f32 to vector<2x64xf32>
    %686 = arith.subf %685, %684 : vector<2x64xf32>
    %687 = math.exp %686 : vector<2x64xf32>
    %cst_187 = arith.constant 1.000000e+00 : f32
    %688 = vector.broadcast %cst_187 : f32 to vector<2x64xf32>
    %689 = arith.addf %688, %687 : vector<2x64xf32>
    %cst_188 = arith.constant 1.000000e+00 : f32
    %690 = vector.broadcast %cst_188 : f32 to vector<2x64xf32>
    %691 = arith.divf %690, %689 : vector<2x64xf32>
    %692 = vector.extract_strided_slice %673 {offsets = [0, 32], sizes = [2, 32], strides = [1, 1]} : vector<2x192xf32> to vector<2x32xf32>
    %693 = vector.extract_strided_slice %673 {offsets = [0, 128], sizes = [2, 32], strides = [1, 1]} : vector<2x192xf32> to vector<2x32xf32>
    %694 = tpu.concatenate %692, %693 in 1 : vector<2x32xf32>, vector<2x32xf32> -> vector<2x64xf32>
    %695 = vector.extract_strided_slice %677 {offsets = [0, 32], sizes = [2, 32], strides = [1, 1]} : vector<2x192xf32> to vector<2x32xf32>
    %696 = vector.extract_strided_slice %677 {offsets = [0, 128], sizes = [2, 32], strides = [1, 1]} : vector<2x192xf32> to vector<2x32xf32>
    %697 = tpu.concatenate %695, %696 in 1 : vector<2x32xf32>, vector<2x32xf32> -> vector<2x64xf32>
    %698 = arith.addf %694, %697 : vector<2x64xf32>
    %cst_189 = arith.constant 0.000000e+00 : f32
    %699 = vector.broadcast %cst_189 : f32 to vector<2x64xf32>
    %700 = arith.subf %699, %698 : vector<2x64xf32>
    %701 = math.exp %700 : vector<2x64xf32>
    %cst_190 = arith.constant 1.000000e+00 : f32
    %702 = vector.broadcast %cst_190 : f32 to vector<2x64xf32>
    %703 = arith.addf %702, %701 : vector<2x64xf32>
    %cst_191 = arith.constant 1.000000e+00 : f32
    %704 = vector.broadcast %cst_191 : f32 to vector<2x64xf32>
    %705 = arith.divf %704, %703 : vector<2x64xf32>
    %706 = vector.extract_strided_slice %673 {offsets = [0, 64], sizes = [2, 32], strides = [1, 1]} : vector<2x192xf32> to vector<2x32xf32>
    %707 = vector.extract_strided_slice %673 {offsets = [0, 160], sizes = [2, 32], strides = [1, 1]} : vector<2x192xf32> to vector<2x32xf32>
    %708 = tpu.concatenate %706, %707 in 1 : vector<2x32xf32>, vector<2x32xf32> -> vector<2x64xf32>
    %709 = vector.extract_strided_slice %677 {offsets = [0, 64], sizes = [2, 32], strides = [1, 1]} : vector<2x192xf32> to vector<2x32xf32>
    %710 = vector.extract_strided_slice %677 {offsets = [0, 160], sizes = [2, 32], strides = [1, 1]} : vector<2x192xf32> to vector<2x32xf32>
    %711 = tpu.concatenate %709, %710 in 1 : vector<2x32xf32>, vector<2x32xf32> -> vector<2x64xf32>
    %712 = arith.mulf %691, %711 : vector<2x64xf32>
    %713 = arith.addf %708, %712 : vector<2x64xf32>
    %714 = math.tanh %713 : vector<2x64xf32>
    %cst_192 = arith.constant 1.000000e+00 : f32
    %715 = vector.broadcast %cst_192 : f32 to vector<2x64xf32>
    %716 = arith.subf %715, %705 : vector<2x64xf32>
    %717 = arith.mulf %716, %714 : vector<2x64xf32>
    %718 = arith.mulf %705, %668 : vector<2x64xf32>
    %719 = arith.addf %717, %718 : vector<2x64xf32>
    %720 = vector.extract_strided_slice %412 {offsets = [0, 6, 0], sizes = [2, 1, 96], strides = [1, 1, 1]} : vector<2x8x192xf32> to vector<2x1x96xf32>
    %721 = vector.shape_cast %720 : vector<2x1x96xf32> to vector<2x96xf32>
    %722 = vector.extract_strided_slice %412 {offsets = [0, 1, 96], sizes = [2, 1, 96], strides = [1, 1, 1]} : vector<2x8x192xf32> to vector<2x1x96xf32>
    %723 = vector.shape_cast %722 : vector<2x1x96xf32> to vector<2x96xf32>
    %724 = tpu.concatenate %721, %723 in 1 : vector<2x96xf32>, vector<2x96xf32> -> vector<2x192xf32>
    %725 = arith.truncf %719 : vector<2x64xf32> to vector<2x64xbf16>
    %cst_193 = arith.constant dense<0.000000e+00> : vector<2x192xf32>
    %726 = tpu.matmul %725, %28, %cst_193 {dimension_numbers = #tpu.dot_dimension_numbers<[1], [0], [0], [1], [0, 0, 1, 1], [], []>} : vector<2x64xbf16>, vector<64x192xbf16>, vector<2x192xf32> -> vector<2x192xf32>
    %727 = vector.broadcast %29 : vector<1x192xf32> to vector<2x192xf32>
    %728 = arith.addf %726, %727 : vector<2x192xf32>
    %729 = vector.extract_strided_slice %724 {offsets = [0, 0], sizes = [2, 32], strides = [1, 1]} : vector<2x192xf32> to vector<2x32xf32>
    %730 = vector.extract_strided_slice %724 {offsets = [0, 96], sizes = [2, 32], strides = [1, 1]} : vector<2x192xf32> to vector<2x32xf32>
    %731 = tpu.concatenate %729, %730 in 1 : vector<2x32xf32>, vector<2x32xf32> -> vector<2x64xf32>
    %732 = vector.extract_strided_slice %728 {offsets = [0, 0], sizes = [2, 32], strides = [1, 1]} : vector<2x192xf32> to vector<2x32xf32>
    %733 = vector.extract_strided_slice %728 {offsets = [0, 96], sizes = [2, 32], strides = [1, 1]} : vector<2x192xf32> to vector<2x32xf32>
    %734 = tpu.concatenate %732, %733 in 1 : vector<2x32xf32>, vector<2x32xf32> -> vector<2x64xf32>
    %735 = arith.addf %731, %734 : vector<2x64xf32>
    %cst_194 = arith.constant 0.000000e+00 : f32
    %736 = vector.broadcast %cst_194 : f32 to vector<2x64xf32>
    %737 = arith.subf %736, %735 : vector<2x64xf32>
    %738 = math.exp %737 : vector<2x64xf32>
    %cst_195 = arith.constant 1.000000e+00 : f32
    %739 = vector.broadcast %cst_195 : f32 to vector<2x64xf32>
    %740 = arith.addf %739, %738 : vector<2x64xf32>
    %cst_196 = arith.constant 1.000000e+00 : f32
    %741 = vector.broadcast %cst_196 : f32 to vector<2x64xf32>
    %742 = arith.divf %741, %740 : vector<2x64xf32>
    %743 = vector.extract_strided_slice %724 {offsets = [0, 32], sizes = [2, 32], strides = [1, 1]} : vector<2x192xf32> to vector<2x32xf32>
    %744 = vector.extract_strided_slice %724 {offsets = [0, 128], sizes = [2, 32], strides = [1, 1]} : vector<2x192xf32> to vector<2x32xf32>
    %745 = tpu.concatenate %743, %744 in 1 : vector<2x32xf32>, vector<2x32xf32> -> vector<2x64xf32>
    %746 = vector.extract_strided_slice %728 {offsets = [0, 32], sizes = [2, 32], strides = [1, 1]} : vector<2x192xf32> to vector<2x32xf32>
    %747 = vector.extract_strided_slice %728 {offsets = [0, 128], sizes = [2, 32], strides = [1, 1]} : vector<2x192xf32> to vector<2x32xf32>
    %748 = tpu.concatenate %746, %747 in 1 : vector<2x32xf32>, vector<2x32xf32> -> vector<2x64xf32>
    %749 = arith.addf %745, %748 : vector<2x64xf32>
    %cst_197 = arith.constant 0.000000e+00 : f32
    %750 = vector.broadcast %cst_197 : f32 to vector<2x64xf32>
    %751 = arith.subf %750, %749 : vector<2x64xf32>
    %752 = math.exp %751 : vector<2x64xf32>
    %cst_198 = arith.constant 1.000000e+00 : f32
    %753 = vector.broadcast %cst_198 : f32 to vector<2x64xf32>
    %754 = arith.addf %753, %752 : vector<2x64xf32>
    %cst_199 = arith.constant 1.000000e+00 : f32
    %755 = vector.broadcast %cst_199 : f32 to vector<2x64xf32>
    %756 = arith.divf %755, %754 : vector<2x64xf32>
    %757 = vector.extract_strided_slice %724 {offsets = [0, 64], sizes = [2, 32], strides = [1, 1]} : vector<2x192xf32> to vector<2x32xf32>
    %758 = vector.extract_strided_slice %724 {offsets = [0, 160], sizes = [2, 32], strides = [1, 1]} : vector<2x192xf32> to vector<2x32xf32>
    %759 = tpu.concatenate %757, %758 in 1 : vector<2x32xf32>, vector<2x32xf32> -> vector<2x64xf32>
    %760 = vector.extract_strided_slice %728 {offsets = [0, 64], sizes = [2, 32], strides = [1, 1]} : vector<2x192xf32> to vector<2x32xf32>
    %761 = vector.extract_strided_slice %728 {offsets = [0, 160], sizes = [2, 32], strides = [1, 1]} : vector<2x192xf32> to vector<2x32xf32>
    %762 = tpu.concatenate %760, %761 in 1 : vector<2x32xf32>, vector<2x32xf32> -> vector<2x64xf32>
    %763 = arith.mulf %742, %762 : vector<2x64xf32>
    %764 = arith.addf %759, %763 : vector<2x64xf32>
    %765 = math.tanh %764 : vector<2x64xf32>
    %cst_200 = arith.constant 1.000000e+00 : f32
    %766 = vector.broadcast %cst_200 : f32 to vector<2x64xf32>
    %767 = arith.subf %766, %756 : vector<2x64xf32>
    %768 = arith.mulf %767, %765 : vector<2x64xf32>
    %769 = arith.mulf %756, %719 : vector<2x64xf32>
    %770 = arith.addf %768, %769 : vector<2x64xf32>
    %771 = vector.extract_strided_slice %412 {offsets = [0, 7, 0], sizes = [2, 1, 96], strides = [1, 1, 1]} : vector<2x8x192xf32> to vector<2x1x96xf32>
    %772 = vector.shape_cast %771 : vector<2x1x96xf32> to vector<2x96xf32>
    %773 = vector.extract_strided_slice %412 {offsets = [0, 0, 96], sizes = [2, 1, 96], strides = [1, 1, 1]} : vector<2x8x192xf32> to vector<2x1x96xf32>
    %774 = vector.shape_cast %773 : vector<2x1x96xf32> to vector<2x96xf32>
    %775 = tpu.concatenate %772, %774 in 1 : vector<2x96xf32>, vector<2x96xf32> -> vector<2x192xf32>
    %776 = arith.truncf %770 : vector<2x64xf32> to vector<2x64xbf16>
    %cst_201 = arith.constant dense<0.000000e+00> : vector<2x192xf32>
    %777 = tpu.matmul %776, %28, %cst_201 {dimension_numbers = #tpu.dot_dimension_numbers<[1], [0], [0], [1], [0, 0, 1, 1], [], []>} : vector<2x64xbf16>, vector<64x192xbf16>, vector<2x192xf32> -> vector<2x192xf32>
    %778 = vector.broadcast %29 : vector<1x192xf32> to vector<2x192xf32>
    %779 = arith.addf %777, %778 : vector<2x192xf32>
    %780 = vector.extract_strided_slice %775 {offsets = [0, 0], sizes = [2, 32], strides = [1, 1]} : vector<2x192xf32> to vector<2x32xf32>
    %781 = vector.extract_strided_slice %775 {offsets = [0, 96], sizes = [2, 32], strides = [1, 1]} : vector<2x192xf32> to vector<2x32xf32>
    %782 = tpu.concatenate %780, %781 in 1 : vector<2x32xf32>, vector<2x32xf32> -> vector<2x64xf32>
    %783 = vector.extract_strided_slice %779 {offsets = [0, 0], sizes = [2, 32], strides = [1, 1]} : vector<2x192xf32> to vector<2x32xf32>
    %784 = vector.extract_strided_slice %779 {offsets = [0, 96], sizes = [2, 32], strides = [1, 1]} : vector<2x192xf32> to vector<2x32xf32>
    %785 = tpu.concatenate %783, %784 in 1 : vector<2x32xf32>, vector<2x32xf32> -> vector<2x64xf32>
    %786 = arith.addf %782, %785 : vector<2x64xf32>
    %cst_202 = arith.constant 0.000000e+00 : f32
    %787 = vector.broadcast %cst_202 : f32 to vector<2x64xf32>
    %788 = arith.subf %787, %786 : vector<2x64xf32>
    %789 = math.exp %788 : vector<2x64xf32>
    %cst_203 = arith.constant 1.000000e+00 : f32
    %790 = vector.broadcast %cst_203 : f32 to vector<2x64xf32>
    %791 = arith.addf %790, %789 : vector<2x64xf32>
    %cst_204 = arith.constant 1.000000e+00 : f32
    %792 = vector.broadcast %cst_204 : f32 to vector<2x64xf32>
    %793 = arith.divf %792, %791 : vector<2x64xf32>
    %794 = vector.extract_strided_slice %775 {offsets = [0, 32], sizes = [2, 32], strides = [1, 1]} : vector<2x192xf32> to vector<2x32xf32>
    %795 = vector.extract_strided_slice %775 {offsets = [0, 128], sizes = [2, 32], strides = [1, 1]} : vector<2x192xf32> to vector<2x32xf32>
    %796 = tpu.concatenate %794, %795 in 1 : vector<2x32xf32>, vector<2x32xf32> -> vector<2x64xf32>
    %797 = vector.extract_strided_slice %779 {offsets = [0, 32], sizes = [2, 32], strides = [1, 1]} : vector<2x192xf32> to vector<2x32xf32>
    %798 = vector.extract_strided_slice %779 {offsets = [0, 128], sizes = [2, 32], strides = [1, 1]} : vector<2x192xf32> to vector<2x32xf32>
    %799 = tpu.concatenate %797, %798 in 1 : vector<2x32xf32>, vector<2x32xf32> -> vector<2x64xf32>
    %800 = arith.addf %796, %799 : vector<2x64xf32>
    %cst_205 = arith.constant 0.000000e+00 : f32
    %801 = vector.broadcast %cst_205 : f32 to vector<2x64xf32>
    %802 = arith.subf %801, %800 : vector<2x64xf32>
    %803 = math.exp %802 : vector<2x64xf32>
    %cst_206 = arith.constant 1.000000e+00 : f32
    %804 = vector.broadcast %cst_206 : f32 to vector<2x64xf32>
    %805 = arith.addf %804, %803 : vector<2x64xf32>
    %cst_207 = arith.constant 1.000000e+00 : f32
    %806 = vector.broadcast %cst_207 : f32 to vector<2x64xf32>
    %807 = arith.divf %806, %805 : vector<2x64xf32>
    %808 = vector.extract_strided_slice %775 {offsets = [0, 64], sizes = [2, 32], strides = [1, 1]} : vector<2x192xf32> to vector<2x32xf32>
    %809 = vector.extract_strided_slice %775 {offsets = [0, 160], sizes = [2, 32], strides = [1, 1]} : vector<2x192xf32> to vector<2x32xf32>
    %810 = tpu.concatenate %808, %809 in 1 : vector<2x32xf32>, vector<2x32xf32> -> vector<2x64xf32>
    %811 = vector.extract_strided_slice %779 {offsets = [0, 64], sizes = [2, 32], strides = [1, 1]} : vector<2x192xf32> to vector<2x32xf32>
    %812 = vector.extract_strided_slice %779 {offsets = [0, 160], sizes = [2, 32], strides = [1, 1]} : vector<2x192xf32> to vector<2x32xf32>
    %813 = tpu.concatenate %811, %812 in 1 : vector<2x32xf32>, vector<2x32xf32> -> vector<2x64xf32>
    %814 = arith.mulf %793, %813 : vector<2x64xf32>
    %815 = arith.addf %810, %814 : vector<2x64xf32>
    %816 = math.tanh %815 : vector<2x64xf32>
    %cst_208 = arith.constant 1.000000e+00 : f32
    %817 = vector.broadcast %cst_208 : f32 to vector<2x64xf32>
    %818 = arith.subf %817, %807 : vector<2x64xf32>
    %819 = arith.mulf %818, %816 : vector<2x64xf32>
    %820 = arith.mulf %807, %770 : vector<2x64xf32>
    %821 = arith.addf %819, %820 : vector<2x64xf32>
    %822 = arith.truncf %821 : vector<2x64xf32> to vector<2x64xbf16>
    %cst_209 = arith.constant dense<0.000000e+00> : vector<2x30xf32>
    %823 = tpu.matmul %822, %30, %cst_209 {dimension_numbers = #tpu.dot_dimension_numbers<[1], [0], [0], [1], [0, 0, 1, 1], [], []>} : vector<2x64xbf16>, vector<64x30xbf16>, vector<2x30xf32> -> vector<2x30xf32>
    %824 = vector.broadcast %31 : vector<1x30xf32> to vector<2x30xf32>
    %825 = arith.addf %823, %824 : vector<2x30xf32>
    %c0_210 = arith.constant 0 : index
    %c0_211 = arith.constant 0 : index
    %826 = vector.load %arg34[%c0_210, %c0_211] : memref<2x30xf32, #tpu.memory_space<vmem>>, vector<2x30xf32>
    tpu.vector_store %arg34[%c0_210, %c0_211], %825 {strides = array<i32>} : memref<2x30xf32, #tpu.memory_space<vmem>>, vector<2x30xf32>,
    return
  }
}

</mosaic_0001>

<bundles_post_ra>
// kernel: bigru_re_forward.1
= control target key start
LH: loop header
LB: loop body
LE: loop exit
PB: predicated region body
PF: predicated region fallthrough
CT: control target
= control target key end

     0   :  { %s3777_s6 = smov 1   ;;  %s3778_s10 = smov 2   ;;  %s4667_s0 = inlined_call_operand.smem [shape: u32[35], index: -1, kind: input, shape index: {}] }
   0x1   :  { %s3830_s5 = sld [smem:[%s4667_s0]]   ;;  %s3779_s14 = smov 3  }
   0x2   :  { %s3835_s9 = sld [smem:[%s4667_s0 + %s3777_s6]]   ;;  %s3780_s18 = smov 4  }
   0x3   :  { %s3840_s13 = sld [smem:[%s4667_s0 + %s3778_s10]]   ;;  %s3781_s22 = smov 5  }
   0x4   :  { %s3845_s17 = sld [smem:[%s4667_s0 + %s3779_s14]]   ;;  %s3782_s26 = smov 6  }
   0x5   :  { %s3850_s21 = sld [smem:[%s4667_s0 + %s3780_s18]]   ;;  %s3783_s30 = smov 7  }
   0x6   :  { %s3855_s25 = sld [smem:[%s4667_s0 + %s3781_s22]]   ;;  %s3784_s4 = smov 8  }
   0x7   :  { %s3860_s29 = sld [smem:[%s4667_s0 + %s3782_s26]]   ;;  %s3785_s10 = smov 9  }
   0x8   :  { %s3865_s3 = sld [smem:[%s4667_s0 + %s3783_s30]]   ;;  %s3786_s15 = smov 10  }
   0x9   :  { %s3870_s8 = sld [smem:[%s4667_s0 + %s3784_s4]]   ;;  %s3787_s20 = smov 11  }
   0xa   :  { %s3875_s14 = sld [smem:[%s4667_s0 + %s3785_s10]]   ;;  %s3788_s26 = smov 12  }
   0xb   :  { %s3880_s19 = sld [smem:[%s4667_s0 + %s3786_s15]]   ;;  %s3789_s1 = smov 13  }
   0xc   :  { %s3885_s24 = sld [smem:[%s4667_s0 + %s3787_s20]]   ;;  %s3790_s7 = smov 14  }
   0xd   :  { %s3890_s30 = sld [smem:[%s4667_s0 + %s3788_s26]]   ;;  %s3791_s15 = smov 15  }
   0xe   :  { %s3895_s6 = sld [smem:[%s4667_s0 + %s3789_s1]]   ;;  %s3792_s22 = smov 16  }
   0xf   :  { %s3900_s12 = sld [smem:[%s4667_s0 + %s3790_s7]]   ;;  %s3793_s28 = smov 17  }
  0x10   :  { %s3905_s20 = sld [smem:[%s4667_s0 + %s3791_s15]]   ;;  %s3794_s7 = smov 18  }
  0x11   :  { %s3910_s27 = sld [smem:[%s4667_s0 + %s3792_s22]]   ;;  %s3795_s15 = smov 19  }
  0x12   :  { %s3915_s4 = sld [smem:[%s4667_s0 + %s3793_s28]]   ;;  %s3796_s22 = smov 20  }
  0x13   :  { %s3797_s28 = smov 21  }
  0x15   :  { %4674 = sst [smem:[#allocation5_spill]] %s3900_s12 }
  0x16   :  { %4675 = sst [smem:[#allocation6_spill]] %s3905_s20 }
  0x17   :  { %4676 = sst [smem:[#allocation7_spill]] %s3910_s27 }
  0x18   :  { %4677 = sst [smem:[#allocation8_spill]] %s3915_s4 }
  0x19   :  { %s3920_s12 = sld [smem:[%s4667_s0 + %s3794_s7]]   ;;  %s3798_s7 = smov 22  }
  0x1a   :  { %s3925_s20 = sld [smem:[%s4667_s0 + %s3795_s15]]   ;;  %s3799_s15 = smov 23  }
  0x1b   :  { %s3930_s27 = sld [smem:[%s4667_s0 + %s3796_s22]]   ;;  %s3800_s22 = smov 24  }
  0x1c   :  { %s3935_s4 = sld [smem:[%s4667_s0 + %s3797_s28]]   ;;  %s3801_s28 = smov 25  }
  0x1f   :  { %4678 = sst [smem:[#allocation9_spill]] %s3920_s12 }
  0x20   :  { %4679 = sst [smem:[#allocation10_spill]] %s3925_s20 }
  0x21   :  { %4680 = sst [smem:[#allocation11_spill]] %s3930_s27 }
  0x22   :  { %4681 = sst [smem:[#allocation12_spill]] %s3935_s4 }
  0x23   :  { %s3940_s12 = sld [smem:[%s4667_s0 + %s3798_s7]]   ;;  %s3802_s7 = smov 26  }
  0x24   :  { %s3945_s20 = sld [smem:[%s4667_s0 + %s3799_s15]]   ;;  %s3803_s15 = smov 27  }
  0x25   :  { %s3950_s27 = sld [smem:[%s4667_s0 + %s3800_s22]]   ;;  %s3804_s22 = smov 28  }
  0x26   :  { %s3955_s4 = sld [smem:[%s4667_s0 + %s3801_s28]]   ;;  %s3805_s28 = smov 29  }
  0x29   :  { %4682 = sst [smem:[#allocation13_spill]] %s3940_s12 }
  0x2a   :  { %4683 = sst [smem:[#allocation14_spill]] %s3945_s20 }
  0x2b   :  { %4684 = sst [smem:[#allocation15_spill]] %s3950_s27 }
  0x2c   :  { %4685 = sst [smem:[#allocation16_spill]] %s3955_s4 }
  0x2d   :  { %s3960_s12 = sld [smem:[%s4667_s0 + %s3802_s7]]   ;;  %s3806_s7 = smov 30  }
  0x2e   :  { %s3965_s20 = sld [smem:[%s4667_s0 + %s3803_s15]]   ;;  %s3807_s15 = smov 31  }
  0x2f   :  { %s3970_s27 = sld [smem:[%s4667_s0 + %s3804_s22]]   ;;  %s3808_s22 = smov 32  }
  0x30   :  { %s3975_s4 = sld [smem:[%s4667_s0 + %s3805_s28]]   ;;  %s3809_s28 = smov 33  }
  0x33   :  { %4686 = sst [smem:[#allocation17_spill]] %s3960_s12 }
  0x34   :  { %4687 = sst [smem:[#allocation18_spill]] %s3965_s20 }
  0x35   :  { %4688 = sst [smem:[#allocation19_spill]] %s3970_s27 }
  0x36   :  { %4689 = sst [smem:[#allocation20_spill]] %s3975_s4 }
  0x37   :  { %s3980_s12 = sld [smem:[%s4667_s0 + %s3806_s7]]   ;;  %s3810_s7 = smov 34  }
  0x38   :  { %s3985_s20 = sld [smem:[%s4667_s0 + %s3807_s15]]  }
  0x39   :  { %s3990_s27 = sld [smem:[%s4667_s0 + %s3808_s22]]  }
  0x3a   :  { %s3995_s4 = sld [smem:[%s4667_s0 + %s3809_s28]]  }
  0x3d   :  { %4690 = sst [smem:[#allocation21_spill]] %s3980_s12 }
  0x3e   :  { %s4000_s12 = sld [smem:[%s4667_s0 + %s3810_s7]]  }
  0x3f   :  { %v228_v0 = vld [vmem:[%s3830_s5] sm:$0xff]  ;;  %vm230_vm0 = vcmask 261120   ;;  %v229_v1 = vld [vmem:[%s3830_s5 + $0x8] sm:$0xff] }
  0x40   :  { %v231_v2 = vsel %vm230_vm0, %v228_v0, 0.0  ;;  %v234_v3 = vsel %vm230_vm0, %v229_v1, 0.0 }
  0x41   :  { %232 = vadd.xlane.f32.xlu0 %v231_v2 }
  0x45   :  { %235 = vadd.xlane.f32.xlu0 %v234_v3 }
  0x46   :  { %74 = vsyncpa [#allocation3], 0  ;;  %v3561_v14 = vld [vmem:[%s3850_s21] sm:$0xff]   ;;  %v3811_v15 = vmov 0.0   ;;  %vm3812_vm1 = vmmov 0   ;;  %v3562_v16 = vld [vmem:[%s3850_s21 + $0x8] sm:$0xff]   ;;  %v341_v57 = vlaneseq }
  0x47   :  { %3326 = vmatprep.subr.bf16.mxu0 %v3811_v15  ;;  %3330 = vmatprep.mubr.msk.bf16.mxu0 %vm3812_vm1, %v3811_v15  ;;  %v3173_v25 = vld [vmem:[%s3840_s13] ss:$0 sm:$0xff]  ;;  %s3813_s0 = smov 80   ;;  %s3814_s5 = smov 96   ;;  %vm348_vm2 = vcmask 130048   ;;  %vm395_vm3 = vcmask 64512  }
  0x48   :  { %3327 = vmatpush3.bf16.msra.mxu0 %v3561_v14  ;;  %3334 = vmatprep.subr.bf16.mxu1 %v3811_v15  ;;  %v3174_v29 = vld [vmem:[%s3845_s17] ss:$0 sm:$0xff]  ;;  %s3815_s13 = smov 112   ;;  %v342_v60 = vshrl.u32 %v341_v57, 7  ;;  %s3817_s17 = smov 64   ;;  %vm413_vm4 = vcmask 1043456  }
  0x49   :  { %3328 = vmatprep.subr.bf16.mxu0 %v3811_v15  ;;  %3336 = vmatprep.mubr.msk.bf16.mxu1 %vm3812_vm1, %v3811_v15  ;;  %v3175_v34 = vld [vmem:[%s3855_s25] ss:$0 sm:$0xff]  ;;  %s3818_s21 = smov 16   ;;  %vm1023_vm5 = vcmask 523264   ;;  %s4691_s25 = sld [smem:[#allocation7_spill]]  ;;  %vm2019_vm6 = vcmask 1041409  }
  0x4a   :  { %v225_v58 = vld [vmem:[%s3835_s9] sm:$0x3]  ;;  %v4065_v62 = vsub.s32 0, %v342_v60  ;;  %s3816_s9 = smov 48   ;;  %s4700_s15 = sld [smem:[#allocation15_spill]]  ;;  %vm2032_vm7 = vcmask 785408  }
  0x4b   :  { %v226_v59 = vsub.f32 1.0, %v225_v58  ;;  %s4701_s16 = sld [smem:[#allocation14_spill]]  ;;  %s4702_s18 = sld [smem:[#allocation16_spill]]  ;;  %vm2418_vm8 = vcmask 1044484   ;;  %vm2177_vm9 = vcmask 1042434   ;;  %vm2294_vm10 = vcmask 1043459  }
  0x4c   :  { %3329 = vmatpush3.bf16.msra.mxu0 %v3562_v16  ;;  %s4703_s22 = sld [smem:[#allocation19_spill]]  ;;  %s4704_s23 = sld [smem:[#allocation21_spill]]  ;;  %vm2535_vm11 = vcmask 1045509   ;;  %vm2656_vm12 = vcmask 1046534   ;;  %vm2771_vm13 = vcmask 1047559   ;;  %vm3123_vm14 = vcmask 238592  }
  0x4d   :  { %3340 = vmatprep.subr.bf16.mxu0 %v3811_v15  ;;  %v227_v61 = vmul.f32 -1e+09, %v226_v59  ;;  %s4705_s26 = sld [smem:[#allocation17_spill]]  ;;  %s4706_s28 = sld [smem:[#allocation18_spill]] }
  0x4e   :  { %s4707_s1 = sld [smem:[#allocation20_spill]] }
  0x4f   :  { %v4068_v63 = vrot.slane %v227_v61, %v4065_v62 }
  0xce   :  { %v233_v4 = vpop.xlane.xlu0 %232 }
  0xcf   :  { %v238_v5 = vmul.f32 0.03125, %v233_v4 }
  0xd1   :  { %v240_v6 = vsub.f32 %v228_v0, %v238_v5 }
  0xd2   :  { %v236_v7 = vpop.xlane.xlu0 %235 }
  0xd3   :  { %v239_v8 = vmul.f32 0.03125, %v236_v7  ;;  %v242_v9 = vmul.f32 %v240_v6, %v240_v6 }
  0xd5   :  { %v241_v10 = vsub.f32 %v229_v1, %v239_v8  ;;  %v244_v11 = vsel %vm230_vm0, %v242_v9, 0.0  ;;  %v4073_v9 = vsub.s32 1, %v342_v60 }
  0xd6   :  { %245 = vadd.xlane.f32.xlu1 %v244_v11 }
  0xd7   :  { %v243_v12 = vmul.f32 %v241_v10, %v241_v10 }
  0xd9   :  { %v247_v13 = vsel %vm230_vm0, %v243_v12, 0.0 }
  0xda   :  { %248 = vadd.xlane.f32.xlu1 %v247_v13  ;;  %v4077_v13 = vrot.slane %v227_v61, %v4073_v9 }
 0x163   :  { %v246_v17 = vpop.xlane.xlu1 %245 }
 0x164   :  { %v250_v18 = vmul.f32 0.03125, %v246_v17 }
 0x166   :  { %v252_v19 = vadd.f32 1e-12, %v250_v18 }
 0x167   :  { %v249_v20 = vpop.xlane.xlu1 %248 }
 0x168   :  { %3603 = vrsqrt.f32 %v252_v19  ;;  %v251_v21 = vmul.f32 0.03125, %v249_v20 }
 0x16a   :  { %v253_v22 = vadd.f32 1e-12, %v251_v21 }
 0x16c   :  { %3605 = vrsqrt.f32 %v253_v22 }
 0x172   :  { %v3604_v23 = vpop.eup %3603 }
 0x173   :  { %v256_v24 = vmul.f32 %v3604_v23, %v240_v6 }
 0x175   :  { %v264_v28 = vmul.f32 %v3173_v25, %v256_v24 }
 0x176   :  { %v3606_v26 = vpop.eup %3605 }
 0x177   :  { %v257_v27 = vmul.f32 %v3606_v26, %v241_v10  ;;  %v4020_v31 = vadd.f32 %v3174_v29, %v264_v28 }
 0x179   :  { %v265_v30 = vmul.f32 %v3173_v25, %v257_v27 }
 0x17b   :  { %v4022_v32 = vadd.f32 %v3174_v29, %v265_v30 }
 0x17d   :  { %v274_v33 = vpack.c.bf16 %v4022_v32, %v4020_v31 }
 0x17f   :  { %3331 = vmatmul.mubr.msk.bf16.vlgmr.msra.gmra.mrb[0].mxu0 %vm230_vm0, %v274_v33 }
 0x180   :  { %3342 = vmatprep.mubr.msk.bf16.mxu0 %vm3812_vm1, %v3811_v15 }
 0x252   :  { %v330_v35 = vpop.f32.mrb[0].mxu0 }
 0x253   :  { %v331_v36 = vadd.f32 %v3175_v34, %v330_v35  ;;  %v3332_v37 = vpop.f32.mrb[1].mxu0 }
 0x254   :  { %v333_v38 = vpop.f32.mrb[2].mxu0 }
 0x255   :  { %v337_v39 = vmul.f32 0.25, %v331_v36  ;;  %v4030_v40 = vpack.c.bf16 %v331_v36, %v331_v36  ;;  %v334_v41 = vadd.f32 %v3175_v34, %v333_v38  ;;  %v3333_v42 = vpop.f32.mrb[3].mxu0 }
 0x257   :  { %460 = vrot.lane.b32.xlu1 %v4030_v40, %s3813_s0  ;;  %346 = vrot.lane.b32.xlu0 %v4030_v40, %s3814_s5  ;;  %v339_v43 = vpack.c.bf16 %v337_v39, %v337_v39  ;;  %v4036_v44 = vpack.c.bf16 %v334_v41, %v334_v41  ;;  %v338_v45 = vmul.f32 0.25, %v334_v41 }
 0x259   :  { %v573_v46 = vpack.c.bf16 %v338_v45, %v338_v45 }
 0x25b   :  { %458 = vrot.lane.b32.xlu1 %v339_v43, %s3815_s13  ;;  %691 = vrot.lane.b32.xlu0 %v4036_v44, %s3813_s0 }
 0x25f   :  { %580 = vrot.lane.b32.xlu1 %v4036_v44, %s3814_s5 }
 0x263   :  { %689 = vrot.lane.b32.xlu1 %v573_v46, %s3815_s13 }
 0x2c9   :  { %v347_v47 = vpop.permute.xlu0 %346  ;;  %v461_v49 = vpop.permute.xlu1 %460 }
 0x2ca   :  { %v353_v48 = vsel %vm348_vm2, %v347_v47, 0  ;;  %v466_v51 = vsel %vm348_vm2, %v461_v49, 0 }
 0x2cb   :  { %3335 = vmatpush3.bf16.xpose.msra.mxu1 %v353_v48 }
 0x2cc   :  { %3346 = vmatprep.subr.bf16.mxu1 %v3811_v15 }
 0x2cd   :  { %v459_v50 = vpop.permute.xlu1 %458  ;;  %v692_v54 = vpop.permute.xlu0 %691 }
 0x2ce   :  { %v697_v55 = vsel %vm348_vm2, %v692_v54, 0 }
 0x2d1   :  { %v581_v52 = vpop.permute.xlu1 %580 }
 0x2d2   :  { %3337 = vmatmul.mubr.msk.bf16.vlgmr.msra.gmra.mrb[0].mxu1 %vm348_vm2, %v339_v43  ;;  %v586_v53 = vsel %vm348_vm2, %v581_v52, 0 }
 0x2d3   :  { %3347 = vmatpush3.bf16.xpose.msra.mxu1 %v466_v51  ;;  %3348 = vmatprep.mubr.msk.bf16.mxu1 %vm3812_vm1, %v3811_v15 }
 0x2d4   :  { %3358 = vmatprep.subr.bf16.mxu1 %v3811_v15 }
 0x2d5   :  { %v690_v56 = vpop.permute.xlu1 %689 }
 0x2da   :  { %3349 = vmatmul.mubr.msk.bf16.vlgmr.msra.gmra.mrb[4].mxu1 %vm348_vm2, %v459_v50 }
 0x2db   :  { %3359 = vmatpush3.bf16.xpose.msra.mxu1 %v586_v53  ;;  %3360 = vmatprep.mubr.msk.bf16.mxu1 %vm3812_vm1, %v3811_v15 }
 0x2dc   :  { %3370 = vmatprep.subr.bf16.mxu1 %v3811_v15 }
 0x2e2   :  { %3361 = vmatmul.mubr.msk.bf16.vlgmr.msra.gmra.mrb[8].mxu1 %vm348_vm2, %v573_v46 }
 0x2e3   :  { %3371 = vmatpush3.bf16.xpose.msra.mxu1 %v697_v55  ;;  %3372 = vmatprep.mubr.msk.bf16.mxu1 %vm3812_vm1, %v3811_v15 }
 0x2e4   :  { %3382 = vmatprep.subr.bf16.mxu1 %v3811_v15 }
 0x2ea   :  { %3373 = vmatmul.mubr.msk.bf16.vlgmr.msra.gmra.mrb[12].mxu1 %vm348_vm2, %v690_v56 }
 0x2eb   :  { %3386 = vmatprep.mubr.msk.bf16.mxu1 %vm3812_vm1, %v3811_v15 }
 0x3a5   :  { %v389_v0 = vpop.f32.mrb[0].mxu1 }
 0x3a6   :  { %v390_v1 = vadd.f32 %v389_v0, %v4068_v63  ;;  %v3338_v2 = vpop.f32.mrb[1].mxu1 }
 0x3a7   :  { %v392_v3 = vpop.f32.mrb[2].mxu1 }
 0x3a8   :  { %v3339_v4 = vpop.f32.mrb[3].mxu1  ;;  %v396_v5 = vsel %vm395_vm3, %v390_v1, -inf }
 0x3a9   :  { %397 = vmax.xlane.f32.xlu0 %v396_v5 }
 0x3ad   :  { %v502_v6 = vpop.f32.mrb[4].mxu1 }
 0x3ae   :  { %v503_v7 = vadd.f32 %v502_v6, %v4068_v63  ;;  %v3350_v8 = vpop.f32.mrb[5].mxu1 }
 0x3af   :  { %v505_v10 = vpop.f32.mrb[6].mxu1 }
 0x3b0   :  { %v3351_v11 = vpop.f32.mrb[7].mxu1  ;;  %v508_v12 = vsel %vm395_vm3, %v503_v7, -inf }
 0x3b1   :  { %509 = vmax.xlane.f32.xlu1 %v508_v12  ;;  %v3563_v12 = vld [vmem:[%s3860_s29] sm:$0xff]  }
 0x3b2   :  { %3383 = vmatpush3.bf16.msra.mxu1 %v3563_v12 }
 0x3b3   :  { %3384 = vmatprep.subr.bf16.mxu1 %v3811_v15 }
 0x3b5   :  { %v622_v14 = vpop.f32.mrb[8].mxu1 }
 0x3b6   :  { %v623_v16 = vadd.f32 %v622_v14, %v4077_v13  ;;  %v3362_v17 = vpop.f32.mrb[9].mxu1 }
 0x3b7   :  { %v625_v18 = vpop.f32.mrb[10].mxu1 }
 0x3b8   :  { %v3363_v19 = vpop.f32.mrb[11].mxu1  ;;  %v628_v20 = vsel %vm395_vm3, %v623_v16, -inf }
 0x3b9   :  { %629 = vmax.xlane.f32.xlu0 %v628_v20 }
 0x3bd   :  { %v733_v21 = vpop.f32.mrb[12].mxu1 }
 0x3be   :  { %v734_v22 = vadd.f32 %v733_v21, %v4077_v13  ;;  %v3374_v23 = vpop.f32.mrb[13].mxu1 }
 0x3bf   :  { %v736_v24 = vpop.f32.mrb[14].mxu1 }
 0x3c0   :  { %v3375_v25 = vpop.f32.mrb[15].mxu1  ;;  %v739_v26 = vsel %vm395_vm3, %v734_v22, -inf }
 0x3c1   :  { %740 = vmax.xlane.f32.xlu0 %v739_v26 }
 0x436   :  { %v398_v27 = vpop.xlane.xlu0 %397 }
 0x437   :  { %v399_v28 = vsub.f32 %v390_v1, %v398_v27  ;;  %v3564_v27 = vld [vmem:[%s3860_s29 + $0x8] sm:$0xff]   ;;  %s4692_s29 = sld [smem:[#allocation5_spill]] }
 0x438   :  { %3385 = vmatpush3.bf16.msra.mxu1 %v3564_v27 }
 0x439   :  { %v400_v29 = vmul.f32 1.442695, %v399_v28  ;;  %3398 = vmatprep.subr.bf16.mxu1 %v3811_v15 }
 0x43b   :  { %3607 = vpow2.f32 %v400_v29 }
 0x43e   :  { %v510_v30 = vpop.xlane.xlu1 %509 }
 0x43f   :  { %v511_v33 = vsub.f32 %v503_v7, %v510_v30 }
 0x441   :  { %v512_v34 = vmul.f32 1.442695, %v511_v33 }
 0x443   :  { %3609 = vpow2.f32 %v512_v34 }
 0x445   :  { %v3608_v35 = vpop.eup %3607 }
 0x446   :  { %v630_v36 = vpop.xlane.xlu0 %629  ;;  %v402_v37 = vsel %vm395_vm3, %v3608_v35, 0.0 }
 0x447   :  { %v631_v38 = vsub.f32 %v623_v16, %v630_v36  ;;  %403 = vadd.xlane.f32.xlu0 %v402_v37 }
 0x449   :  { %v632_v39 = vmul.f32 1.442695, %v631_v38 }
 0x44b   :  { %3611 = vpow2.f32 %v632_v39 }
 0x44d   :  { %v3610_v41 = vpop.eup %3609 }
 0x44e   :  { %v514_v42 = vsel %vm395_vm3, %v3610_v41, 0.0  ;;  %v741_v46 = vpop.xlane.xlu0 %740 }
 0x44f   :  { %515 = vadd.xlane.f32.xlu1 %v514_v42  ;;  %v742_v47 = vsub.f32 %v734_v22, %v741_v46  ;;  %v3187_v42 = vld [vmem:[%s3865_s3] ss:$0 sm:$0xff]  ;;  %s4693_s3 = sld [smem:[#allocation6_spill]] }
 0x451   :  { %v743_v48 = vmul.f32 1.442695, %v742_v47 }
 0x453   :  { %3613 = vpow2.f32 %v743_v48 }
 0x455   :  { %v3612_v43 = vpop.eup %3611 }
 0x456   :  { %v634_v45 = vsel %vm395_vm3, %v3612_v43, 0.0 }
 0x457   :  { %635 = vadd.xlane.f32.xlu0 %v634_v45 }
 0x45d   :  { %v3614_v49 = vpop.eup %3613 }
 0x45e   :  { %v745_v50 = vsel %vm395_vm3, %v3614_v49, 0.0 }
 0x460   :  { %520 = vrot.lane.b32.xlu1 %v4030_v40, %s3816_s9 }
 0x464   :  { %640 = vrot.lane.b32.xlu1 %v4036_v44, %s3817_s17 }
 0x46d   :  { %408 = vrot.lane.b32.xlu0 %v4030_v40, %s3817_s17 }
 0x488   :  { %746 = vadd.xlane.f32.xlu1 %v745_v50 }
 0x499   :  { %751 = vrot.lane.b32.xlu1 %v4036_v44, %s3816_s9 }
 0x4d4   :  { %v404_v51 = vpop.xlane.xlu0 %403 }
 0x4d5   :  { %3615 = vrcp.f32 %v404_v51 }
 0x4dc   :  { %v516_v52 = vpop.xlane.xlu1 %515 }
 0x4dd   :  { %3617 = vrcp.f32 %v516_v52 }
 0x4df   :  { %v3616_v53 = vpop.eup %3615 }
 0x4e0   :  { %v406_v55 = vmul.f32 %v3616_v53, %v3608_v35  ;;  %v521_v57 = vpop.permute.xlu1 %520 }
 0x4e1   :  { %v526_v44 = vsel %vm413_vm4, %v521_v57, 0 }
 0x4e2   :  { %v407_v58 = vpack.c.bf16 %v406_v55, %v406_v55 }
 0x4e4   :  { %v636_v54 = vpop.xlane.xlu0 %635  ;;  %v641_v61 = vpop.permute.xlu1 %640 }
 0x4e5   :  { %3619 = vrcp.f32 %v636_v54  ;;  %v646_v2 = vsel %vm413_vm4, %v641_v61, 0  ;;  %v3566_v61 = vld [vmem:[%s3880_s19 + $0x8] sm:$0xff]  }
 0x4e7   :  { %v3618_v59 = vpop.eup %3617 }
 0x4e8   :  { %v409_v40 = vpop.permute.xlu0 %408  ;;  %v518_v60 = vmul.f32 %v3618_v59, %v3610_v41 }
 0x4e9   :  { %v415_v56 = vsel %vm413_vm4, %v409_v40, 0 }
 0x4ea   :  { %3341 = vmatpush3.bf16.msra.mxu0 %v415_v56  ;;  %v519_v0 = vpack.c.bf16 %v518_v60, %v518_v60 }
 0x4eb   :  { %3352 = vmatprep.subr.bf16.mxu0 %v3811_v15 }
 0x4ed   :  { %3343 = vmatmul.mubr.msk.bf16.vlgmr.msra.gmra.mrb[4].mxu0 %vm395_vm3, %v407_v58 }
 0x4ee   :  { %3353 = vmatpush3.bf16.msra.mxu0 %v526_v44  ;;  %3354 = vmatprep.mubr.msk.bf16.mxu0 %vm3812_vm1, %v3811_v15 }
 0x4ef   :  { %3364 = vmatprep.subr.bf16.mxu0 %v3811_v15  ;;  %v3620_v1 = vpop.eup %3619 }
 0x4f0   :  { %v638_v3 = vmul.f32 %v3620_v1, %v3612_v43 }
 0x4f2   :  { %v639_v4 = vpack.c.bf16 %v638_v3, %v638_v3 }
 0x4f5   :  { %3355 = vmatmul.mubr.msk.bf16.vlgmr.msra.gmra.mrb[8].mxu0 %vm395_vm3, %v519_v0 }
 0x4f6   :  { %3365 = vmatpush3.bf16.msra.mxu0 %v646_v2  ;;  %3366 = vmatprep.mubr.msk.bf16.mxu0 %vm3812_vm1, %v3811_v15 }
 0x4f7   :  { %3376 = vmatprep.subr.bf16.mxu0 %v3811_v15 }
 0x4fd   :  { %3367 = vmatmul.mubr.msk.bf16.vlgmr.msra.gmra.mrb[12].mxu0 %vm395_vm3, %v639_v4 }
 0x4fe   :  { %3378 = vmatprep.mubr.msk.bf16.mxu0 %vm3812_vm1, %v3811_v15 }
 0x515   :  { %v747_v5 = vpop.xlane.xlu1 %746 }
 0x516   :  { %3621 = vrcp.f32 %v747_v5 }
 0x519   :  { %v752_v6 = vpop.permute.xlu1 %751 }
 0x51a   :  { %v757_v7 = vsel %vm413_vm4, %v752_v6, 0 }
 0x51b   :  { %3377 = vmatpush3.bf16.msra.mxu0 %v757_v7 }
 0x51c   :  { %3390 = vmatprep.subr.bf16.mxu0 %v3811_v15 }
 0x520   :  { %v3622_v8 = vpop.eup %3621 }
 0x521   :  { %v749_v10 = vmul.f32 %v3622_v8, %v3614_v49  ;;  %v3191_v8 = vld [vmem:[%s3870_s8] ss:$0 sm:$0xff]  ;;  %s4694_s8 = sld [smem:[#allocation8_spill]] }
 0x523   :  { %v750_v11 = vpack.c.bf16 %v749_v10, %v749_v10 }
 0x525   :  { %3379 = vmatmul.mubr.msk.bf16.vlgmr.msra.gmra.mrb[16].mxu0 %vm395_vm3, %v750_v11 }
 0x526   :  { %3394 = vmatprep.mubr.msk.bf16.mxu0 %vm3812_vm1, %v3811_v15 }
 0x5c0   :  { %v451_v14 = vpop.f32.mrb[4].mxu0 }
 0x5c1   :  { %v3344_v16 = vpop.f32.mrb[5].mxu0 }
 0x5c2   :  { %v454_v17 = vpop.f32.mrb[6].mxu0 }
 0x5c3   :  { %v3345_v18 = vpop.f32.mrb[7].mxu0 }
 0x5c8   :  { %v562_v19 = vpop.f32.mrb[8].mxu0 }
 0x5c9   :  { %v3356_v20 = vpop.f32.mrb[9].mxu0 }
 0x5ca   :  { %v565_v21 = vpop.f32.mrb[10].mxu0  ;;  %v3567_v20 = vld [vmem:[%s3890_s30] sm:$0xff]  }
 0x5cb   :  { %v3357_v22 = vpop.f32.mrb[11].mxu0  ;;  %v3568_v21 = vld [vmem:[%s3890_s30 + $0x8] sm:$0xff]  }
 0x5cc   :  { %v3569_v22 = vld [vmem:[%s3890_s30 + $0x10] sm:$0xff]  }
 0x5d0   :  { %v682_v23 = vpop.f32.mrb[12].mxu0 }
 0x5d1   :  { %v3368_v24 = vpop.f32.mrb[13].mxu0 }
 0x5d2   :  { %v685_v25 = vpop.f32.mrb[14].mxu0  ;;  %v3193_v24 = vld [vmem:[%s3885_s24] ss:$0 sm:$0xff]  ;;  %s4697_s24 = sld [smem:[#allocation13_spill]] }
 0x5d3   :  { %v3369_v26 = vpop.f32.mrb[15].mxu0 }
 0x5f8   :  { %v793_v28 = vpop.f32.mrb[16].mxu0 }
 0x5f9   :  { %v3551_v29 = vpack.i.bf16 %v793_v28, %v562_v19  ;;  %v3380_v30 = vpop.f32.mrb[17].mxu0 }
 0x5fa   :  { %v796_v33 = vpop.f32.mrb[18].mxu0 }
 0x5fb   :  { %3552 = vrot.lane.b32.xlu0 %v3551_v29, %s3818_s21  ;;  %v3381_v34 = vpop.f32.mrb[19].mxu0 }
 0x66d   :  { %v3553_v35 = vpop.permute.xlu0 %3552 }
 0x66e   :  { %v3555_v36 = vunpack.i.h.bf16 %v3553_v35  ;;  %v3554_v37 = vunpack.i.l.bf16 %v3553_v35 }
 0x670   :  { %v803_v38 = vsel %vm348_vm2, %v682_v23, %v3555_v36  ;;  %v572_v39 = vsel %vm348_vm2, %v451_v14, %v3554_v37  ;;  %v3192_v14 = vld [vmem:[%s3875_s14] ss:$0 sm:$0xff]  ;;  %v3570_v23 = vld [vmem:[%s3890_s30 + $0x18] sm:$0xff]   ;;  %s4695_s14 = sld [smem:[#allocation9_spill]]  ;;  %s4698_s30 = sld [smem:[#allocation11_spill]] }
 0x671   :  { %v804_v41 = vpack.c.bf16 %v803_v38, %v572_v39 }
 0x673   :  { %3387 = vmatmul.mubr.msk.bf16.vlgmr.msra.gmra.mrb[16].mxu1 %vm230_vm0, %v804_v41 }
 0x674   :  { %3406 = vmatprep.mubr.msk.bf16.mxu1 %vm3812_vm1, %v3811_v15  ;;  %3399 = vmatpush3.bf16.msra.mxu1 %v3567_v20 }
 0x675   :  { %3400 = vmatprep.subr.bf16.mxu1 %v3811_v15 }
 0x678   :  { %3401 = vmatpush3.bf16.msra.mxu1 %v3568_v21  ;;  %v3203_v21 = vld [vmem:[%s4692_s29] ss:$0 sm:$0xff] }
 0x679   :  { %3402 = vmatprep.subr.bf16.mxu1 %v3811_v15 }
 0x67c   :  { %3403 = vmatpush3.bf16.msra.mxu1 %v3569_v22 }
 0x67d   :  { %3404 = vmatprep.subr.bf16.mxu1 %v3811_v15 }
 0x680   :  { %3405 = vmatpush3.bf16.msra.mxu1 %v3570_v23 }
 0x681   :  { %3424 = vmatprep.subr.bf16.mxu1 %v3811_v15 }
 0x746   :  { %v860_v43 = vpop.f32.mrb[16].mxu1 }
 0x747   :  { %v861_v45 = vadd.f32 %v3187_v42, %v860_v43  ;;  %v3388_v46 = vpop.f32.mrb[17].mxu1 }
 0x748   :  { %v863_v47 = vpop.f32.mrb[18].mxu1 }
 0x749   :  { %v864_v48 = vadd.f32 %v3187_v42, %v863_v47  ;;  %v3389_v49 = vpop.f32.mrb[19].mxu1  ;;  %v867_v50 = vadd.f32 %v861_v45, %v4020_v31 }
 0x74b   :  { %v869_v51 = vsel %vm230_vm0, %v867_v50, 0.0  ;;  %v868_v52 = vadd.f32 %v864_v48, %v4022_v32  ;;  %v3565_v32 = vld [vmem:[%s3880_s19] sm:$0xff]   ;;  %s4696_s19 = sld [smem:[#allocation10_spill]] }
 0x74c   :  { %870 = vadd.xlane.f32.xlu1 %v869_v51  ;;  %3391 = vmatpush3.bf16.msra.mxu0 %v3565_v32 }
 0x74d   :  { %v872_v53 = vsel %vm230_vm0, %v868_v52, 0.0  ;;  %3392 = vmatprep.subr.bf16.mxu0 %v3811_v15 }
 0x74e   :  { %873 = vadd.xlane.f32.xlu0 %v872_v53 }
 0x750   :  { %3393 = vmatpush3.bf16.msra.mxu0 %v3566_v61 }
 0x751   :  { %3410 = vmatprep.subr.bf16.mxu0 %v3811_v15 }
 0x7d9   :  { %v871_v54 = vpop.xlane.xlu1 %870 }
 0x7da   :  { %v875_v55 = vmul.f32 0.03125, %v871_v54  ;;  %v3197_v54 = vld [vmem:[%s3895_s6] ss:$0 sm:$0xff]  ;;  %s4699_s6 = sld [smem:[#allocation12_spill]] }
 0x7db   :  { %v874_v40 = vpop.xlane.xlu0 %873 }
 0x7dc   :  { %v877_v56 = vsub.f32 %v867_v50, %v875_v55  ;;  %v876_v57 = vmul.f32 0.03125, %v874_v40 }
 0x7de   :  { %v878_v58 = vsub.f32 %v868_v52, %v876_v57  ;;  %v879_v59 = vmul.f32 %v877_v56, %v877_v56 }
 0x7e0   :  { %v881_v44 = vsel %vm230_vm0, %v879_v59, 0.0  ;;  %v880_v31 = vmul.f32 %v878_v58, %v878_v58 }
 0x7e1   :  { %882 = vadd.xlane.f32.xlu0 %v881_v44 }
 0x7e2   :  { %v884_v60 = vsel %vm230_vm0, %v880_v31, 0.0 }
 0x7e5   :  { %885 = vadd.xlane.f32.xlu0 %v884_v60 }
 0x86e   :  { %v883_v0 = vpop.xlane.xlu0 %882 }
 0x86f   :  { %v887_v1 = vmul.f32 0.03125, %v883_v0 }
 0x871   :  { %v889_v2 = vadd.f32 1e-12, %v887_v1 }
 0x872   :  { %v886_v3 = vpop.xlane.xlu0 %885 }
 0x873   :  { %3623 = vrsqrt.f32 %v889_v2  ;;  %v888_v4 = vmul.f32 0.03125, %v886_v3 }
 0x875   :  { %v890_v5 = vadd.f32 1e-12, %v888_v4 }
 0x877   :  { %3625 = vrsqrt.f32 %v890_v5 }
 0x87d   :  { %v3624_v6 = vpop.eup %3623 }
 0x87e   :  { %v893_v7 = vmul.f32 %v3624_v6, %v877_v56 }
 0x880   :  { %v901_v11 = vmul.f32 %v3191_v8, %v893_v7 }
 0x881   :  { %v3626_v10 = vpop.eup %3625 }
 0x882   :  { %v894_v12 = vmul.f32 %v3626_v10, %v878_v58  ;;  %v909_v17 = vadd.f32 %v3192_v14, %v901_v11  ;;  %v3571_v10 = vld [vmem:[%s4691_s25] sm:$0xff]   ;;  %v3572_v11 = vld [vmem:[%s4691_s25 + $0x8] sm:$0xff]  }
 0x884   :  { %v902_v16 = vmul.f32 %v3191_v8, %v894_v12 }
 0x886   :  { %v910_v18 = vadd.f32 %v3192_v14, %v902_v16 }
 0x888   :  { %v911_v19 = vpack.c.bf16 %v910_v18, %v909_v17 }
 0x88a   :  { %3395 = vmatmul.mubr.msk.bf16.vlgmr.msra.gmra.mrb[20].mxu0 %vm230_vm0, %v911_v19 }
 0x88b   :  { %3414 = vmatprep.mubr.msk.bf16.mxu0 %vm3812_vm1, %v3811_v15  ;;  %3411 = vmatpush3.bf16.msra.mxu0 %v3571_v10 }
 0x88c   :  { %3412 = vmatprep.subr.bf16.mxu0 %v3811_v15 }
 0x88f   :  { %3413 = vmatpush3.bf16.msra.mxu0 %v3572_v11 }
 0x890   :  { %3418 = vmatprep.subr.bf16.mxu0 %v3811_v15 }
 0x95d   :  { %v967_v25 = vpop.f32.mrb[20].mxu0 }
 0x95e   :  { %v968_v26 = vadd.f32 %v3193_v24, %v967_v25  ;;  %v3396_v27 = vpop.f32.mrb[21].mxu0 }
 0x95f   :  { %v970_v28 = vpop.f32.mrb[22].mxu0 }
 0x960   :  { %v974_v29 = vmul.f32 %v968_v26, %v968_v26  ;;  %v971_v30 = vadd.f32 %v3193_v24, %v970_v28  ;;  %v3397_v33 = vpop.f32.mrb[23].mxu0 }
 0x961   :  { %v3205_v33 = vld [vmem:[%s4694_s8] ss:$0 sm:$0xff] }
 0x962   :  { %v976_v34 = vmul.f32 %v974_v29, %v968_v26  ;;  %v975_v35 = vmul.f32 %v971_v30, %v971_v30 }
 0x964   :  { %v978_v36 = vmul.f32 0.044715, %v976_v34  ;;  %v977_v37 = vmul.f32 %v975_v35, %v971_v30 }
 0x966   :  { %v980_v38 = vadd.f32 %v978_v36, %v968_v26  ;;  %v979_v39 = vmul.f32 0.044715, %v977_v37 }
 0x968   :  { %v982_v41 = vmul.f32 0.7978846, %v980_v38  ;;  %v981_v42 = vadd.f32 %v979_v39, %v971_v30 }
 0x96a   :  { %3627 = vtanh.f32 %v982_v41  ;;  %v983_v43 = vmul.f32 0.7978846, %v981_v42 }
 0x96c   :  { %3629 = vtanh.f32 %v983_v43 }
 0x974   :  { %v3628_v45 = vpop.eup %3627 }
 0x975   :  { %v986_v46 = vadd.f32 1.0, %v3628_v45 }
 0x976   :  { %v3630_v47 = vpop.eup %3629 }
 0x977   :  { %v988_v48 = vmul.f32 0.5, %v986_v46  ;;  %v987_v49 = vadd.f32 1.0, %v3630_v47 }
 0x979   :  { %v989_v50 = vmul.f32 0.5, %v987_v49  ;;  %v990_v51 = vmul.f32 %v988_v48, %v968_v26  ;;  %v3204_v26 = vld [vmem:[%s4693_s3] ss:$0 sm:$0xff] }
 0x97b   :  { %v991_v52 = vmul.f32 %v989_v50, %v971_v30 }
 0x97d   :  { %v992_v53 = vpack.c.bf16 %v991_v52, %v990_v51 }
 0x97f   :  { %3407 = vmatmul.mubr.msk.bf16.vlgmr.msra.gmra.mrb[20].mxu1 %vm1023_vm5, %v992_v53 }
 0x980   :  { %3426 = vmatprep.mubr.msk.bf16.mxu1 %vm3812_vm1, %v3811_v15 }
 0xa52   :  { %v1061_v55 = vpop.f32.mrb[20].mxu1 }
 0xa53   :  { %v1062_v40 = vadd.f32 %v3197_v54, %v1061_v55  ;;  %v3408_v56 = vpop.f32.mrb[21].mxu1 }
 0xa54   :  { %v1064_v57 = vpop.f32.mrb[22].mxu1 }
 0xa55   :  { %v1065_v58 = vadd.f32 %v3197_v54, %v1064_v57  ;;  %v3409_v59 = vpop.f32.mrb[23].mxu1  ;;  %v1068_v44 = vadd.f32 %v1062_v40, %v909_v17 }
 0xa57   :  { %v1070_v31 = vsel %vm230_vm0, %v1068_v44, 0.0  ;;  %v1069_v60 = vadd.f32 %v1065_v58, %v910_v18 }
 0xa58   :  { %1071 = vadd.xlane.f32.xlu1 %v1070_v31 }
 0xa59   :  { %v1073_v32 = vsel %vm230_vm0, %v1069_v60, 0.0 }
 0xa5a   :  { %1074 = vadd.xlane.f32.xlu0 %v1073_v32 }
 0xae5   :  { %v1072_v61 = vpop.xlane.xlu1 %1071 }
 0xae6   :  { %v1076_v0 = vmul.f32 0.03125, %v1072_v61 }
 0xae7   :  { %v1075_v1 = vpop.xlane.xlu0 %1074 }
 0xae8   :  { %v1078_v2 = vsub.f32 %v1068_v44, %v1076_v0  ;;  %v1077_v3 = vmul.f32 0.03125, %v1075_v1 }
 0xaea   :  { %v1079_v4 = vsub.f32 %v1069_v60, %v1077_v3  ;;  %v1080_v5 = vmul.f32 %v1078_v2, %v1078_v2 }
 0xaec   :  { %v1082_v6 = vsel %vm230_vm0, %v1080_v5, 0.0  ;;  %v1081_v7 = vmul.f32 %v1079_v4, %v1079_v4 }
 0xaed   :  { %1083 = vadd.xlane.f32.xlu1 %v1082_v6 }
 0xaee   :  { %v1085_v8 = vsel %vm230_vm0, %v1081_v7, 0.0 }
 0xaef   :  { %1086 = vadd.xlane.f32.xlu0 %v1085_v8 }
 0xb7a   :  { %v1084_v12 = vpop.xlane.xlu1 %1083 }
 0xb7b   :  { %v1088_v14 = vmul.f32 0.03125, %v1084_v12 }
 0xb7c   :  { %v1087_v16 = vpop.xlane.xlu0 %1086 }
 0xb7d   :  { %v1090_v17 = vadd.f32 1e-12, %v1088_v14  ;;  %v1089_v18 = vmul.f32 0.03125, %v1087_v16 }
 0xb7f   :  { %3631 = vrsqrt.f32 %v1090_v17  ;;  %v1091_v19 = vadd.f32 1e-12, %v1089_v18 }
 0xb81   :  { %3633 = vrsqrt.f32 %v1091_v19 }
 0xb89   :  { %v3632_v20 = vpop.eup %3631 }
 0xb8a   :  { %v1094_v22 = vmul.f32 %v3632_v20, %v1078_v2 }
 0xb8b   :  { %v3634_v23 = vpop.eup %3633 }
 0xb8c   :  { %v1102_v24 = vmul.f32 %v3203_v21, %v1094_v22  ;;  %v1095_v25 = vmul.f32 %v3634_v23, %v1079_v4 }
 0xb8e   :  { %v1103_v27 = vmul.f32 %v3203_v21, %v1095_v25  ;;  %v4164_v28 = vadd.f32 %v3204_v26, %v1102_v24 }
 0xb90   :  { %v4166_v29 = vadd.f32 %v3204_v26, %v1103_v27 }
 0xb92   :  { %v1112_v30 = vpack.c.bf16 %v4166_v29, %v4164_v28 }
 0xb94   :  { %3415 = vmatmul.mubr.msk.bf16.vlgmr.msra.gmra.mrb[24].mxu0 %vm230_vm0, %v1112_v30 }
 0xb95   :  { %3420 = vmatprep.mubr.msk.bf16.mxu0 %vm3812_vm1, %v3811_v15 }
 0xc67   :  { %v1168_v34 = vpop.f32.mrb[24].mxu0 }
 0xc68   :  { %v1169_v35 = vadd.f32 %v3205_v33, %v1168_v34  ;;  %v3416_v36 = vpop.f32.mrb[25].mxu0 }
 0xc69   :  { %v1171_v37 = vpop.f32.mrb[26].mxu0 }
 0xc6a   :  { %v1175_v38 = vmul.f32 0.25, %v1169_v35  ;;  %v4174_v39 = vpack.c.bf16 %v1169_v35, %v1169_v35  ;;  %v1172_v41 = vadd.f32 %v3205_v33, %v1171_v37  ;;  %v3417_v42 = vpop.f32.mrb[27].mxu0 }
 0xc6c   :  { %v1176_v43 = vmul.f32 0.25, %v1172_v41  ;;  %1291 = vrot.lane.b32.xlu0 %v4174_v39, %s3813_s0  ;;  %1180 = vrot.lane.b32.xlu1 %v4174_v39, %s3814_s5  ;;  %v1177_v45 = vpack.c.bf16 %v1175_v38, %v1175_v38  ;;  %v4182_v47 = vpack.c.bf16 %v1172_v41, %v1172_v41 }
 0xc6e   :  { %v1404_v46 = vpack.c.bf16 %v1176_v43, %v1176_v43 }
 0xc70   :  { %1289 = vrot.lane.b32.xlu1 %v1177_v45, %s3815_s13  ;;  %1516 = vrot.lane.b32.xlu0 %v1404_v46, %s3815_s13 }
 0xc74   :  { %1407 = vrot.lane.b32.xlu1 %v4182_v47, %s3814_s5 }
 0xc78   :  { %1518 = vrot.lane.b32.xlu1 %v4182_v47, %s3813_s0 }
 0xcde   :  { %v1181_v48 = vpop.permute.xlu1 %1180  ;;  %v1292_v50 = vpop.permute.xlu0 %1291 }
 0xcdf   :  { %v1186_v49 = vsel %vm348_vm2, %v1181_v48, 0  ;;  %v1297_v52 = vsel %vm348_vm2, %v1292_v50, 0 }
 0xce0   :  { %3419 = vmatpush3.bf16.xpose.msra.mxu0 %v1186_v49 }
 0xce1   :  { %3430 = vmatprep.subr.bf16.mxu0 %v3811_v15 }
 0xce2   :  { %v1290_v51 = vpop.permute.xlu1 %1289  ;;  %v1517_v56 = vpop.permute.xlu0 %1516 }
 0xce6   :  { %v1408_v53 = vpop.permute.xlu1 %1407 }
 0xce7   :  { %3421 = vmatmul.mubr.msk.bf16.vlgmr.msra.gmra.mrb[28].mxu0 %vm348_vm2, %v1177_v45  ;;  %v1413_v54 = vsel %vm348_vm2, %v1408_v53, 0 }
 0xce8   :  { %3431 = vmatpush3.bf16.xpose.msra.mxu0 %v1297_v52  ;;  %3432 = vmatprep.mubr.msk.bf16.mxu0 %vm3812_vm1, %v3811_v15 }
 0xce9   :  { %3442 = vmatprep.subr.bf16.mxu0 %v3811_v15 }
 0xcea   :  { %v1519_v55 = vpop.permute.xlu1 %1518 }
 0xceb   :  { %v1524_v40 = vsel %vm348_vm2, %v1519_v55, 0 }
 0xcef   :  { %3433 = vmatmul.mubr.msk.bf16.vlgmr.msra.gmra.mrb[32].mxu0 %vm348_vm2, %v1290_v51 }
 0xcf0   :  { %3443 = vmatpush3.bf16.xpose.msra.mxu0 %v1413_v54  ;;  %3444 = vmatprep.mubr.msk.bf16.mxu0 %vm3812_vm1, %v3811_v15 }
 0xcf1   :  { %3454 = vmatprep.subr.bf16.mxu0 %v3811_v15 }
 0xcf7   :  { %3445 = vmatmul.mubr.msk.bf16.vlgmr.msra.gmra.mrb[36].mxu0 %vm348_vm2, %v1404_v46 }
 0xcf8   :  { %3455 = vmatpush3.bf16.xpose.msra.mxu0 %v1524_v40  ;;  %3456 = vmatprep.mubr.msk.bf16.mxu0 %vm3812_vm1, %v3811_v15 }
 0xcf9   :  { %3466 = vmatprep.subr.bf16.mxu0 %v3811_v15 }
 0xcff   :  { %3457 = vmatmul.mubr.msk.bf16.vlgmr.msra.gmra.mrb[40].mxu0 %vm348_vm2, %v1517_v56 }
 0xd00   :  { %3470 = vmatprep.mubr.msk.bf16.mxu0 %vm3812_vm1, %v3811_v15 }
 0xdba   :  { %v1222_v57 = vpop.f32.mrb[28].mxu0 }
 0xdbb   :  { %v1223_v58 = vadd.f32 %v1222_v57, %v4068_v63  ;;  %v3422_v59 = vpop.f32.mrb[29].mxu0 }
 0xdbc   :  { %v1225_v44 = vpop.f32.mrb[30].mxu0 }
 0xdbd   :  { %v3423_v31 = vpop.f32.mrb[31].mxu0  ;;  %v1228_v60 = vsel %vm395_vm3, %v1223_v58, -inf }
 0xdbe   :  { %1229 = vmax.xlane.f32.xlu1 %v1228_v60 }
 0xdc2   :  { %v1333_v32 = vpop.f32.mrb[32].mxu0 }
 0xdc3   :  { %v1334_v61 = vadd.f32 %v1333_v32, %v4068_v63  ;;  %v3434_v0 = vpop.f32.mrb[33].mxu0 }
 0xdc4   :  { %v1336_v1 = vpop.f32.mrb[34].mxu0 }
 0xdc5   :  { %v3435_v2 = vpop.f32.mrb[35].mxu0  ;;  %v1339_v3 = vsel %vm395_vm3, %v1334_v61, -inf  ;;  %v3573_v1 = vld [vmem:[%s4695_s14] sm:$0xff]  }
 0xdc6   :  { %1340 = vmax.xlane.f32.xlu0 %v1339_v3  ;;  %3467 = vmatpush3.bf16.msra.mxu0 %v3573_v1 }
 0xdc7   :  { %3468 = vmatprep.subr.bf16.mxu0 %v3811_v15 }
 0xdca   :  { %v1449_v4 = vpop.f32.mrb[36].mxu0 }
 0xdcb   :  { %v1450_v5 = vadd.f32 %v1449_v4, %v4077_v13  ;;  %v3446_v6 = vpop.f32.mrb[37].mxu0 }
 0xdcc   :  { %v1452_v7 = vpop.f32.mrb[38].mxu0 }
 0xdcd   :  { %v3447_v8 = vpop.f32.mrb[39].mxu0  ;;  %v1455_v10 = vsel %vm395_vm3, %v1450_v5, -inf }
 0xdce   :  { %1456 = vmax.xlane.f32.xlu0 %v1455_v10 }
 0xdd2   :  { %v1560_v11 = vpop.f32.mrb[40].mxu0 }
 0xdd3   :  { %v1561_v12 = vadd.f32 %v1560_v11, %v4077_v13  ;;  %v3458_v14 = vpop.f32.mrb[41].mxu0  ;;  %v3574_v11 = vld [vmem:[%s4695_s14 + $0x8] sm:$0xff]  }
 0xdd4   :  { %v1563_v63 = vpop.f32.mrb[42].mxu0  ;;  %3469 = vmatpush3.bf16.msra.mxu0 %v3574_v11 }
 0xdd5   :  { %v3459_v16 = vpop.f32.mrb[43].mxu0  ;;  %v1566_v17 = vsel %vm395_vm3, %v1561_v12, -inf  ;;  %3482 = vmatprep.subr.bf16.mxu0 %v3811_v15 }
 0xdd6   :  { %1567 = vmax.xlane.f32.xlu0 %v1566_v17 }
 0xe4b   :  { %v1230_v18 = vpop.xlane.xlu1 %1229 }
 0xe4c   :  { %v1231_v19 = vsub.f32 %v1223_v58, %v1230_v18 }
 0xe4e   :  { %v1232_v20 = vmul.f32 1.442695, %v1231_v19 }
 0xe50   :  { %3635 = vpow2.f32 %v1232_v20 }
 0xe53   :  { %v1341_v21 = vpop.xlane.xlu0 %1340 }
 0xe54   :  { %v1342_v22 = vsub.f32 %v1334_v61, %v1341_v21 }
 0xe56   :  { %v1343_v23 = vmul.f32 1.442695, %v1342_v22 }
 0xe58   :  { %3637 = vpow2.f32 %v1343_v23 }
 0xe5a   :  { %v3636_v24 = vpop.eup %3635 }
 0xe5b   :  { %v1234_v25 = vsel %vm395_vm3, %v3636_v24, 0.0  ;;  %v1457_v26 = vpop.xlane.xlu0 %1456 }
 0xe5c   :  { %1235 = vadd.xlane.f32.xlu1 %v1234_v25  ;;  %v1458_v37 = vsub.f32 %v1450_v5, %v1457_v26 }
 0xe5e   :  { %v1459_v38 = vmul.f32 1.442695, %v1458_v37 }
 0xe62   :  { %v3638_v13 = vpop.eup %3637 }
 0xe63   :  { %v1568_v27 = vpop.xlane.xlu0 %1567  ;;  %v1345_v30 = vsel %vm395_vm3, %v3638_v13, 0.0 }
 0xe64   :  { %v1569_v33 = vsub.f32 %v1561_v12, %v1568_v27  ;;  %1346 = vadd.xlane.f32.xlu0 %v1345_v30  ;;  %v3217_v27 = vld [vmem:[%s4696_s19] ss:$0 sm:$0xff] }
 0xe66   :  { %v1570_v34 = vmul.f32 1.442695, %v1569_v33 }
 0xe68   :  { %3639 = vpow2.f32 %v1570_v34 }
 0xe69   :  { %3641 = vpow2.f32 %v1459_v38 }
 0xe6d   :  { %1240 = vrot.lane.b32.xlu1 %v4174_v39, %s3817_s17 }
 0xe72   :  { %v3640_v35 = vpop.eup %3639 }
 0xe73   :  { %v1572_v36 = vsel %vm395_vm3, %v3640_v35, 0.0  ;;  %v3642_v41 = vpop.eup %3641 }
 0xe74   :  { %1573 = vadd.xlane.f32.xlu0 %v1572_v36  ;;  %v1461_v42 = vsel %vm395_vm3, %v3642_v41, 0.0 }
 0xe8a   :  { %1351 = vrot.lane.b32.xlu0 %v4174_v39, %s3816_s9 }
 0xe91   :  { %1462 = vadd.xlane.f32.xlu1 %v1461_v42 }
 0xea2   :  { %1467 = vrot.lane.b32.xlu1 %v4182_v47, %s3817_s17 }
 0xea6   :  { %1578 = vrot.lane.b32.xlu1 %v4182_v47, %s3816_s9 }
 0xee9   :  { %v1236_v43 = vpop.xlane.xlu1 %1235 }
 0xeea   :  { %3643 = vrcp.f32 %v1236_v43 }
 0xeed   :  { %v1241_v45 = vpop.permute.xlu1 %1240 }
 0xeee   :  { %v1246_v46 = vsel %vm413_vm4, %v1241_v45, 0 }
 0xeef   :  { %3425 = vmatpush3.bf16.msra.mxu1 %v1246_v46 }
 0xef0   :  { %3436 = vmatprep.subr.bf16.mxu1 %v3811_v15 }
 0xef1   :  { %v1347_v39 = vpop.xlane.xlu0 %1346 }
 0xef2   :  { %3645 = vrcp.f32 %v1347_v39 }
 0xef4   :  { %v3644_v48 = vpop.eup %3643 }
 0xef5   :  { %v1238_v49 = vmul.f32 %v3644_v48, %v3636_v24 }
 0xef7   :  { %v1239_v50 = vpack.c.bf16 %v1238_v49, %v1238_v49 }
 0xef9   :  { %3427 = vmatmul.mubr.msk.bf16.vlgmr.msra.gmra.mrb[24].mxu1 %vm395_vm3, %v1239_v50 }
 0xefa   :  { %3438 = vmatprep.mubr.msk.bf16.mxu1 %vm3812_vm1, %v3811_v15 }
 0xefc   :  { %v3646_v51 = vpop.eup %3645 }
 0xefd   :  { %v1349_v52 = vmul.f32 %v3646_v51, %v3638_v13 }
 0xeff   :  { %v1350_v55 = vpack.c.bf16 %v1349_v52, %v1349_v52 }
 0xf01   :  { %v1574_v47 = vpop.xlane.xlu0 %1573 }
 0xf05   :  { %v1352_v53 = vpop.permute.xlu0 %1351 }
 0xf06   :  { %v1357_v54 = vsel %vm413_vm4, %v1352_v53, 0  ;;  %v3576_v53 = vld [vmem:[%s4697_s24 + $0x8] sm:$0xff]  }
 0xf07   :  { %3437 = vmatpush3.bf16.msra.mxu1 %v1357_v54 }
 0xf08   :  { %3448 = vmatprep.subr.bf16.mxu1 %v3811_v15 }
 0xf0a   :  { %3439 = vmatmul.mubr.msk.bf16.vlgmr.msra.gmra.mrb[28].mxu1 %vm395_vm3, %v1350_v55 }
 0xf0b   :  { %3450 = vmatprep.mubr.msk.bf16.mxu1 %vm3812_vm1, %v3811_v15 }
 0xf1e   :  { %v1463_v40 = vpop.xlane.xlu1 %1462 }
 0xf1f   :  { %3647 = vrcp.f32 %v1463_v40 }
 0xf20   :  { %3649 = vrcp.f32 %v1574_v47 }
 0xf22   :  { %v1468_v56 = vpop.permute.xlu1 %1467 }
 0xf23   :  { %v1473_v57 = vsel %vm413_vm4, %v1468_v56, 0 }
 0xf24   :  { %3449 = vmatpush3.bf16.msra.mxu1 %v1473_v57 }
 0xf25   :  { %3460 = vmatprep.subr.bf16.mxu1 %v3811_v15 }
 0xf26   :  { %v1579_v44 = vpop.permute.xlu1 %1578 }
 0xf27   :  { %v1584_v32 = vsel %vm413_vm4, %v1579_v44, 0 }
 0xf29   :  { %v3648_v58 = vpop.eup %3647 }
 0xf2a   :  { %v1465_v59 = vmul.f32 %v3648_v58, %v3642_v41  ;;  %v3650_v60 = vpop.eup %3649 }
 0xf2b   :  { %v1576_v61 = vmul.f32 %v3650_v60, %v3640_v35 }
 0xf2c   :  { %v1466_v31 = vpack.c.bf16 %v1465_v59, %v1465_v59 }
 0xf2d   :  { %v1577_v0 = vpack.c.bf16 %v1576_v61, %v1576_v61 }
 0xf2e   :  { %3451 = vmatmul.mubr.msk.bf16.vlgmr.msra.gmra.mrb[32].mxu1 %vm395_vm3, %v1466_v31  ;;  %v3221_v31 = vld [vmem:[%s4698_s30] ss:$0 sm:$0xff] }
 0xf2f   :  { %3461 = vmatpush3.bf16.msra.mxu1 %v1584_v32  ;;  %3462 = vmatprep.mubr.msk.bf16.mxu1 %vm3812_vm1, %v3811_v15 }
 0xf30   :  { %3474 = vmatprep.subr.bf16.mxu1 %v3811_v15 }
 0xf36   :  { %3463 = vmatmul.mubr.msk.bf16.vlgmr.msra.gmra.mrb[36].mxu1 %vm395_vm3, %v1577_v0  ;;  %v3222_v0 = vld [vmem:[%s4699_s6] ss:$0 sm:$0xff] }
 0xf37   :  { %3478 = vmatprep.mubr.msk.bf16.mxu1 %vm3812_vm1, %v3811_v15 }
 0xfcc   :  { %v1282_v2 = vpop.f32.mrb[24].mxu1 }
 0xfcd   :  { %v3428_v3 = vpop.f32.mrb[25].mxu1 }
 0xfce   :  { %v1285_v4 = vpop.f32.mrb[26].mxu1 }
 0xfcf   :  { %v3429_v5 = vpop.f32.mrb[27].mxu1 }
 0xfd0   :  { %v3577_v5 = vld [vmem:[%s4700_s15] sm:$0xff]  }
 0xfdd   :  { %v1393_v6 = vpop.f32.mrb[28].mxu1 }
 0xfde   :  { %v3440_v7 = vpop.f32.mrb[29].mxu1 }
 0xfdf   :  { %v1396_v8 = vpop.f32.mrb[30].mxu1  ;;  %v3579_v7 = vld [vmem:[%s4700_s15 + $0x10] sm:$0xff]  }
 0xfe0   :  { %v3441_v10 = vpop.f32.mrb[31].mxu1  ;;  %v3580_v8 = vld [vmem:[%s4700_s15 + $0x18] sm:$0xff]  }
 0xfe1   :  { %v3223_v10 = vld [vmem:[%s4701_s16] ss:$0 sm:$0xff] }
0x1001   :  { %v1509_v12 = vpop.f32.mrb[32].mxu1 }
0x1002   :  { %v3452_v14 = vpop.f32.mrb[33].mxu1 }
0x1003   :  { %v1512_v63 = vpop.f32.mrb[34].mxu1 }
0x1004   :  { %v3453_v16 = vpop.f32.mrb[35].mxu1 }
0x1009   :  { %v1620_v17 = vpop.f32.mrb[36].mxu1 }
0x100a   :  { %v3556_v18 = vpack.i.bf16 %v1620_v17, %v1393_v6  ;;  %v3464_v19 = vpop.f32.mrb[37].mxu1  ;;  %v3578_v6 = vld [vmem:[%s4700_s15 + $0x8] sm:$0xff]  }
0x100b   :  { %v1623_v20 = vpop.f32.mrb[38].mxu1 }
0x100c   :  { %3557 = vrot.lane.b32.xlu1 %v3556_v18, %s3818_s21  ;;  %v3465_v21 = vpop.f32.mrb[39].mxu1 }
0x107e   :  { %v3558_v22 = vpop.permute.xlu1 %3557 }
0x107f   :  { %v3560_v23 = vunpack.i.h.bf16 %v3558_v22  ;;  %v3559_v24 = vunpack.i.l.bf16 %v3558_v22 }
0x1081   :  { %v1630_v25 = vsel %vm348_vm2, %v1509_v12, %v3560_v23  ;;  %v1403_v26 = vsel %vm348_vm2, %v1282_v2, %v3559_v24 }
0x1082   :  { %v1631_v13 = vpack.c.bf16 %v1630_v25, %v1403_v26 }
0x1084   :  { %3471 = vmatmul.mubr.msk.bf16.vlgmr.msra.gmra.mrb[44].mxu0 %vm230_vm0, %v1631_v13 }
0x1085   :  { %3490 = vmatprep.mubr.msk.bf16.mxu0 %vm3812_vm1, %v3811_v15  ;;  %3483 = vmatpush3.bf16.msra.mxu0 %v3577_v5  ;;  %v4312_v5 = vld [vmem:[%s4704_s23 + $0x20] ss:$8 sps:$4 sm:$0xff]  }
0x1086   :  { %3484 = vmatprep.subr.bf16.mxu0 %v3811_v15 }
0x1089   :  { %3485 = vmatpush3.bf16.msra.mxu0 %v3578_v6  ;;  %v4316_v6 = vld [vmem:[%s4704_s23 + $0x34] ss:$8 sps:$4 sm:$0xff]  }
0x108a   :  { %3486 = vmatprep.subr.bf16.mxu0 %v3811_v15 }
0x108d   :  { %3487 = vmatpush3.bf16.msra.mxu0 %v3579_v7  ;;  %v4320_v7 = vld [vmem:[%s4704_s23 + $0x30] ss:$8 sps:$4 sm:$0xff]  }
0x108e   :  { %3488 = vmatprep.subr.bf16.mxu0 %v3811_v15 }
0x1091   :  { %3489 = vmatpush3.bf16.msra.mxu0 %v3580_v8 }
0x1157   :  { %v1687_v30 = vpop.f32.mrb[44].mxu0 }
0x1158   :  { %v1688_v33 = vadd.f32 %v3217_v27, %v1687_v30  ;;  %v3472_v34 = vpop.f32.mrb[45].mxu0 }
0x1159   :  { %v1690_v35 = vpop.f32.mrb[46].mxu0 }
0x115a   :  { %v1691_v36 = vadd.f32 %v3217_v27, %v1690_v35  ;;  %v3473_v37 = vpop.f32.mrb[47].mxu0  ;;  %v1694_v38 = vadd.f32 %v1688_v33, %v4164_v28 }
0x115c   :  { %v1696_v41 = vsel %vm230_vm0, %v1694_v38, 0.0  ;;  %v1695_v42 = vadd.f32 %v1691_v36, %v4166_v29  ;;  %v3575_v29 = vld [vmem:[%s4697_s24] sm:$0xff]  }
0x115d   :  { %1697 = vadd.xlane.f32.xlu0 %v1696_v41  ;;  %3475 = vmatpush3.bf16.msra.mxu1 %v3575_v29 }
0x115e   :  { %v1699_v43 = vsel %vm230_vm0, %v1695_v42, 0.0  ;;  %3476 = vmatprep.subr.bf16.mxu1 %v3811_v15 }
0x115f   :  { %1700 = vadd.xlane.f32.xlu1 %v1699_v43 }
0x1161   :  { %3477 = vmatpush3.bf16.msra.mxu1 %v3576_v53 }
0x11ea   :  { %v1698_v45 = vpop.xlane.xlu0 %1697 }
0x11eb   :  { %v1702_v46 = vmul.f32 0.03125, %v1698_v45 }
0x11ec   :  { %v1701_v48 = vpop.xlane.xlu1 %1700 }
0x11ed   :  { %v1704_v39 = vsub.f32 %v1694_v38, %v1702_v46  ;;  %v1703_v49 = vmul.f32 0.03125, %v1701_v48 }
0x11ef   :  { %v1705_v50 = vsub.f32 %v1695_v42, %v1703_v49  ;;  %v1706_v51 = vmul.f32 %v1704_v39, %v1704_v39  ;;  %v3227_v42 = vld [vmem:[%s4702_s18] ss:$0 sm:$0xff] }
0x11f1   :  { %v1708_v47 = vsel %vm230_vm0, %v1706_v51, 0.0  ;;  %v1707_v28 = vmul.f32 %v1705_v50, %v1705_v50 }
0x11f2   :  { %1709 = vadd.xlane.f32.xlu0 %v1708_v47 }
0x11f3   :  { %v1711_v52 = vsel %vm230_vm0, %v1707_v28, 0.0 }
0x11f6   :  { %1712 = vadd.xlane.f32.xlu0 %v1711_v52 }
0x127f   :  { %v1710_v54 = vpop.xlane.xlu0 %1709 }
0x1280   :  { %v1714_v55 = vmul.f32 0.03125, %v1710_v54 }
0x1282   :  { %v1716_v40 = vadd.f32 1e-12, %v1714_v55 }
0x1283   :  { %v1713_v56 = vpop.xlane.xlu0 %1712 }
0x1284   :  { %3651 = vrsqrt.f32 %v1716_v40  ;;  %v1715_v57 = vmul.f32 0.03125, %v1713_v56 }
0x1286   :  { %v1717_v58 = vadd.f32 1e-12, %v1715_v57 }
0x1288   :  { %3653 = vrsqrt.f32 %v1717_v58 }
0x128e   :  { %v3652_v59 = vpop.eup %3651 }
0x128f   :  { %v1720_v44 = vmul.f32 %v3652_v59, %v1704_v39 }
0x1291   :  { %v1728_v32 = vmul.f32 %v3221_v31, %v1720_v44  ;;  %v3583_v44 = vld [vmem:[%s4703_s22 + $0x4] ss:$8 sps:$4 sm:$0xff]  }
0x1292   :  { %v3654_v60 = vpop.eup %3653  ;;  %1973 = vmatprep.subr.bf16.mxu1 %v3583_v44 }
0x1293   :  { %v1721_v61 = vmul.f32 %v3654_v60, %v1705_v50  ;;  %v1736_v2 = vadd.f32 %v3222_v0, %v1728_v32  ;;  %v3584_v60 = vld [vmem:[%s4703_s22 + $0x10] ss:$8 sps:$4 sm:$0xff]   ;;  %v3586_v32 = vld [vmem:[%s4703_s22 + $0x14] ss:$8 sps:$4 sm:$0xff]  }
0x1295   :  { %v1729_v1 = vmul.f32 %v3221_v31, %v1721_v61  ;;  %v3581_v31 = vld [vmem:[%s4703_s22] ss:$8 sps:$4 sm:$0xff]   ;;  %v3819_v61 = vmov 0  }
0x1297   :  { %v1737_v3 = vadd.f32 %v3222_v0, %v1729_v1  ;;  %v4291_v0 = vld [vmem:[%s4704_s23 + $0x4] ss:$8 sps:$4 sm:$0xff]   ;;  %v4297_v1 = vld [vmem:[%s4704_s23] ss:$8 sps:$4 sm:$0xff]  }
0x1298   :  { %2193 = vmatprep.subr.bf16.mxu0 %v4291_v0 }
0x1299   :  { %v1738_v4 = vpack.c.bf16 %v1737_v3, %v1736_v2 }
0x129b   :  { %3479 = vmatmul.mubr.msk.bf16.vlgmr.msra.gmra.mrb[40].mxu1 %vm230_vm0, %v1738_v4  ;;  %v4308_v4 = vld [vmem:[%s4704_s23 + $0x24] ss:$8 sps:$4 sm:$0xff]  }
0x129c   :  { %1974 = vmatpush1.bf16.msra.mxu1 %v3581_v31  ;;  %2005 = vmatprep.mubr.bf16.mxu1 %v3819_v61  ;;  %v215_v31 = vld [vmem:[%s3985_s20] sm:$0x3]  ;;  %s3820_s20 = smov 32  }
0x129d   :  { %1975 = vmatprep.subr.bf16.mxu1 %v3586_v32 }
0x12a0   :  { %1976 = vmatpush1.bf16.msra.mxu1 %v3584_v60 }
0x12a1   :  { %2088 = vmatprep.subr.bf16.mxu1 %v4291_v0 }
0x136e   :  { %v1794_v11 = vpop.f32.mrb[40].mxu1 }
0x136f   :  { %v1795_v12 = vadd.f32 %v3223_v10, %v1794_v11  ;;  %v3480_v14 = vpop.f32.mrb[41].mxu1 }
0x1370   :  { %v1797_v63 = vpop.f32.mrb[42].mxu1 }
0x1371   :  { %v1801_v16 = vmul.f32 %v1795_v12, %v1795_v12  ;;  %v1798_v17 = vadd.f32 %v3223_v10, %v1797_v63  ;;  %v3481_v18 = vpop.f32.mrb[43].mxu1 }
0x1373   :  { %v1803_v19 = vmul.f32 %v1801_v16, %v1795_v12  ;;  %v1802_v20 = vmul.f32 %v1798_v17, %v1798_v17 }
0x1375   :  { %v1805_v21 = vmul.f32 0.044715, %v1803_v19  ;;  %v1804_v22 = vmul.f32 %v1802_v20, %v1798_v17 }
0x1377   :  { %v1807_v23 = vadd.f32 %v1805_v21, %v1795_v12  ;;  %v1806_v24 = vmul.f32 0.044715, %v1804_v22  ;;  %v3234_v22 = vld [vmem:[%s4706_s28] ss:$0 sm:$0xff] }
0x1379   :  { %v1809_v25 = vmul.f32 0.7978846, %v1807_v23  ;;  %v1808_v26 = vadd.f32 %v1806_v24, %v1798_v17 }
0x137b   :  { %3655 = vtanh.f32 %v1809_v25  ;;  %v1810_v13 = vmul.f32 0.7978846, %v1808_v26 }
0x137d   :  { %3657 = vtanh.f32 %v1810_v13  ;;  %v206_v13 = vld [vmem:[%s4707_s1] sm:$0x3] }
0x1385   :  { %v3656_v27 = vpop.eup %3655 }
0x1386   :  { %v1813_v30 = vadd.f32 1.0, %v3656_v27  ;;  %v1943_v27 = vrot.slane %v206_v13, %v4065_v62 }
0x1387   :  { %v3658_v33 = vpop.eup %3657 }
0x1388   :  { %v1815_v34 = vmul.f32 0.5, %v1813_v30  ;;  %v1814_v35 = vadd.f32 1.0, %v3658_v33  ;;  %v1947_v30 = vrot.slane %v206_v13, %v4073_v9 }
0x138a   :  { %v1816_v36 = vmul.f32 0.5, %v1814_v35  ;;  %v1817_v37 = vmul.f32 %v1815_v34, %v1795_v12 }
0x138c   :  { %v1818_v38 = vmul.f32 %v1816_v36, %v1798_v17  ;;  %v3233_v17 = vld [vmem:[%s4705_s26] ss:$0 sm:$0xff] }
0x138e   :  { %v1819_v41 = vpack.c.bf16 %v1818_v38, %v1817_v37 }
0x1390   :  { %3491 = vmatmul.mubr.msk.bf16.vlgmr.msra.gmra.mrb[48].mxu0 %vm1023_vm5, %v1819_v41 }
0x1391   :  { %2225 = vmatprep.mubr.bf16.mxu0 %v3819_v61  ;;  %2194 = vmatpush1.bf16.msra.mxu0 %v4297_v1 }
0x1463   :  { %v1887_v43 = vpop.f32.mrb[48].mxu0 }
0x1464   :  { %v1888_v45 = vadd.f32 %v3227_v42, %v1887_v43  ;;  %v3492_v46 = vpop.f32.mrb[49].mxu0 }
0x1465   :  { %v1890_v48 = vpop.f32.mrb[50].mxu0 }
0x1466   :  { %v1891_v39 = vadd.f32 %v3227_v42, %v1890_v48  ;;  %v3493_v49 = vpop.f32.mrb[51].mxu0  ;;  %v1894_v50 = vadd.f32 %v1888_v45, %v1736_v2  ;;  %v4300_v2 = vld [vmem:[%s4704_s23 + $0x14] ss:$8 sps:$4 sm:$0xff]  }
0x1467   :  { %2195 = vmatprep.subr.bf16.mxu0 %v4300_v2 }
0x1468   :  { %v1896_v51 = vsel %vm230_vm0, %v1894_v50, 0.0  ;;  %v1895_v47 = vadd.f32 %v1891_v39, %v1737_v3  ;;  %v4304_v3 = vld [vmem:[%s4704_s23 + $0x10] ss:$8 sps:$4 sm:$0xff]  }
0x1469   :  { %1897 = vadd.xlane.f32.xlu0 %v1896_v51  ;;  %2196 = vmatpush1.bf16.msra.mxu0 %v4304_v3 }
0x146a   :  { %v1899_v28 = vsel %vm230_vm0, %v1895_v47, 0.0  ;;  %2197 = vmatprep.subr.bf16.mxu0 %v4308_v4 }
0x146b   :  { %1900 = vadd.xlane.f32.xlu1 %v1899_v28 }
0x146d   :  { %2198 = vmatpush1.bf16.msra.mxu0 %v4312_v5 }
0x146e   :  { %2199 = vmatprep.subr.bf16.mxu0 %v4316_v6 }
0x1471   :  { %2200 = vmatpush1.bf16.msra.mxu0 %v4320_v7 }
0x1472   :  { %2434 = vmatprep.subr.bf16.mxu0 %v4291_v0 }
0x14f6   :  { %v1898_v52 = vpop.xlane.xlu0 %1897 }
0x14f7   :  { %v1902_v29 = vmul.f32 0.03125, %v1898_v52 }
0x14f8   :  { %v1901_v53 = vpop.xlane.xlu1 %1900 }
0x14f9   :  { %v1904_v54 = vsub.f32 %v1894_v50, %v1902_v29  ;;  %v1903_v55 = vmul.f32 0.03125, %v1901_v53 }
0x14fb   :  { %v1905_v40 = vsub.f32 %v1895_v47, %v1903_v55  ;;  %v1906_v56 = vmul.f32 %v1904_v54, %v1904_v54 }
0x14fd   :  { %v1908_v57 = vsel %vm230_vm0, %v1906_v56, 0.0  ;;  %v1907_v58 = vmul.f32 %v1905_v40, %v1905_v40 }
0x14fe   :  { %1909 = vadd.xlane.f32.xlu0 %v1908_v57 }
0x14ff   :  { %v1911_v59 = vsel %vm230_vm0, %v1907_v58, 0.0 }
0x1500   :  { %1912 = vadd.xlane.f32.xlu1 %v1911_v59 }
0x158b   :  { %v1910_v8 = vpop.xlane.xlu0 %1909 }
0x158c   :  { %v1914_v10 = vmul.f32 0.03125, %v1910_v8 }
0x158d   :  { %v1913_v11 = vpop.xlane.xlu1 %1912 }
0x158e   :  { %v1916_v12 = vadd.f32 1e-12, %v1914_v10  ;;  %v1915_v14 = vmul.f32 0.03125, %v1913_v11 }
0x1590   :  { %3659 = vrsqrt.f32 %v1916_v12  ;;  %v1917_v63 = vadd.f32 1e-12, %v1915_v14 }
0x1592   :  { %3661 = vrsqrt.f32 %v1917_v63 }
0x159a   :  { %v3660_v16 = vpop.eup %3659 }
0x159b   :  { %v1920_v18 = vmul.f32 %v3660_v16, %v1904_v54 }
0x159c   :  { %v3662_v19 = vpop.eup %3661 }
0x159d   :  { %v1928_v20 = vmul.f32 %v3233_v17, %v1920_v18  ;;  %v1921_v21 = vmul.f32 %v3662_v19, %v1905_v40  ;;  %v4393_v19 = vrot.slane %v215_v31, %v4065_v62 }
0x159f   :  { %v1929_v23 = vmul.f32 %v3233_v17, %v1921_v21  ;;  %v1936_v24 = vadd.f32 %v3234_v22, %v1928_v20 }
0x15a1   :  { %v1937_v25 = vadd.f32 %v3234_v22, %v1929_v23 }
0x15a3   :  { %v1938_v26 = vpack.c.bf16 %v1937_v25, %v1936_v24 }
0x15a5   :  { %3239 = vmatmul.mubr.msk.bf16.vlgmr.msra.gmra.mrb[44].mxu1 %vm230_vm0, %v1938_v26 }
0x15a6   :  { %2089 = vmatpush1.bf16.msra.mxu1 %v4297_v1  ;;  %2120 = vmatprep.mubr.bf16.mxu1 %v3819_v61 }
0x15a7   :  { %2090 = vmatprep.subr.bf16.mxu1 %v4300_v2 }
0x15aa   :  { %2091 = vmatpush1.bf16.msra.mxu1 %v4304_v3 }
0x15ab   :  { %2092 = vmatprep.subr.bf16.mxu1 %v4308_v4 }
0x15ae   :  { %2093 = vmatpush1.bf16.msra.mxu1 %v4312_v5 }
0x15af   :  { %2094 = vmatprep.subr.bf16.mxu1 %v4316_v6 }
0x15b2   :  { %2095 = vmatpush1.bf16.msra.mxu1 %v4320_v7 }
0x15b3   :  { %2317 = vmatprep.subr.bf16.mxu1 %v4291_v0 }
0x15b5   :  { %2121 = vmatmul.mubr.bf16.vlgmr.msra.gmra.mrb[48].mxu1 %v3819_v61 }
0x15b6   :  { %2318 = vmatpush1.bf16.msra.mxu1 %v4297_v1  ;;  %2349 = vmatprep.mubr.bf16.mxu1 %v3819_v61 }
0x15b7   :  { %2319 = vmatprep.subr.bf16.mxu1 %v4300_v2 }
0x15ba   :  { %2320 = vmatpush1.bf16.msra.mxu1 %v4304_v3 }
0x15bb   :  { %2321 = vmatprep.subr.bf16.mxu1 %v4308_v4 }
0x15be   :  { %2322 = vmatpush1.bf16.msra.mxu1 %v4312_v5 }
0x15bf   :  { %2323 = vmatprep.subr.bf16.mxu1 %v4316_v6 }
0x15c2   :  { %2324 = vmatpush1.bf16.msra.mxu1 %v4320_v7 }
0x15c3   :  { %2555 = vmatprep.subr.bf16.mxu1 %v4291_v0 }
0x1678   :  { %v2007_v33 = vpop.f32.mrb[44].mxu1 }
0x1679   :  { %v2008_v34 = vadd.f32 %v2007_v33, %v1943_v27  ;;  %v2009_v35 = vpop.f32.mrb[45].mxu1 }
0x167a   :  { %v4350_v36 = vadd.f32 %v2009_v35, %v1947_v30  ;;  %v2011_v37 = vpop.f32.mrb[46].mxu1 }
0x167b   :  { %v2012_v38 = vadd.f32 %v2011_v37, %v1943_v27  ;;  %v2013_v41 = vpop.f32.mrb[47].mxu1  ;;  %v2024_v42 = vrot.slane %v2008_v34, 7  ;;  %v2180_v43 = vrot.slane %v2008_v34, 5  ;;  %v2297_v48 = vrot.slane %v2008_v34, 3 }
0x167c   :  { %v4352_v45 = vadd.f32 %v2013_v41, %v1947_v30  ;;  %v2183_v46 = vrot.slane %v4350_v36, 5  ;;  %v2300_v39 = vrot.slane %v4350_v36, 3  ;;  %v2421_v53 = vrot.slane %v2008_v34, 1 }
0x167d   :  { %v2018_v49 = vrot.slane %v2012_v38, 7  ;;  %v2025_v50 = vrot.slane %v2012_v38, 6  ;;  %v2181_v51 = vrot.slane %v2012_v38, 4  ;;  %v2298_v47 = vrot.slane %v2012_v38, 2 }
0x167e   :  { %v2028_v28 = vrot.slane %v4352_v45, 6  ;;  %v2184_v52 = vrot.slane %v4352_v45, 4  ;;  %v2301_v29 = vrot.slane %v4352_v45, 2  ;;  %v2027_v58 = vrot.slane %v4350_v36, 7 }
0x167f   :  { %v2020_v54 = vsel %vm2019_vm6, %v2018_v49, %v2008_v34  ;;  %v2026_v55 = vsel %vm2019_vm6, %v2025_v50, %v2024_v42  ;;  %v2178_v40 = vsel %vm2177_vm9, %v2018_v49, %v2008_v34  ;;  %v2182_v56 = vsel %vm2177_vm9, %v2181_v51, %v2180_v43 }
0x1680   :  { %v2033_v57 = vsel %vm2032_vm7, %v2020_v54, %v2026_v55  ;;  %v4366_v59 = vsel %vm2032_vm7, %v2178_v40, %v2182_v56  ;;  %v4369_v44 = vsel %vm2177_vm9, %v2184_v52, %v2183_v46  ;;  %v2295_v60 = vsel %vm2294_vm10, %v2018_v49, %v2008_v34 }
0x1681   :  { %2130 = vrot.lane.b32.xlu0 %v2033_v57, %s3817_s17  ;;  %v2299_v32 = vsel %vm2294_vm10, %v2298_v47, %v2297_v48  ;;  %v4376_v8 = vsel %vm2294_vm10, %v2301_v29, %v2300_v39  ;;  %v2419_v10 = vsel %vm2418_vm8, %v2018_v49, %v2008_v34  ;;  %v2422_v12 = vsel %vm2418_vm8, %v2012_v38, %v2421_v53 }
0x1682   :  { %v4380_v11 = vsel %vm2032_vm7, %v2295_v60, %v2299_v32  ;;  %v2536_v14 = vsel %vm2535_vm11, %v2018_v49, %v2008_v34  ;;  %v4385_v63 = vsel %vm2032_vm7, %v2419_v10, %v2422_v12  ;;  %v2538_v16 = vsel %vm2535_vm11, %v2025_v50, %v2024_v42 }
0x1683   :  { %v4389_v17 = vsel %vm2535_vm11, %v2028_v28, %v2027_v58  ;;  %v2657_v18 = vsel %vm2656_vm12, %v2018_v49, %v2008_v34  ;;  %v4396_v20 = vsel %vm2032_vm7, %v2536_v14, %v2538_v16  ;;  %v2659_v21 = vsel %vm2656_vm12, %v2181_v51, %v2180_v43 }
0x1684   :  { %v4400_v22 = vsel %vm2656_vm12, %v2184_v52, %v2183_v46  ;;  %v4403_v23 = vsel %vm2032_vm7, %v2657_v18, %v2659_v21  ;;  %v2772_v24 = vsel %vm2771_vm13, %v2018_v49, %v2008_v34  ;;  %v2774_v25 = vsel %vm2771_vm13, %v2298_v47, %v2297_v48 }
0x1685   :  { %v4405_v26 = vsel %vm2771_vm13, %v2301_v29, %v2300_v39  ;;  %v4408_v13 = vsel %vm2032_vm7, %v2772_v24, %v2774_v25  ;;  %v4411_v62 = vsel %vm2032_vm7, %v2008_v34, %v2421_v53  ;;  %v4414_v27 = vsel %vm2032_vm7, %v2018_v49, %v2012_v38 }
0x1686   :  { %v4421_v42 = vrot.slane %v215_v31, %v4073_v9  ;;  %v2029_v34 = vsel %vm2019_vm6, %v2028_v28, %v2027_v58 }
0x1688   :  { %v2122_v30 = vpop.f32.mrb[48].mxu1 }
0x1689   :  { %v2123_v33 = vadd.f32 %v2122_v30, %v4393_v19  ;;  %v2124_v35 = vpop.f32.mrb[49].mxu1 }
0x168a   :  { %v2126_v37 = vpop.f32.mrb[50].mxu1  ;;  %v2125_v38 = vadd.f32 %v2124_v35, %v4421_v42 }
0x168b   :  { %v2127_v41 = vpop.f32.mrb[51].mxu1  ;;  %2135 = vrot.lane.b32.xlu1 %v2123_v33, %s3817_s17  ;;  %2153 = vrot.lane.b32.xlu0 %v2123_v33, %s3814_s5 }
0x168f   :  { %2146 = vrot.lane.b32.xlu1 %v2033_v57, %s3814_s5 }
0x1693   :  { %2149 = vrot.lane.b32.xlu1 %v2029_v34, %s3820_s20 }
0x1697   :  { %2157 = vrot.lane.b32.xlu1 %v2125_v38, %s3820_s20 }
0x169b   :  { %2235 = vrot.lane.b32.xlu1 %v4366_v59, %s3817_s17 }
0x16f3   :  { %v2131_v43 = vpop.permute.xlu0 %2130 }
0x16f4   :  { %v2133_v48 = vsel %vm230_vm0, %v2033_v57, %v2131_v43  ;;  %v2168_v12 = vsel %vm230_vm0, %v2131_v43, %v2029_v34 }
0x16fd   :  { %v2136_v46 = vpop.permute.xlu1 %2135  ;;  %v2154_v28 = vpop.permute.xlu0 %2153 }
0x16fe   :  { %v2138_v39 = vsel %vm230_vm0, %v2123_v33, %v2136_v46  ;;  %v2169_v60 = vsel %vm230_vm0, %v2136_v46, %v2125_v38 }
0x16ff   :  { %v2139_v9 = vadd.f32 %v2138_v39, %v2133_v48 }
0x1701   :  { %v2140_v49 = vsub.f32 0.0, %v2139_v9  ;;  %v2147_v50 = vpop.permute.xlu1 %2146 }
0x1703   :  { %v2141_v51 = vmul.f32 1.442695, %v2140_v49 }
0x1705   :  { %3663 = vpow2.f32 %v2141_v51  ;;  %v2150_v47 = vpop.permute.xlu1 %2149 }
0x1706   :  { %v2152_v29 = vsel %vm230_vm0, %v2147_v50, %v2150_v47 }
0x1709   :  { %v2158_v52 = vpop.permute.xlu1 %2157 }
0x170a   :  { %v2160_v53 = vsel %vm230_vm0, %v2154_v28, %v2158_v52 }
0x170b   :  { %v2161_v54 = vadd.f32 %v2160_v53, %v2152_v29 }
0x170d   :  { %v2162_v55 = vsub.f32 0.0, %v2161_v54  ;;  %v2236_v46 = vpop.permute.xlu1 %2235 }
0x170e   :  { %v2238_v50 = vsel %vm230_vm0, %v4366_v59, %v2236_v46 }
0x170f   :  { %v3664_v40 = vpop.eup %3663  ;;  %v2163_v56 = vmul.f32 1.442695, %v2162_v55 }
0x1710   :  { %v2143_v58 = vadd.f32 1.0, %v3664_v40 }
0x1711   :  { %3665 = vpow2.f32 %v2163_v56 }
0x1712   :  { %3667 = vrcp.f32 %v2143_v58 }
0x171b   :  { %v3666_v57 = vpop.eup %3665 }
0x171c   :  { %v3668_v31 = vpop.eup %3667  ;;  %v2165_v32 = vadd.f32 1.0, %v3666_v57 }
0x171d   :  { %v2170_v10 = vmul.f32 %v3668_v31, %v2169_v60 }
0x171e   :  { %3669 = vrcp.f32 %v2165_v32 }
0x171f   :  { %v2171_v14 = vadd.f32 %v2170_v10, %v2168_v12 }
0x1721   :  { %3671 = vtanh.f32 %v2171_v14 }
0x1728   :  { %v3670_v16 = vpop.eup %3669 }
0x1729   :  { %v2173_v18 = vsub.f32 1.0, %v3670_v16  ;;  %v2175_v25 = vmul.f32 0.0, %v3670_v16 }
0x172b   :  { %v3672_v21 = vpop.eup %3671 }
0x172c   :  { %v2174_v24 = vmul.f32 %v3672_v21, %v2173_v18  ;;  %v2279_v18 = vsel %vm230_vm0, %v2236_v46, %v4369_v44 }
0x172e   :  { %v2176_v30 = vadd.f32 %v2175_v25, %v2174_v24 }
0x1730   :  { %v2189_v33 = vpack.c.bf16 %v2176_v30, %v2176_v30  ;;  %v2290_v25 = vrot.slane %v2176_v30, 7 }
0x1732   :  { %3248 = vmatmul.mubr.msk.bf16.vlgmr.msra.gmra.mrb[52].mxu0 %vm1023_vm5, %v2189_v33 }
0x1733   :  { %2435 = vmatpush1.bf16.msra.mxu0 %v4297_v1  ;;  %2466 = vmatprep.mubr.bf16.mxu0 %v3819_v61 }
0x1734   :  { %2436 = vmatprep.subr.bf16.mxu0 %v4300_v2 }
0x1737   :  { %2437 = vmatpush1.bf16.msra.mxu0 %v4304_v3 }
0x1738   :  { %2438 = vmatprep.subr.bf16.mxu0 %v4308_v4 }
0x173b   :  { %2439 = vmatpush1.bf16.msra.mxu0 %v4312_v5 }
0x173c   :  { %2440 = vmatprep.subr.bf16.mxu0 %v4316_v6 }
0x173f   :  { %2441 = vmatpush1.bf16.msra.mxu0 %v4320_v7 }
0x1740   :  { %2670 = vmatprep.subr.bf16.mxu0 %v4291_v0 }
0x1805   :  { %v2227_v35 = vpop.f32.mrb[52].mxu0 }
0x1806   :  { %v2228_v37 = vadd.f32 %v2227_v35, %v4393_v19  ;;  %v2229_v41 = vpop.f32.mrb[53].mxu0 }
0x1807   :  { %v2230_v34 = vadd.f32 %v2229_v41, %v4421_v42  ;;  %v2231_v38 = vpop.f32.mrb[54].mxu0 }
0x1808   :  { %v2232_v43 = vpop.f32.mrb[55].mxu0  ;;  %2240 = vrot.lane.b32.xlu0 %v2228_v37, %s3817_s17 }
0x1809   :  { %2265 = vrot.lane.b32.xlu1 %v2230_v34, %s3820_s20 }
0x180c   :  { %2261 = vrot.lane.b32.xlu0 %v2228_v37, %s3814_s5 }
0x180d   :  { %2257 = vrot.lane.b32.xlu1 %v4369_v44, %s3820_s20 }
0x1810   :  { %2254 = vrot.lane.b32.xlu0 %v4366_v59, %s3814_s5 }
0x1811   :  { %2359 = vrot.lane.b32.xlu1 %v4380_v11, %s3817_s17 }
0x187a   :  { %v2241_v48 = vpop.permute.xlu0 %2240 }
0x187b   :  { %v2243_v39 = vsel %vm230_vm0, %v2228_v37, %v2241_v48  ;;  %v2266_v49 = vpop.permute.xlu1 %2265  ;;  %v2280_v32 = vsel %vm230_vm0, %v2241_v48, %v2230_v34 }
0x187c   :  { %v2245_v9 = vrot.slane %v2243_v39, 7  ;;  %v2282_v12 = vrot.slane %v2280_v32, 7 }
0x187e   :  { %v2247_v51 = vadd.f32 %v2245_v9, %v2238_v50  ;;  %v2262_v47 = vpop.permute.xlu0 %2261 }
0x187f   :  { %v2268_v28 = vsel %vm230_vm0, %v2262_v47, %v2266_v49  ;;  %v2258_v54 = vpop.permute.xlu1 %2257 }
0x1880   :  { %v2248_v52 = vsub.f32 0.0, %v2247_v51  ;;  %v2270_v53 = vrot.slane %v2268_v28, 7 }
0x1882   :  { %v2249_v29 = vmul.f32 1.442695, %v2248_v52  ;;  %v2255_v55 = vpop.permute.xlu0 %2254 }
0x1883   :  { %v2260_v40 = vsel %vm230_vm0, %v2255_v55, %v2258_v54  ;;  %v2360_v47 = vpop.permute.xlu1 %2359 }
0x1884   :  { %3673 = vpow2.f32 %v2249_v29  ;;  %v2272_v56 = vadd.f32 %v2270_v53, %v2260_v40  ;;  %v2362_v54 = vsel %vm230_vm0, %v4380_v11, %v2360_v47 }
0x1886   :  { %v2273_v58 = vsub.f32 0.0, %v2272_v56 }
0x1888   :  { %v2274_v57 = vmul.f32 1.442695, %v2273_v58 }
0x188a   :  { %3675 = vpow2.f32 %v2274_v57 }
0x188e   :  { %v3674_v31 = vpop.eup %3673 }
0x188f   :  { %v2251_v60 = vadd.f32 1.0, %v3674_v31 }
0x1891   :  { %3677 = vrcp.f32 %v2251_v60 }
0x1894   :  { %v3676_v59 = vpop.eup %3675 }
0x1895   :  { %v2276_v10 = vadd.f32 1.0, %v3676_v59 }
0x1897   :  { %3679 = vrcp.f32 %v2276_v10 }
0x189b   :  { %v3678_v14 = vpop.eup %3677 }
0x189c   :  { %v2284_v16 = vmul.f32 %v3678_v14, %v2282_v12 }
0x189e   :  { %v2285_v21 = vadd.f32 %v2284_v16, %v2279_v18 }
0x18a0   :  { %3681 = vtanh.f32 %v2285_v21 }
0x18a1   :  { %v3680_v24 = vpop.eup %3679 }
0x18a2   :  { %v2287_v33 = vsub.f32 1.0, %v3680_v24  ;;  %v2292_v37 = vmul.f32 %v3680_v24, %v2290_v25 }
0x18aa   :  { %v3682_v35 = vpop.eup %3681 }
0x18ab   :  { %v2288_v41 = vmul.f32 %v3682_v35, %v2287_v33 }
0x18ad   :  { %v4464_v38 = vadd.f32 %v2292_v37, %v2288_v41  ;;  %v2403_v37 = vsel %vm230_vm0, %v2360_v47, %v4376_v8 }
0x18af   :  { %v2306_v34 = vpack.c.bf16 %v4464_v38, %v4464_v38 }
0x18b1   :  { %v2310_v43 = vshll.u32 %v2306_v34, 16  ;;  %v2308_v48 = vshrl.u32 %v2306_v34, 16 }
0x18b3   :  { %v2312_v39 = vrot.slane %v2310_v43, 1 }
0x18b5   :  { %v2313_v9 = vor.u32 %v2312_v39, %v2308_v48  ;;  %v2414_v48 = vrot.slane %v4464_v38, 7 }
0x18b7   :  { %3249 = vmatmul.mubr.msk.bf16.vlgmr.msra.gmra.mrb[52].mxu1 %vm1023_vm5, %v2313_v9 }
0x18b8   :  { %2556 = vmatpush1.bf16.msra.mxu1 %v4297_v1  ;;  %2587 = vmatprep.mubr.bf16.mxu1 %v3819_v61 }
0x18b9   :  { %2557 = vmatprep.subr.bf16.mxu1 %v4300_v2 }
0x18bc   :  { %2558 = vmatpush1.bf16.msra.mxu1 %v4304_v3 }
0x18bd   :  { %2559 = vmatprep.subr.bf16.mxu1 %v4308_v4 }
0x18c0   :  { %2560 = vmatpush1.bf16.msra.mxu1 %v4312_v5 }
0x18c1   :  { %2561 = vmatprep.subr.bf16.mxu1 %v4316_v6 }
0x18c4   :  { %2562 = vmatpush1.bf16.msra.mxu1 %v4320_v7 }
0x18c5   :  { %2791 = vmatprep.subr.bf16.mxu1 %v4291_v0 }
0x198a   :  { %v2351_v44 = vpop.f32.mrb[52].mxu1 }
0x198b   :  { %v2352_v30 = vadd.f32 %v2351_v44, %v4393_v19  ;;  %v2353_v46 = vpop.f32.mrb[53].mxu1 }
0x198c   :  { %v2354_v49 = vadd.f32 %v2353_v46, %v4421_v42  ;;  %v2355_v50 = vpop.f32.mrb[54].mxu1 }
0x198d   :  { %v2356_v51 = vpop.f32.mrb[55].mxu1  ;;  %2364 = vrot.lane.b32.xlu0 %v2352_v30, %s3817_s17 }
0x198e   :  { %2389 = vrot.lane.b32.xlu1 %v2354_v49, %s3820_s20 }
0x1991   :  { %2385 = vrot.lane.b32.xlu0 %v2352_v30, %s3814_s5 }
0x1992   :  { %2381 = vrot.lane.b32.xlu1 %v4376_v8, %s3820_s20 }
0x1995   :  { %2378 = vrot.lane.b32.xlu0 %v4380_v11, %s3814_s5 }
0x1996   :  { %2476 = vrot.lane.b32.xlu1 %v4385_v63, %s3817_s17 }
0x19ff   :  { %v2365_v28 = vpop.permute.xlu0 %2364 }
0x1a00   :  { %v2367_v52 = vsel %vm230_vm0, %v2352_v30, %v2365_v28  ;;  %v2390_v53 = vpop.permute.xlu1 %2389  ;;  %v2404_v21 = vsel %vm230_vm0, %v2365_v28, %v2354_v49  ;;  %v4515_v28 = vrot.slane %v4350_v36, 1 }
0x1a01   :  { %v2369_v29 = vrot.slane %v2367_v52, 6  ;;  %v2406_v25 = vrot.slane %v2404_v21, 6 }
0x1a03   :  { %v2371_v55 = vadd.f32 %v2369_v29, %v2362_v54  ;;  %v2386_v40 = vpop.permute.xlu0 %2385  ;;  %v2424_v29 = vsel %vm2418_vm8, %v4352_v45, %v4515_v28 }
0x1a04   :  { %v2392_v56 = vsel %vm230_vm0, %v2386_v40, %v2390_v53  ;;  %v2382_v60 = vpop.permute.xlu1 %2381 }
0x1a05   :  { %v2372_v58 = vsub.f32 0.0, %v2371_v55  ;;  %v2394_v31 = vrot.slane %v2392_v56, 6 }
0x1a07   :  { %v2373_v57 = vmul.f32 1.442695, %v2372_v58  ;;  %v2379_v59 = vpop.permute.xlu0 %2378 }
0x1a08   :  { %v2384_v32 = vsel %vm230_vm0, %v2379_v59, %v2382_v60 }
0x1a09   :  { %3683 = vpow2.f32 %v2373_v57  ;;  %v2396_v10 = vadd.f32 %v2394_v31, %v2384_v32 }
0x1a0b   :  { %v2397_v12 = vsub.f32 0.0, %v2396_v10 }
0x1a0d   :  { %v2398_v14 = vmul.f32 1.442695, %v2397_v12 }
0x1a0f   :  { %3685 = vpow2.f32 %v2398_v14 }
0x1a13   :  { %v3684_v16 = vpop.eup %3683 }
0x1a14   :  { %v2375_v18 = vadd.f32 1.0, %v3684_v16 }
0x1a16   :  { %3687 = vrcp.f32 %v2375_v18 }
0x1a19   :  { %v3686_v11 = vpop.eup %3685 }
0x1a1a   :  { %v2400_v24 = vadd.f32 1.0, %v3686_v11 }
0x1a1c   :  { %3689 = vrcp.f32 %v2400_v24 }
0x1a20   :  { %v3688_v33 = vpop.eup %3687 }
0x1a21   :  { %v2408_v35 = vmul.f32 %v3688_v33, %v2406_v25 }
0x1a23   :  { %v2409_v41 = vadd.f32 %v2408_v35, %v2403_v37 }
0x1a25   :  { %3691 = vtanh.f32 %v2409_v41 }
0x1a26   :  { %v3690_v34 = vpop.eup %3689 }
0x1a27   :  { %v2411_v43 = vsub.f32 1.0, %v3690_v34  ;;  %v2416_v44 = vmul.f32 %v3690_v34, %v2414_v48 }
0x1a2f   :  { %v3692_v39 = vpop.eup %3691 }
0x1a30   :  { %v2412_v9 = vmul.f32 %v3692_v39, %v2411_v43 }
0x1a32   :  { %v4498_v30 = vadd.f32 %v2416_v44, %v2412_v9 }
0x1a34   :  { %v2428_v46 = vpack.c.bf16 %v4498_v30, %v4498_v30  ;;  %v2531_v48 = vrot.slane %v4498_v30, 7 }
0x1a36   :  { %v2430_v49 = vrot.slane %v2428_v46, 1 }
0x1a38   :  { %3250 = vmatmul.mubr.msk.bf16.vlgmr.msra.gmra.mrb[56].mxu0 %vm1023_vm5, %v2430_v49 }
0x1a39   :  { %2671 = vmatpush1.bf16.msra.mxu0 %v4297_v1  ;;  %2702 = vmatprep.mubr.bf16.mxu0 %v3819_v61 }
0x1a3a   :  { %2672 = vmatprep.subr.bf16.mxu0 %v4300_v2 }
0x1a3d   :  { %2673 = vmatpush1.bf16.msra.mxu0 %v4304_v3 }
0x1a3e   :  { %2674 = vmatprep.subr.bf16.mxu0 %v4308_v4 }
0x1a41   :  { %2675 = vmatpush1.bf16.msra.mxu0 %v4312_v5 }
0x1a42   :  { %2676 = vmatprep.subr.bf16.mxu0 %v4316_v6 }
0x1a45   :  { %2677 = vmatpush1.bf16.msra.mxu0 %v4320_v7 }
0x1a46   :  { %2906 = vmatprep.subr.bf16.mxu0 %v4291_v0  ;;  %v2477_v0 = vpop.permute.xlu1 %2476 }
0x1a47   :  { %v2479_v40 = vsel %vm230_vm0, %v4385_v63, %v2477_v0  ;;  %v2520_v41 = vsel %vm230_vm0, %v2477_v0, %v2424_v29 }
0x1b0b   :  { %v2468_v8 = vpop.f32.mrb[56].mxu0 }
0x1b0c   :  { %v2469_v38 = vadd.f32 %v2468_v8, %v4393_v19  ;;  %v2470_v50 = vpop.f32.mrb[57].mxu0 }
0x1b0d   :  { %v2471_v51 = vadd.f32 %v2470_v50, %v4421_v42  ;;  %v2472_v47 = vpop.f32.mrb[58].mxu0 }
0x1b0e   :  { %v2473_v52 = vpop.f32.mrb[59].mxu0  ;;  %2481 = vrot.lane.b32.xlu0 %v2469_v38, %s3817_s17 }
0x1b0f   :  { %2506 = vrot.lane.b32.xlu1 %v2471_v51, %s3820_s20 }
0x1b12   :  { %2502 = vrot.lane.b32.xlu0 %v2469_v38, %s3814_s5 }
0x1b13   :  { %2498 = vrot.lane.b32.xlu1 %v2424_v29, %s3820_s20 }
0x1b16   :  { %2495 = vrot.lane.b32.xlu0 %v4385_v63, %s3814_s5 }
0x1b17   :  { %2597 = vrot.lane.b32.xlu1 %v4396_v20, %s3817_s17 }
0x1b80   :  { %v2482_v36 = vpop.permute.xlu0 %2481 }
0x1b81   :  { %v2484_v53 = vsel %vm230_vm0, %v2469_v38, %v2482_v36  ;;  %v2507_v55 = vpop.permute.xlu1 %2506  ;;  %v2521_v24 = vsel %vm230_vm0, %v2482_v36, %v2471_v51 }
0x1b82   :  { %v2486_v54 = vrot.slane %v2484_v53, 5  ;;  %v2523_v33 = vrot.slane %v2521_v24, 5 }
0x1b84   :  { %v2488_v56 = vadd.f32 %v2486_v54, %v2479_v40  ;;  %v2503_v58 = vpop.permute.xlu0 %2502 }
0x1b85   :  { %v2509_v57 = vsel %vm230_vm0, %v2503_v58, %v2507_v55  ;;  %v2499_v32 = vpop.permute.xlu1 %2498 }
0x1b86   :  { %v2489_v31 = vsub.f32 0.0, %v2488_v56  ;;  %v2511_v59 = vrot.slane %v2509_v57, 5 }
0x1b88   :  { %v2490_v60 = vmul.f32 1.442695, %v2489_v31  ;;  %v2496_v10 = vpop.permute.xlu0 %2495 }
0x1b89   :  { %v2501_v12 = vsel %vm230_vm0, %v2496_v10, %v2499_v32  ;;  %v2598_v55 = vpop.permute.xlu1 %2597 }
0x1b8a   :  { %3693 = vpow2.f32 %v2490_v60  ;;  %v2513_v14 = vadd.f32 %v2511_v59, %v2501_v12  ;;  %v2600_v31 = vsel %vm230_vm0, %v4396_v20, %v2598_v55 }
0x1b8c   :  { %v2514_v16 = vsub.f32 0.0, %v2513_v14 }
0x1b8e   :  { %v2515_v18 = vmul.f32 1.442695, %v2514_v16 }
0x1b90   :  { %3695 = vpow2.f32 %v2515_v18 }
0x1b94   :  { %v3694_v11 = vpop.eup %3693 }
0x1b95   :  { %v2492_v21 = vadd.f32 1.0, %v3694_v11 }
0x1b97   :  { %3697 = vrcp.f32 %v2492_v21 }
0x1b9a   :  { %v3696_v63 = vpop.eup %3695 }
0x1b9b   :  { %v2517_v25 = vadd.f32 1.0, %v3696_v63 }
0x1b9d   :  { %3699 = vrcp.f32 %v2517_v25 }
0x1ba1   :  { %v3698_v35 = vpop.eup %3697 }
0x1ba2   :  { %v2525_v37 = vmul.f32 %v3698_v35, %v2523_v33 }
0x1ba4   :  { %v2526_v34 = vadd.f32 %v2525_v37, %v2520_v41 }
0x1ba6   :  { %3701 = vtanh.f32 %v2526_v34 }
0x1ba7   :  { %v3700_v43 = vpop.eup %3699 }
0x1ba8   :  { %v2528_v39 = vsub.f32 1.0, %v3700_v43  ;;  %v2533_v44 = vmul.f32 %v3700_v43, %v2531_v48  ;;  %v2641_v48 = vsel %vm230_vm0, %v2598_v55, %v4389_v17 }
0x1bb0   :  { %v3702_v9 = vpop.eup %3701 }
0x1bb1   :  { %v2529_v46 = vmul.f32 %v3702_v9, %v2528_v39 }
0x1bb3   :  { %v4536_v49 = vadd.f32 %v2533_v44, %v2529_v46 }
0x1bb5   :  { %v2543_v8 = vpack.c.bf16 %v4536_v49, %v4536_v49  ;;  %v2652_v46 = vrot.slane %v4536_v49, 7 }
0x1bb7   :  { %v2545_v38 = vshrl.u32 %v2543_v8, 16  ;;  %v2548_v50 = vshll.u32 %v2543_v8, 16 }
0x1bb9   :  { %v2547_v51 = vrot.slane %v2545_v38, 1  ;;  %v2550_v47 = vrot.slane %v2548_v50, 2 }
0x1bbb   :  { %v2551_v52 = vor.u32 %v2550_v47, %v2547_v51 }
0x1bbd   :  { %3251 = vmatmul.mubr.msk.bf16.vlgmr.msra.gmra.mrb[56].mxu1 %vm1023_vm5, %v2551_v52 }
0x1bbe   :  { %2792 = vmatpush1.bf16.msra.mxu1 %v4297_v1  ;;  %2823 = vmatprep.mubr.bf16.mxu1 %v3819_v61 }
0x1bbf   :  { %2793 = vmatprep.subr.bf16.mxu1 %v4300_v2 }
0x1bc2   :  { %2794 = vmatpush1.bf16.msra.mxu1 %v4304_v3 }
0x1bc3   :  { %2795 = vmatprep.subr.bf16.mxu1 %v4308_v4 }
0x1bc6   :  { %2796 = vmatpush1.bf16.msra.mxu1 %v4312_v5 }
0x1bc7   :  { %2797 = vmatprep.subr.bf16.mxu1 %v4316_v6 }
0x1bca   :  { %2798 = vmatpush1.bf16.msra.mxu1 %v4320_v7 }
0x1bcb   :  { %3494 = vmatprep.subr.bf16.mxu1 %v3811_v15 }
0x1c90   :  { %v2589_v30 = vpop.f32.mrb[56].mxu1 }
0x1c91   :  { %v2590_v29 = vadd.f32 %v2589_v30, %v4393_v19  ;;  %v2591_v0 = vpop.f32.mrb[57].mxu1 }
0x1c92   :  { %v2592_v36 = vadd.f32 %v2591_v0, %v4421_v42  ;;  %v2593_v53 = vpop.f32.mrb[58].mxu1 }
0x1c93   :  { %v2594_v54 = vpop.f32.mrb[59].mxu1  ;;  %2602 = vrot.lane.b32.xlu0 %v2590_v29, %s3817_s17 }
0x1c94   :  { %2627 = vrot.lane.b32.xlu1 %v2592_v36, %s3820_s20 }
0x1c97   :  { %2623 = vrot.lane.b32.xlu0 %v2590_v29, %s3814_s5 }
0x1c98   :  { %2619 = vrot.lane.b32.xlu1 %v4389_v17, %s3820_s20 }
0x1c9b   :  { %2616 = vrot.lane.b32.xlu0 %v4396_v20, %s3814_s5 }
0x1c9c   :  { %2712 = vrot.lane.b32.xlu1 %v4403_v23, %s3817_s17 }
0x1d05   :  { %v2603_v40 = vpop.permute.xlu0 %2602 }
0x1d06   :  { %v2605_v56 = vsel %vm230_vm0, %v2590_v29, %v2603_v40  ;;  %v2628_v57 = vpop.permute.xlu1 %2627  ;;  %v2642_v35 = vsel %vm230_vm0, %v2603_v40, %v2592_v36 }
0x1d07   :  { %v2607_v58 = vrot.slane %v2605_v56, 4  ;;  %v2644_v41 = vrot.slane %v2642_v35, 4 }
0x1d09   :  { %v2609_v60 = vadd.f32 %v2607_v58, %v2600_v31  ;;  %v2624_v59 = vpop.permute.xlu0 %2623 }
0x1d0a   :  { %v2630_v32 = vsel %vm230_vm0, %v2624_v59, %v2628_v57  ;;  %v2620_v16 = vpop.permute.xlu1 %2619 }
0x1d0b   :  { %v2610_v10 = vsub.f32 0.0, %v2609_v60  ;;  %v2632_v14 = vrot.slane %v2630_v32, 4 }
0x1d0d   :  { %v2611_v12 = vmul.f32 1.442695, %v2610_v10  ;;  %v2617_v18 = vpop.permute.xlu0 %2616 }
0x1d0e   :  { %v2622_v11 = vsel %vm230_vm0, %v2617_v18, %v2620_v16 }
0x1d0f   :  { %3703 = vpow2.f32 %v2611_v12  ;;  %v2634_v21 = vadd.f32 %v2632_v14, %v2622_v11 }
0x1d11   :  { %v2635_v63 = vsub.f32 0.0, %v2634_v21 }
0x1d13   :  { %v2636_v24 = vmul.f32 1.442695, %v2635_v63 }
0x1d15   :  { %3705 = vpow2.f32 %v2636_v24 }
0x1d19   :  { %v3704_v25 = vpop.eup %3703 }
0x1d1a   :  { %v2613_v33 = vadd.f32 1.0, %v3704_v25 }
0x1d1c   :  { %3707 = vrcp.f32 %v2613_v33 }
0x1d1f   :  { %v3706_v20 = vpop.eup %3705 }
0x1d20   :  { %v2638_v37 = vadd.f32 1.0, %v3706_v20 }
0x1d22   :  { %3709 = vrcp.f32 %v2638_v37 }
0x1d26   :  { %v3708_v34 = vpop.eup %3707 }
0x1d27   :  { %v2646_v43 = vmul.f32 %v3708_v34, %v2644_v41 }
0x1d29   :  { %v2647_v39 = vadd.f32 %v2646_v43, %v2641_v48 }
0x1d2b   :  { %3711 = vtanh.f32 %v2647_v39 }
0x1d2c   :  { %v3710_v9 = vpop.eup %3709 }
0x1d2d   :  { %v2649_v44 = vsub.f32 1.0, %v3710_v9  ;;  %v2654_v50 = vmul.f32 %v3710_v9, %v2652_v46 }
0x1d35   :  { %v3712_v8 = vpop.eup %3711 }
0x1d36   :  { %v2650_v38 = vmul.f32 %v3712_v8, %v2649_v44 }
0x1d38   :  { %v2655_v51 = vadd.f32 %v2654_v50, %v2650_v38 }
0x1d3a   :  { %v2664_v47 = vpack.c.bf16 %v2655_v51, %v2655_v51  ;;  %v2767_v25 = vrot.slane %v2655_v51, 7 }
0x1d3c   :  { %v2666_v52 = vrot.slane %v2664_v47, 2 }
0x1d3e   :  { %3252 = vmatmul.mubr.msk.bf16.vlgmr.msra.gmra.mrb[60].mxu0 %vm1023_vm5, %v2666_v52 }
0x1d3f   :  { %2907 = vmatpush1.bf16.msra.mxu0 %v4297_v1  ;;  %2938 = vmatprep.mubr.bf16.mxu0 %v3819_v61 }
0x1d40   :  { %2908 = vmatprep.subr.bf16.mxu0 %v4300_v2  ;;  %v2713_v2 = vpop.permute.xlu1 %2712 }
0x1d41   :  { %v2756_v21 = vsel %vm230_vm0, %v2713_v2, %v4400_v22 }
0x1d43   :  { %2909 = vmatpush1.bf16.msra.mxu0 %v4304_v3 }
0x1d44   :  { %2910 = vmatprep.subr.bf16.mxu0 %v4308_v4 }
0x1d47   :  { %2911 = vmatpush1.bf16.msra.mxu0 %v4312_v5 }
0x1d48   :  { %2912 = vmatprep.subr.bf16.mxu0 %v4316_v6 }
0x1d4b   :  { %2913 = vmatpush1.bf16.msra.mxu0 %v4320_v7  ;;  %v2715_v7 = vsel %vm230_vm0, %v4403_v23, %v2713_v2 }
0x1e11   :  { %v2704_v17 = vpop.f32.mrb[60].mxu0 }
0x1e12   :  { %v2705_v49 = vadd.f32 %v2704_v17, %v4393_v19  ;;  %v2706_v30 = vpop.f32.mrb[61].mxu0 }
0x1e13   :  { %v2707_v1 = vadd.f32 %v2706_v30, %v4421_v42  ;;  %v2708_v29 = vpop.f32.mrb[62].mxu0 }
0x1e14   :  { %v2709_v61 = vpop.f32.mrb[63].mxu0  ;;  %2717 = vrot.lane.b32.xlu0 %v2705_v49, %s3817_s17 }
0x1e15   :  { %2742 = vrot.lane.b32.xlu1 %v2707_v1, %s3820_s20 }
0x1e18   :  { %2738 = vrot.lane.b32.xlu0 %v2705_v49, %s3814_s5 }
0x1e19   :  { %2734 = vrot.lane.b32.xlu1 %v4400_v22, %s3820_s20 }
0x1e1c   :  { %2731 = vrot.lane.b32.xlu0 %v4403_v23, %s3814_s5 }
0x1e1d   :  { %2833 = vrot.lane.b32.xlu1 %v4408_v13, %s3817_s17 }
0x1e86   :  { %v2718_v3 = vpop.permute.xlu0 %2717 }
0x1e87   :  { %v2720_v4 = vsel %vm230_vm0, %v2705_v49, %v2718_v3  ;;  %v2743_v6 = vpop.permute.xlu1 %2742  ;;  %v2757_v12 = vsel %vm230_vm0, %v2718_v3, %v2707_v1 }
0x1e88   :  { %v2722_v5 = vrot.slane %v2720_v4, 3  ;;  %v2759_v16 = vrot.slane %v2757_v12, 3 }
0x1e8a   :  { %v2724_v0 = vadd.f32 %v2722_v5, %v2715_v7  ;;  %v2739_v36 = vpop.permute.xlu0 %2738 }
0x1e8b   :  { %v2745_v53 = vsel %vm230_vm0, %v2739_v36, %v2743_v6  ;;  %v2735_v56 = vpop.permute.xlu1 %2734 }
0x1e8c   :  { %v2725_v54 = vsub.f32 0.0, %v2724_v0  ;;  %v2747_v40 = vrot.slane %v2745_v53, 3 }
0x1e8e   :  { %v2726_v55 = vmul.f32 1.442695, %v2725_v54  ;;  %v2732_v58 = vpop.permute.xlu0 %2731 }
0x1e8f   :  { %v2737_v57 = vsel %vm230_vm0, %v2732_v58, %v2735_v56  ;;  %v2834_v47 = vpop.permute.xlu1 %2833 }
0x1e90   :  { %3713 = vpow2.f32 %v2726_v55  ;;  %v2749_v31 = vadd.f32 %v2747_v40, %v2737_v57  ;;  %v2836_v1 = vsel %vm230_vm0, %v4408_v13, %v2834_v47 }
0x1e92   :  { %v2750_v60 = vsub.f32 0.0, %v2749_v31 }
0x1e94   :  { %v2751_v59 = vmul.f32 1.442695, %v2750_v60 }
0x1e96   :  { %3715 = vpow2.f32 %v2751_v59  ;;  %v2877_v59 = vsel %vm230_vm0, %v2834_v47, %v4405_v26 }
0x1e9a   :  { %v3714_v32 = vpop.eup %3713 }
0x1e9b   :  { %v2728_v10 = vadd.f32 1.0, %v3714_v32 }
0x1e9d   :  { %3717 = vrcp.f32 %v2728_v10 }
0x1ea0   :  { %v3716_v23 = vpop.eup %3715 }
0x1ea1   :  { %v2753_v14 = vadd.f32 1.0, %v3716_v23 }
0x1ea3   :  { %3719 = vrcp.f32 %v2753_v14 }
0x1ea7   :  { %v3718_v18 = vpop.eup %3717 }
0x1ea8   :  { %v2761_v11 = vmul.f32 %v3718_v18, %v2759_v16 }
0x1eaa   :  { %v2762_v63 = vadd.f32 %v2761_v11, %v2756_v21 }
0x1eac   :  { %3721 = vtanh.f32 %v2762_v63 }
0x1ead   :  { %v3720_v24 = vpop.eup %3719 }
0x1eae   :  { %v2764_v33 = vsub.f32 1.0, %v3720_v24  ;;  %v2769_v35 = vmul.f32 %v3720_v24, %v2767_v25 }
0x1eb6   :  { %v3722_v20 = vpop.eup %3721 }
0x1eb7   :  { %v2765_v37 = vmul.f32 %v3722_v20, %v2764_v33 }
0x1eb9   :  { %v2770_v41 = vadd.f32 %v2769_v35, %v2765_v37  ;;  %v3599_v35 = vld [vmem:[%s3990_s27] sm:$0xff]   ;;  %v3600_v37 = vld [vmem:[%s3990_s27 + $0x8] sm:$0xff]  }
0x1ebb   :  { %v2779_v34 = vpack.c.bf16 %v2770_v41, %v2770_v41  ;;  %v2888_v12 = vrot.slane %v2770_v41, 7  ;;  %v3601_v41 = vld [vmem:[%s3990_s27 + $0x10] sm:$0xff]  }
0x1ebd   :  { %v2781_v43 = vshrl.u32 %v2779_v34, 16  ;;  %v2784_v48 = vshll.u32 %v2779_v34, 16  ;;  %v3602_v34 = vld [vmem:[%s3990_s27 + $0x18] sm:$0xff]   ;;  %s3821_s27 = smov [#allocation2]  }
0x1ebe   :  { %s3131_s2 = sshll.u32 %s3821_s27, 4  ;;  %s3132_s2 = int_to_ptr.vmem [resolvable:$true] %s3131_s2 }
0x1ebf   :  { %v2783_v39 = vrot.slane %v2781_v43, 2  ;;  %v2786_v9 = vrot.slane %v2784_v48, 3  ;;  %s3753_s7 = scalar_lea.vmem %s3132_s2, 32  ;;  %p3758_p1 = scmp.lt.s32.totalorder %s3132_s2, %s3132_s2 }
0x1ec0   :  { %p3754_p0 = scmp.ne.s32.totalorder %s3132_s2, %s3753_s7  ;;  %p3759_p2 = scmp.lt.s32.totalorder %s3753_s7, %s3753_s7 }
0x1ec1   :  { %v2787_v44 = vor.u32 %v2786_v9, %v2783_v39 }
0x1ec2   :  { %p3760_p3 = por %p3759_p2, %p3758_p1 }
0x1ec3   :  { %3253 = vmatmul.mubr.msk.bf16.vlgmr.msra.gmra.mrb[60].mxu1 %vm1023_vm5, %v2787_v44 }
0x1ec4   :  { %3502 = vmatprep.mubr.msk.bf16.mxu1 %vm3812_vm1, %v3811_v15  ;;  %3495 = vmatpush3.bf16.msra.mxu1 %v3599_v35  ;;  %p3761_p4 = pnand %p3760_p3, %p3754_p0 }
0x1ec5   :  { %3496 = vmatprep.subr.bf16.mxu1 %v3811_v15 }
0x1ec8   :  { %3497 = vmatpush3.bf16.msra.mxu1 %v3600_v37 }
0x1ec9   :  { %3498 = vmatprep.subr.bf16.mxu1 %v3811_v15 }
0x1ecc   :  { %3499 = vmatpush3.bf16.msra.mxu1 %v3601_v41 }
0x1ecd   :  { %3500 = vmatprep.subr.bf16.mxu1 %v3811_v15 }
0x1ed0   :  { %3501 = vmatpush3.bf16.msra.mxu1 %v3602_v34 }
0x1f96   :  { %v2825_v22 = vpop.f32.mrb[60].mxu1 }
0x1f97   :  { %v2826_v46 = vadd.f32 %v2825_v22, %v4393_v19  ;;  %v2827_v8 = vpop.f32.mrb[61].mxu1 }
0x1f98   :  { %v2828_v38 = vadd.f32 %v2827_v8, %v4421_v42  ;;  %v2829_v50 = vpop.f32.mrb[62].mxu1 }
0x1f99   :  { %v2830_v51 = vpop.f32.mrb[63].mxu1  ;;  %2838 = vrot.lane.b32.xlu0 %v2826_v46, %s3817_s17 }
0x1f9a   :  { %2863 = vrot.lane.b32.xlu1 %v2828_v38, %s3820_s20 }
0x1f9d   :  { %2859 = vrot.lane.b32.xlu0 %v2826_v46, %s3814_s5 }
0x1f9e   :  { %2855 = vrot.lane.b32.xlu1 %v4405_v26, %s3820_s20 }
0x1fa1   :  { %2852 = vrot.lane.b32.xlu0 %v4408_v13, %s3814_s5 }
0x1fa2   :  { %2949 = vrot.lane.b32.xlu1 %v4411_v62, %s3817_s17 }
0x1fa6   :  { %2979 = vrot.lane.b32.xlu1 %v4411_v62, %s3814_s5 }
0x200b   :  { %v2839_v52 = vpop.permute.xlu0 %2838 }
0x200c   :  { %v2841_v17 = vsel %vm230_vm0, %v2826_v46, %v2839_v52  ;;  %v2864_v30 = vpop.permute.xlu1 %2863  ;;  %v2878_v56 = vsel %vm230_vm0, %v2839_v52, %v2828_v38 }
0x200d   :  { %v2843_v49 = vrot.slane %v2841_v17, 2  ;;  %v2880_v57 = vrot.slane %v2878_v56, 2 }
0x200f   :  { %v2845_v29 = vadd.f32 %v2843_v49, %v2836_v1  ;;  %v2860_v61 = vpop.permute.xlu0 %2859 }
0x2010   :  { %v2866_v2 = vsel %vm230_vm0, %v2860_v61, %v2864_v30  ;;  %v2856_v6 = vpop.permute.xlu1 %2855 }
0x2011   :  { %v2846_v3 = vsub.f32 0.0, %v2845_v29  ;;  %v2868_v5 = vrot.slane %v2866_v2, 2 }
0x2013   :  { %v2847_v4 = vmul.f32 1.442695, %v2846_v3  ;;  %v2853_v7 = vpop.permute.xlu0 %2852 }
0x2014   :  { %v2858_v0 = vsel %vm230_vm0, %v2853_v7, %v2856_v6 }
0x2015   :  { %3723 = vpow2.f32 %v2847_v4  ;;  %v2870_v36 = vadd.f32 %v2868_v5, %v2858_v0 }
0x2017   :  { %v2871_v53 = vsub.f32 0.0, %v2870_v36 }
0x2019   :  { %v2872_v54 = vmul.f32 1.442695, %v2871_v53 }
0x201b   :  { %3725 = vpow2.f32 %v2872_v54 }
0x201f   :  { %v3724_v55 = vpop.eup %3723 }
0x2020   :  { %v2849_v40 = vadd.f32 1.0, %v3724_v55 }
0x2022   :  { %3727 = vrcp.f32 %v2849_v40 }
0x2025   :  { %v3726_v13 = vpop.eup %3725 }
0x2026   :  { %v2874_v58 = vadd.f32 1.0, %v3726_v13 }
0x2028   :  { %3729 = vrcp.f32 %v2874_v58 }
0x202c   :  { %v3728_v31 = vpop.eup %3727 }
0x202d   :  { %v2882_v60 = vmul.f32 %v3728_v31, %v2880_v57 }
0x202f   :  { %v2883_v32 = vadd.f32 %v2882_v60, %v2877_v59 }
0x2031   :  { %3731 = vtanh.f32 %v2883_v32 }
0x2032   :  { %v3730_v10 = vpop.eup %3729 }
0x2033   :  { %v2885_v23 = vsub.f32 1.0, %v3730_v10  ;;  %v2890_v18 = vmul.f32 %v3730_v10, %v2888_v12 }
0x203b   :  { %v3732_v14 = vpop.eup %3731 }
0x203c   :  { %v2886_v16 = vmul.f32 %v3732_v14, %v2885_v23 }
0x203e   :  { %v4622_v11 = vadd.f32 %v2890_v18, %v2886_v16 }
0x2040   :  { %v2900_v21 = vpack.c.bf16 %v4622_v11, %v4622_v11 }
0x2042   :  { %v2902_v63 = vrot.slane %v2900_v21, 3 }
0x2044   :  { %3254 = vmatmul.mubr.msk.bf16.vlgmr.msra.gmra.mrb[64].mxu0 %vm1023_vm5, %v2902_v63 }
0x2117   :  { %v2940_v24 = vpop.f32.mrb[64].mxu0 }
0x2118   :  { %v2941_v26 = vadd.f32 %v2940_v24, %v4393_v19  ;;  %v2942_v25 = vpop.f32.mrb[65].mxu0 }
0x2119   :  { %v2944_v33 = vpop.f32.mrb[66].mxu0  ;;  %v2943_v19 = vadd.f32 %v2942_v25, %v4421_v42  ;;  %v2950_v42 = vpop.permute.xlu1 %2949 }
0x211a   :  { %v2945_v20 = vpop.f32.mrb[67].mxu0  ;;  %2993 = vrot.lane.b32.xlu1 %v2941_v26, %s3814_s5  ;;  %2958 = vrot.lane.b32.xlu0 %v2941_v26, %s3817_s17  ;;  %v2955_v44 = vsel %vm230_vm0, %v4411_v62, %v2950_v42  ;;  %v3018_v59 = vsel %vm230_vm0, %v2950_v42, %v4515_v28 }
0x211d   :  { %v2980_v39 = vpop.permute.xlu1 %2979 }
0x211e   :  { %2985 = vrot.lane.b32.xlu1 %v4515_v28, %s3820_s20  ;;  %2951 = vrot.lane.b32.xlu0 %v4414_v27, %s3817_s17 }
0x2122   :  { %2981 = vrot.lane.b32.xlu0 %v4414_v27, %s3814_s5 }
0x2126   :  { %2997 = vrot.lane.b32.xlu0 %v2943_v19, %s3820_s20 }
0x212a   :  { %2987 = vrot.lane.b32.xlu0 %v4352_v45, %s3820_s20 }
0x218c   :  { %v2959_v43 = vpop.permute.xlu0 %2958  ;;  %v2994_v38 = vpop.permute.xlu1 %2993 }
0x218d   :  { %v2961_v48 = vsel %vm230_vm0, %v2941_v26, %v2959_v43  ;;  %v3020_v55 = vsel %vm230_vm0, %v2959_v43, %v2943_v19  ;;  %v3035_v26 = vrot.slane %v4622_v11, 7 }
0x218e   :  { %v2963_v9 = vrot.slane %v2961_v48, 1  ;;  %v3022_v13 = vrot.slane %v3020_v55, 1 }
0x2190   :  { %v2965_v22 = vadd.f32 %v2963_v9, %v2955_v44  ;;  %v2952_v46 = vpop.permute.xlu0 %2951  ;;  %v2986_v49 = vpop.permute.xlu1 %2985 }
0x2191   :  { %v2956_v8 = vsel %vm230_vm0, %v4414_v27, %v2952_v46  ;;  %v2991_v62 = vsel %vm230_vm0, %v2980_v39, %v2986_v49  ;;  %v3019_v12 = vsel %vm230_vm0, %v2952_v46, %v4352_v45  ;;  %v3255_v39 = vld [vmem:[%s3995_s4] ss:$0 sm:$0xff] }
0x2192   :  { %v2967_v50 = vsub.f32 0.0, %v2965_v22  ;;  %v2966_v51 = vadd.f32 %v2963_v9, %v2956_v8 }
0x2194   :  { %v2969_v47 = vmul.f32 1.442695, %v2967_v50  ;;  %v2968_v15 = vsub.f32 0.0, %v2966_v51  ;;  %v2982_v52 = vpop.permute.xlu0 %2981 }
0x2196   :  { %3733 = vpow2.f32 %v2969_v47  ;;  %v2971_v17 = vmul.f32 1.442695, %v2968_v15 }
0x2198   :  { %3735 = vpow2.f32 %v2971_v17  ;;  %v2998_v30 = vpop.permute.xlu0 %2997 }
0x2199   :  { %v3000_v1 = vsel %vm230_vm0, %v2994_v38, %v2998_v30 }
0x219a   :  { %v3002_v29 = vrot.slane %v3000_v1, 1 }
0x219c   :  { %v3004_v61 = vadd.f32 %v3002_v29, %v2991_v62  ;;  %v2988_v2 = vpop.permute.xlu0 %2987 }
0x219d   :  { %v2992_v27 = vsel %vm230_vm0, %v2982_v52, %v2988_v2 }
0x219e   :  { %v3006_v3 = vsub.f32 0.0, %v3004_v61  ;;  %v3005_v4 = vadd.f32 %v3002_v29, %v2992_v27 }
0x21a0   :  { %v3734_v5 = vpop.eup %3733  ;;  %v3008_v6 = vmul.f32 1.442695, %v3006_v3  ;;  %v3007_v7 = vsub.f32 0.0, %v3005_v4 }
0x21a1   :  { %v2973_v0 = vadd.f32 1.0, %v3734_v5 }
0x21a2   :  { %v3736_v36 = vpop.eup %3735  ;;  %3737 = vpow2.f32 %v3008_v6  ;;  %v3010_v53 = vmul.f32 1.442695, %v3007_v7 }
0x21a3   :  { %3739 = vrcp.f32 %v2973_v0  ;;  %v2974_v54 = vadd.f32 1.0, %v3736_v36 }
0x21a4   :  { %3741 = vpow2.f32 %v3010_v53 }
0x21a5   :  { %3743 = vrcp.f32 %v2974_v54 }
0x21ac   :  { %v3738_v40 = vpop.eup %3737 }
0x21ad   :  { %v3740_v56 = vpop.eup %3739  ;;  %v3012_v58 = vadd.f32 1.0, %v3738_v40 }
0x21ae   :  { %v3742_v57 = vpop.eup %3741  ;;  %v3024_v31 = vmul.f32 %v3740_v56, %v3022_v13 }
0x21af   :  { %v3744_v60 = vpop.eup %3743  ;;  %3745 = vrcp.f32 %v3012_v58  ;;  %v3013_v32 = vadd.f32 1.0, %v3742_v57 }
0x21b0   :  { %v3026_v10 = vadd.f32 %v3024_v31, %v3018_v59  ;;  %v3025_v23 = vmul.f32 %v3744_v60, %v3022_v13 }
0x21b1   :  { %3747 = vrcp.f32 %v3013_v32 }
0x21b2   :  { %3749 = vtanh.f32 %v3026_v10  ;;  %v3027_v14 = vadd.f32 %v3025_v23, %v3019_v12 }
0x21b4   :  { %3751 = vtanh.f32 %v3027_v14 }
0x21b9   :  { %v3746_v16 = vpop.eup %3745 }
0x21ba   :  { %v3030_v18 = vsub.f32 1.0, %v3746_v16  ;;  %v3037_v33 = vmul.f32 %v3746_v16, %v3035_v26 }
0x21bb   :  { %v3748_v21 = vpop.eup %3747 }
0x21bc   :  { %v3750_v63 = vpop.eup %3749  ;;  %v3031_v24 = vsub.f32 1.0, %v3748_v21  ;;  %v3038_v20 = vmul.f32 %v3748_v21, %v3035_v26 }
0x21bd   :  { %v3032_v28 = vmul.f32 %v3750_v63, %v3030_v18 }
0x21be   :  { %v3752_v25 = vpop.eup %3751 }
0x21bf   :  { %v3033_v19 = vmul.f32 %v3752_v25, %v3031_v24  ;;  %v3039_v35 = vadd.f32 %v3037_v33, %v3032_v28 }
0x21c1   :  { %v3040_v37 = vadd.f32 %v3038_v20, %v3033_v19 }
0x21c3   :  { %v3041_v45 = vpack.c.bf16 %v3040_v37, %v3039_v35 }
0x21c5   :  { %v3049_v41 = vshrl.u32 %v3041_v45, 16  ;;  %v3052_v34 = vshll.u32 %v3041_v45, 16 }
0x21c7   :  { %v3051_v42 = vrot.slane %v3049_v41, 3  ;;  %v3054_v43 = vrot.slane %v3052_v34, 4 }
0x21c9   :  { %v3055_v48 = vor.u32 %v3054_v43, %v3051_v42 }
0x21cb   :  { %3503 = vmatmul.mubr.msk.bf16.vlgmr.msra.gmra.mrb[64].mxu1 %vm1023_vm5, %v3055_v48 }
0x229e   :  { %v3117_v9 = vpop.f32.mrb[64].mxu1 }
0x229f   :  { %v3118_v11 = vadd.f32 %v3255_v39, %v3117_v9  ;;  %v3504_v44 = vpop.f32.mrb[65].mxu1 }
0x22a0   :  { %v3120_v22 = vpop.f32.mrb[66].mxu1 }
0x22a1   :  { %v3505_v46 = vpop.f32.mrb[67].mxu1  ;;  %3124 = vst.msk [vmem:[#allocation2] sm:$0x3] %vm3123_vm14, %v3118_v11 }
0x22a2   :  { %3764 = shalt.err (!%p3761_p4)
}
0x22a3   :  { %s3765_s4 = scalar_lea.hbm %s4000_s12, 32 }
0x22a4   :  { %p3766_p5 = scmp.ne.s32.totalorder %s4000_s12, %s3765_s4  ;;  %p3769_p6 = scmp.lt.u32.totalorder %s3765_s4, %s4000_s12 }
0x22a6   :  { %p3771_p7 = pnand %p3769_p6, %p3766_p5 }
0x22a8   :  { %3774 = shalt.err (!%p3771_p7)
}
0x22a9   :  { %3134 = dma.vmem_to_hbm [thread:$0]  %s3132_s2, 32, %s4000_s12, [#allocation3]  }
0x22aa   :  { %3775 = dma.done.wait [#allocation3], 32  }
0x22ab   :  { %3776 = vsyncadd [#allocation3], 4294967264 }
0x22ac   :  { %3138 = vsyncpa [#allocation3], 1 }

</bundles_post_ra>
